<compile_context>
chip_gen: v5e
topology: v5e:2x2
jax: 0.10.0
libtpu: 0.0.40
codegen_flags: <defaults>
</compile_context>

<pallas_src>
from collections import OrderedDict
import math
import re

import jax
import jax.numpy as jnp
from jax import lax
from jax.experimental import pallas as pl
from jax.experimental.pallas import tpu as pltpu


_MIN_PALLAS_BYTES = 512 * 1024          # below this, fused XLA beats a pallas_call launch
_TARGET_TILE_BYTES = 8 * 1024 * 1024    # per-buffer streaming tile target
_MAX_TR = 1024                          # rows per tile cap
_MAX_TC = 32768                         # reduced cols per tile cap (bounds generated code)
_VMEM_LIMIT = 48 * 1024 * 1024          # fits v7x 64 MiB VMEM; 2 x 8 MiB buffers + slack
_SUBLANE_PACK = {4: 8, 2: 16, 1: 32}    # sublane tile per itemsize


def _round_up(x, m):
    return ((x + m - 1) // m) * m


def _round_down(x, m):
    return (x // m) * m


# ------------------- trailing-reduction kernel (common case) -----------------
def _make_l2sq_trailing_kernel(C, TR, TC, row_blk):
    """kernel(x_ref, out_ref): lane-dense per-row sum-of-squares accumulation."""
    n_chunks = TC // 128
    ct = pl.cdiv(C, TC)                  # total column tiles over the whole C axis
    pad = (C % TC) != 0
    rem = C - (ct - 1) * TC              # valid columns in the globally-last tile
    full_last = rem // 128
    part_last = rem % 128
    n_groups = TR // row_blk

    def _accum(x_ref, out_ref, n_full, n_part):
        def body(g, carry):
            off = g * row_blk
            if not isinstance(off, int):
                off = pl.multiple_of(off, row_blk)
            acc = out_ref[pl.ds(off, row_blk), :]
            for j in range(n_full):                           # static unroll, VPU only
                v = x_ref[pl.ds(off, row_blk), pl.ds(j * 128, 128)].astype(jnp.float32)
                acc = acc + v * v
            if n_part:                                        # only on the last C tile
                v = x_ref[pl.ds(off, row_blk),
                          pl.ds(n_full * 128, 128)].astype(jnp.float32)
                lane = jax.lax.broadcasted_iota(jnp.int32, (1, 128), 1)
                v = jnp.where(lane < n_part, v, 0.0)
                acc = acc + v * v
            out_ref[pl.ds(off, row_blk), :] = acc
            return carry

        if n_groups == 1:
            body(0, 0)
        else:
            lax.fori_loop(0, n_groups, body, 0)

    def kernel(x_ref, out_ref):
        ci = pl.program_id(2)

        @pl.when(ci == 0)
        def _():
            out_ref[...] = jnp.zeros_like(out_ref)

        if not pad:
            _accum(x_ref, out_ref, n_chunks, 0)
        else:
            co = pl.program_id(1)
            is_last = jnp.logical_and(co == pl.num_programs(1) - 1,
                                      ci == pl.num_programs(2) - 1)

            @pl.when(jnp.logical_not(is_last))
            def _():
                _accum(x_ref, out_ref, n_chunks, 0)

            @pl.when(is_last)
            def _():
                _accum(x_ref, out_ref, full_last, part_last)

    return kernel


def _l2_norm_mean_trailing(x2d, R, C):
    """mean over rows of the per-row L2 norm of x2d (shape (R, C), native dtype)."""
    itemsize = x2d.dtype.itemsize
    sub = _SUBLANE_PACK.get(itemsize, 8)
    TR = min(_round_up(R, sub), _MAX_TR)
    tc_budget = max(128, _round_down(_TARGET_TILE_BYTES // (TR * itemsize), 128))
    TC = min(_round_up(C, 128), tc_budget, _MAX_TC)
    nr = pl.cdiv(R, TR)
    ct = pl.cdiv(C, TC)
    # Split the reduction across both v7x TensorCores when R offers no parallelism.
    nco = 2 if (nr == 1 and ct >= 4 and ct % 2 == 0) else 1
    nci = ct // nco

    partials = pl.pallas_call(
        _make_l2sq_trailing_kernel(C, TR, TC, sub),
        out_shape=jax.ShapeDtypeStruct((nr * TR, nco * 128), jnp.float32),
        grid_spec=pltpu.PrefetchScalarGridSpec(
            num_scalar_prefetch=0,
            grid=(nr, nco, nci),
            in_specs=[pl.BlockSpec((TR, TC), lambda r, co, ci: (r, co * nci + ci))],
            out_specs=pl.BlockSpec((TR, 128), lambda r, co, ci: (r, co)),
        ),
        compiler_params=pltpu.CompilerParams(
            dimension_semantics=("parallel", "parallel", "arbitrary"),
            vmem_limit_bytes=_VMEM_LIMIT,
        ),
    )(x2d)
    # Tiny finalize in XLA: 128*nco -> 1 lane reduce, drop padded rows, sqrt, mean.
    sumsq = jnp.sum(partials, axis=1)[:R]
    return jnp.mean(jnp.sqrt(sumsq))


# --------------- middle-axis reduction kernel (non-trailing dims) ------------
def _make_l2sq_middle_kernel(C, T_c):
    """kernel(x_ref, out_ref): per-(outer,inner) sum-of-squares over the middle axis."""
    ct = pl.cdiv(C, T_c)
    pad = (C % T_c) != 0
    base_last = (ct - 1) * T_c

    def _accum(x_ref, out_ref, masked):
        x = x_ref[...].astype(jnp.float32)                    # (T_ro, T_c, RI)
        if masked:
            mid = jax.lax.broadcasted_iota(jnp.int32, (1, x.shape[1], 1), 1) + base_last
            x = jnp.where(mid < C, x, 0.0)
        out_ref[...] += jnp.sum(x * x, axis=1)

    def kernel(x_ref, out_ref):
        ci = pl.program_id(1)

        @pl.when(ci == 0)
        def _():
            out_ref[...] = jnp.zeros_like(out_ref)

        if not pad:
            _accum(x_ref, out_ref, False)
        else:
            @pl.when(ci < ct - 1)
            def _():
                _accum(x_ref, out_ref, False)

            @pl.when(ci == ct - 1)
            def _():
                _accum(x_ref, out_ref, True)

    return kernel


def _l2_norm_mean_middle(x3d, RO, C, RI):
    itemsize = x3d.dtype.itemsize
    sub = _SUBLANE_PACK.get(itemsize, 8)
    T_ro = min(_round_up(RO, 8), 64,
               max(8, _round_down(_TARGET_TILE_BYTES // (sub * RI * itemsize), 8)))
    budget = _round_down(_TARGET_TILE_BYTES // (T_ro * RI * itemsize), sub)
    T_c = min(_round_up(C, sub), max(budget, sub))
    n_ro = pl.cdiv(RO, T_ro)
    n_c = pl.cdiv(C, T_c)

    sumsq = pl.pallas_call(
        _make_l2sq_middle_kernel(C, T_c),
        out_shape=jax.ShapeDtypeStruct((n_ro * T_ro, RI), jnp.float32),
        grid_spec=pltpu.PrefetchScalarGridSpec(
            num_scalar_prefetch=0,
            grid=(n_ro, n_c),
            in_specs=[pl.BlockSpec((T_ro, T_c, RI), lambda ro, ci: (ro, ci, 0))],
            out_specs=pl.BlockSpec((T_ro, RI), lambda ro, ci: (ro, 0)),
        ),
        compiler_params=pltpu.CompilerParams(
            dimension_semantics=("parallel", "arbitrary"),
            vmem_limit_bytes=_VMEM_LIMIT,
        ),
    )(x3d)
    return jnp.mean(jnp.sqrt(sumsq[:RO]))


# ------------------------------ glue (plain JAX) -----------------------------
def _xla_norm_mean(x, dim):
    return jnp.mean(jnp.sqrt(jnp.sum(jnp.square(x.astype(jnp.float32)), axis=dim)))


def _norm_mean(x, dim):
    """torch.norm(x, p=2, dim=dim).mean() for a single tensor."""
    ndim = x.ndim
    dim = tuple(sorted(set(d % ndim for d in dim)))
    if not dim:
        # TODO(synk): verify torch.norm(..., dim=[]) semantics; here it is mean(|x|).
        return jnp.mean(jnp.abs(x.astype(jnp.float32)))

    C = math.prod(x.shape[d] for d in dim)
    R = max(x.size // max(C, 1), 1)

    # Small tensors: a pallas_call launch costs more than the fused XLA reduction.
    if x.size * x.dtype.itemsize < _MIN_PALLAS_BYTES or C <= 1:
        return _xla_norm_mean(x, dim)

    itemsize = x.dtype.itemsize
    sub = _SUBLANE_PACK.get(itemsize, 8)

    if dim == tuple(range(ndim - len(dim), ndim)):
        # Reduction dims trailing (NCHW + dim=(1,2,3), FC + dim=(1,)): free reshape.
        return _l2_norm_mean_trailing(jnp.reshape(x, (R, C)), R, C)

    if dim == tuple(range(dim[0], dim[0] + len(dim))):
        # Contiguous middle block of reduce dims: (R_outer, C, R_inner) view; avoids
        # materializing an HBM transpose (which would ~3x the HBM traffic).
        RO = math.prod(x.shape[:dim[0]])
        RI = math.prod(x.shape[dim[-1] + 1:])
        if 8 * sub * RI * itemsize <= _TARGET_TILE_BYTES:
            return _l2_norm_mean_middle(jnp.reshape(x, (RO, C, RI)), RO, C, RI)

    # Non-contiguous reduce dims (rare): materialize the permutation.
    # TODO(synk): fold arbitrary permutations into the BlockSpec index_map to avoid the
    # extra HBM round-trip.
    keep = tuple(d for d in range(ndim) if d not in dim)
    x2d = jnp.reshape(jnp.transpose(x, keep + dim), (R, C))
    return _l2_norm_mean_trailing(x2d, R, C)


class LayerOutputNormsPallas:
    """JAX/Pallas port of LayerOutputNorms (p=2 only)."""

    def __init__(self, dim, p=2, name_regex=None):
        assert p == 2, "only p=2 (L2 norm) implemented"   # TODO(synk): general-p norms
        self.p = p
        self.dim = tuple(dim)
        self.regex = re.compile(name_regex) if name_regex is not None else None

    def __call__(self, input, layer_output):
        # TODO(synk): same-shape layer outputs could share one pallas_call via a batch
        # grid axis, but stacking would add an extra HBM copy for these bandwidth-bound
        # reductions; the XLA fallback already absorbs the small tensors.
        norms = OrderedDict()
        norms['input'] = _norm_mean(input, self.dim)
        for name, output in layer_output.items():
            if self.regex is not None and self.regex.match(name) is None:
                continue
            dim = self.dim
            if max(dim) >= output.ndim:
                dim = tuple(d for d in dim if d < output.ndim)
            norms[name] = _norm_mean(output, dim)
        return norms

    def __repr__(self):
        return 'LayerOutputNormsPallas(p={}, dim={})'.format(self.p, self.dim)


# --------------------------------- demo --------------------------------------
if __name__ == "__main__":
    key = jax.random.PRNGKey(0)
    k_in, k_c1, k_c2, k_p, k_fc, k_mid = jax.random.split(key, 6)

    # NCHW activations.  'input', conv1 and conv2 are large enough to take the Pallas
    # path (conv1 also exercises bf16 tiling + the 2-way TC reduction split; conv2
    # exercises the masked ragged last column tile); pool/fc use the XLA fallback.
    x = jax.random.normal(k_in, (4, 32, 64, 64), dtype=jnp.float32)
    layer_output = OrderedDict(
        conv1=jax.random.normal(k_c1, (4, 64, 64, 32), dtype=jnp.bfloat16),
        conv2=jax.random.normal(k_c2, (4, 36, 30, 50), dtype=jnp.float32),
        pool=jax.random.normal(k_p, (2, 4, 8, 8), dtype=jnp.float32),
        fc=jax.random.normal(k_fc, (2, 32), dtype=jnp.float32),   # dim filtered to (1,)
    )

    module = LayerOutputNormsPallas(dim=(1, 2, 3), p=2, name_regex=None)
    norms = module(x, layer_output)
    jax.block_until_ready(list(norms.values()))

    # Non-trailing (contiguous middle) reduction path: dim=(1, 2) on a 4-D tensor.
    x_mid = jax.random.normal(k_mid, (4, 16, 32, 128), dtype=jnp.float32)
    module_mid = LayerOutputNormsPallas(dim=(1, 2), p=2)
    norms_mid = module_mid(x_mid, OrderedDict())
    jax.block_until_ready(list(norms_mid.values()))

    # Correctness vs plain-JAX reference.
    def ref_norm_mean(t, dim):
        dim = tuple(d for d in dim if d < t.ndim)
        return jnp.mean(jnp.sqrt(jnp.sum(jnp.square(t.astype(jnp.float32)), axis=dim)))

    refs = OrderedDict()
    refs['input'] = ref_norm_mean(x, (1, 2, 3))
    for name, out in layer_output.items():
        refs[name] = ref_norm_mean(out, (1, 2, 3))

    for name in norms:
        assert jnp.allclose(norms[name], refs[name], rtol=1e-4, atol=1e-5), (
            name, norms[name], refs[name])
    assert jnp.allclose(norms_mid['input'], ref_norm_mean(x_mid, (1, 2)),
                        rtol=1e-4, atol=1e-5)

    print("KERNEL_OK")
</pallas_src>

<mosaic_0001>
module attributes {stable_mosaic.version = 11 : i64} {
  func.func @kernel(%arg0: i32, %arg1: i32, %arg2: i32, %arg3: memref<8x32768xf32, #tpu.memory_space<vmem>>, %arg4: memref<8x128xf32, #tpu.memory_space<vmem>>) attributes {dimension_semantics = [#tpu.dimension_semantics<parallel>, #tpu.dimension_semantics<parallel>, #tpu.dimension_semantics<arbitrary>], iteration_bounds = array<i64: 1, 2, 2>, scalar_prefetch = 0 : i64, scratch_operands = 0 : i64, tpu.core_type = #tpu.core_type<tc>, window_params = [{transform_indices = @transform_0, window_bounds = array<i64: 8, 32768>}, {transform_indices = @transform_1, window_bounds = array<i64: 8, 128>}]} {
    %c0_i32 = arith.constant 0 : i32
    %0 = arith.cmpi eq, %arg2, %c0_i32 : i32
    %1 = arith.extui %0 : i1 to i32
    %c0_i32_0 = arith.constant 0 : i32
    %2 = arith.cmpi ne, %1, %c0_i32_0 : i32
    scf.if %2 {
      %cst = arith.constant 0.000000e+00 : f32
      %773 = vector.broadcast %cst : f32 to vector<8x128xf32>
      %c0_261 = arith.constant 0 : index
      %c0_262 = arith.constant 0 : index
      %774 = vector.load %arg4[%c0_261, %c0_262] : memref<8x128xf32, #tpu.memory_space<vmem>>, vector<8x128xf32>
      tpu.vector_store %arg4[%c0_261, %c0_262], %773 {strides = array<i32>} : memref<8x128xf32, #tpu.memory_space<vmem>>, vector<8x128xf32>,
    } else {
    }
    %c0 = arith.constant 0 : index
    %c0_1 = arith.constant 0 : index
    %3 = vector.load %arg4[%c0, %c0_1] : memref<8x128xf32, #tpu.memory_space<vmem>>, vector<8x128xf32>
    %c0_2 = arith.constant 0 : index
    %c0_3 = arith.constant 0 : index
    %4 = vector.load %arg3[%c0_2, %c0_3] : memref<8x32768xf32, #tpu.memory_space<vmem>>, vector<8x128xf32>
    %5 = arith.mulf %4, %4 : vector<8x128xf32>
    %6 = arith.addf %3, %5 : vector<8x128xf32>
    %c0_4 = arith.constant 0 : index
    %c128 = arith.constant 128 : index
    %7 = vector.load %arg3[%c0_4, %c128] : memref<8x32768xf32, #tpu.memory_space<vmem>>, vector<8x128xf32>
    %8 = arith.mulf %7, %7 : vector<8x128xf32>
    %9 = arith.addf %6, %8 : vector<8x128xf32>
    %c0_5 = arith.constant 0 : index
    %c256 = arith.constant 256 : index
    %10 = vector.load %arg3[%c0_5, %c256] : memref<8x32768xf32, #tpu.memory_space<vmem>>, vector<8x128xf32>
    %11 = arith.mulf %10, %10 : vector<8x128xf32>
    %12 = arith.addf %9, %11 : vector<8x128xf32>
    %c0_6 = arith.constant 0 : index
    %c384 = arith.constant 384 : index
    %13 = vector.load %arg3[%c0_6, %c384] : memref<8x32768xf32, #tpu.memory_space<vmem>>, vector<8x128xf32>
    %14 = arith.mulf %13, %13 : vector<8x128xf32>
    %15 = arith.addf %12, %14 : vector<8x128xf32>
    %c0_7 = arith.constant 0 : index
    %c512 = arith.constant 512 : index
    %16 = vector.load %arg3[%c0_7, %c512] : memref<8x32768xf32, #tpu.memory_space<vmem>>, vector<8x128xf32>
    %17 = arith.mulf %16, %16 : vector<8x128xf32>
    %18 = arith.addf %15, %17 : vector<8x128xf32>
    %c0_8 = arith.constant 0 : index
    %c640 = arith.constant 640 : index
    %19 = vector.load %arg3[%c0_8, %c640] : memref<8x32768xf32, #tpu.memory_space<vmem>>, vector<8x128xf32>
    %20 = arith.mulf %19, %19 : vector<8x128xf32>
    %21 = arith.addf %18, %20 : vector<8x128xf32>
    %c0_9 = arith.constant 0 : index
    %c768 = arith.constant 768 : index
    %22 = vector.load %arg3[%c0_9, %c768] : memref<8x32768xf32, #tpu.memory_space<vmem>>, vector<8x128xf32>
    %23 = arith.mulf %22, %22 : vector<8x128xf32>
    %24 = arith.addf %21, %23 : vector<8x128xf32>
    %c0_10 = arith.constant 0 : index
    %c896 = arith.constant 896 : index
    %25 = vector.load %arg3[%c0_10, %c896] : memref<8x32768xf32, #tpu.memory_space<vmem>>, vector<8x128xf32>
    %26 = arith.mulf %25, %25 : vector<8x128xf32>
    %27 = arith.addf %24, %26 : vector<8x128xf32>
    %c0_11 = arith.constant 0 : index
    %c1024 = arith.constant 1024 : index
    %28 = vector.load %arg3[%c0_11, %c1024] : memref<8x32768xf32, #tpu.memory_space<vmem>>, vector<8x128xf32>
    %29 = arith.mulf %28, %28 : vector<8x128xf32>
    %30 = arith.addf %27, %29 : vector<8x128xf32>
    %c0_12 = arith.constant 0 : index
    %c1152 = arith.constant 1152 : index
    %31 = vector.load %arg3[%c0_12, %c1152] : memref<8x32768xf32, #tpu.memory_space<vmem>>, vector<8x128xf32>
    %32 = arith.mulf %31, %31 : vector<8x128xf32>
    %33 = arith.addf %30, %32 : vector<8x128xf32>
    %c0_13 = arith.constant 0 : index
    %c1280 = arith.constant 1280 : index
    %34 = vector.load %arg3[%c0_13, %c1280] : memref<8x32768xf32, #tpu.memory_space<vmem>>, vector<8x128xf32>
    %35 = arith.mulf %34, %34 : vector<8x128xf32>
    %36 = arith.addf %33, %35 : vector<8x128xf32>
    %c0_14 = arith.constant 0 : index
    %c1408 = arith.constant 1408 : index
    %37 = vector.load %arg3[%c0_14, %c1408] : memref<8x32768xf32, #tpu.memory_space<vmem>>, vector<8x128xf32>
    %38 = arith.mulf %37, %37 : vector<8x128xf32>
    %39 = arith.addf %36, %38 : vector<8x128xf32>
    %c0_15 = arith.constant 0 : index
    %c1536 = arith.constant 1536 : index
    %40 = vector.load %arg3[%c0_15, %c1536] : memref<8x32768xf32, #tpu.memory_space<vmem>>, vector<8x128xf32>
    %41 = arith.mulf %40, %40 : vector<8x128xf32>
    %42 = arith.addf %39, %41 : vector<8x128xf32>
    %c0_16 = arith.constant 0 : index
    %c1664 = arith.constant 1664 : index
    %43 = vector.load %arg3[%c0_16, %c1664] : memref<8x32768xf32, #tpu.memory_space<vmem>>, vector<8x128xf32>
    %44 = arith.mulf %43, %43 : vector<8x128xf32>
    %45 = arith.addf %42, %44 : vector<8x128xf32>
    %c0_17 = arith.constant 0 : index
    %c1792 = arith.constant 1792 : index
    %46 = vector.load %arg3[%c0_17, %c1792] : memref<8x32768xf32, #tpu.memory_space<vmem>>, vector<8x128xf32>
    %47 = arith.mulf %46, %46 : vector<8x128xf32>
    %48 = arith.addf %45, %47 : vector<8x128xf32>
    %c0_18 = arith.constant 0 : index
    %c1920 = arith.constant 1920 : index
    %49 = vector.load %arg3[%c0_18, %c1920] : memref<8x32768xf32, #tpu.memory_space<vmem>>, vector<8x128xf32>
    %50 = arith.mulf %49, %49 : vector<8x128xf32>
    %51 = arith.addf %48, %50 : vector<8x128xf32>
    %c0_19 = arith.constant 0 : index
    %c2048 = arith.constant 2048 : index
    %52 = vector.load %arg3[%c0_19, %c2048] : memref<8x32768xf32, #tpu.memory_space<vmem>>, vector<8x128xf32>
    %53 = arith.mulf %52, %52 : vector<8x128xf32>
    %54 = arith.addf %51, %53 : vector<8x128xf32>
    %c0_20 = arith.constant 0 : index
    %c2176 = arith.constant 2176 : index
    %55 = vector.load %arg3[%c0_20, %c2176] : memref<8x32768xf32, #tpu.memory_space<vmem>>, vector<8x128xf32>
    %56 = arith.mulf %55, %55 : vector<8x128xf32>
    %57 = arith.addf %54, %56 : vector<8x128xf32>
    %c0_21 = arith.constant 0 : index
    %c2304 = arith.constant 2304 : index
    %58 = vector.load %arg3[%c0_21, %c2304] : memref<8x32768xf32, #tpu.memory_space<vmem>>, vector<8x128xf32>
    %59 = arith.mulf %58, %58 : vector<8x128xf32>
    %60 = arith.addf %57, %59 : vector<8x128xf32>
    %c0_22 = arith.constant 0 : index
    %c2432 = arith.constant 2432 : index
    %61 = vector.load %arg3[%c0_22, %c2432] : memref<8x32768xf32, #tpu.memory_space<vmem>>, vector<8x128xf32>
    %62 = arith.mulf %61, %61 : vector<8x128xf32>
    %63 = arith.addf %60, %62 : vector<8x128xf32>
    %c0_23 = arith.constant 0 : index
    %c2560 = arith.constant 2560 : index
    %64 = vector.load %arg3[%c0_23, %c2560] : memref<8x32768xf32, #tpu.memory_space<vmem>>, vector<8x128xf32>
    %65 = arith.mulf %64, %64 : vector<8x128xf32>
    %66 = arith.addf %63, %65 : vector<8x128xf32>
    %c0_24 = arith.constant 0 : index
    %c2688 = arith.constant 2688 : index
    %67 = vector.load %arg3[%c0_24, %c2688] : memref<8x32768xf32, #tpu.memory_space<vmem>>, vector<8x128xf32>
    %68 = arith.mulf %67, %67 : vector<8x128xf32>
    %69 = arith.addf %66, %68 : vector<8x128xf32>
    %c0_25 = arith.constant 0 : index
    %c2816 = arith.constant 2816 : index
    %70 = vector.load %arg3[%c0_25, %c2816] : memref<8x32768xf32, #tpu.memory_space<vmem>>, vector<8x128xf32>
    %71 = arith.mulf %70, %70 : vector<8x128xf32>
    %72 = arith.addf %69, %71 : vector<8x128xf32>
    %c0_26 = arith.constant 0 : index
    %c2944 = arith.constant 2944 : index
    %73 = vector.load %arg3[%c0_26, %c2944] : memref<8x32768xf32, #tpu.memory_space<vmem>>, vector<8x128xf32>
    %74 = arith.mulf %73, %73 : vector<8x128xf32>
    %75 = arith.addf %72, %74 : vector<8x128xf32>
    %c0_27 = arith.constant 0 : index
    %c3072 = arith.constant 3072 : index
    %76 = vector.load %arg3[%c0_27, %c3072] : memref<8x32768xf32, #tpu.memory_space<vmem>>, vector<8x128xf32>
    %77 = arith.mulf %76, %76 : vector<8x128xf32>
    %78 = arith.addf %75, %77 : vector<8x128xf32>
    %c0_28 = arith.constant 0 : index
    %c3200 = arith.constant 3200 : index
    %79 = vector.load %arg3[%c0_28, %c3200] : memref<8x32768xf32, #tpu.memory_space<vmem>>, vector<8x128xf32>
    %80 = arith.mulf %79, %79 : vector<8x128xf32>
    %81 = arith.addf %78, %80 : vector<8x128xf32>
    %c0_29 = arith.constant 0 : index
    %c3328 = arith.constant 3328 : index
    %82 = vector.load %arg3[%c0_29, %c3328] : memref<8x32768xf32, #tpu.memory_space<vmem>>, vector<8x128xf32>
    %83 = arith.mulf %82, %82 : vector<8x128xf32>
    %84 = arith.addf %81, %83 : vector<8x128xf32>
    %c0_30 = arith.constant 0 : index
    %c3456 = arith.constant 3456 : index
    %85 = vector.load %arg3[%c0_30, %c3456] : memref<8x32768xf32, #tpu.memory_space<vmem>>, vector<8x128xf32>
    %86 = arith.mulf %85, %85 : vector<8x128xf32>
    %87 = arith.addf %84, %86 : vector<8x128xf32>
    %c0_31 = arith.constant 0 : index
    %c3584 = arith.constant 3584 : index
    %88 = vector.load %arg3[%c0_31, %c3584] : memref<8x32768xf32, #tpu.memory_space<vmem>>, vector<8x128xf32>
    %89 = arith.mulf %88, %88 : vector<8x128xf32>
    %90 = arith.addf %87, %89 : vector<8x128xf32>
    %c0_32 = arith.constant 0 : index
    %c3712 = arith.constant 3712 : index
    %91 = vector.load %arg3[%c0_32, %c3712] : memref<8x32768xf32, #tpu.memory_space<vmem>>, vector<8x128xf32>
    %92 = arith.mulf %91, %91 : vector<8x128xf32>
    %93 = arith.addf %90, %92 : vector<8x128xf32>
    %c0_33 = arith.constant 0 : index
    %c3840 = arith.constant 3840 : index
    %94 = vector.load %arg3[%c0_33, %c3840] : memref<8x32768xf32, #tpu.memory_space<vmem>>, vector<8x128xf32>
    %95 = arith.mulf %94, %94 : vector<8x128xf32>
    %96 = arith.addf %93, %95 : vector<8x128xf32>
    %c0_34 = arith.constant 0 : index
    %c3968 = arith.constant 3968 : index
    %97 = vector.load %arg3[%c0_34, %c3968] : memref<8x32768xf32, #tpu.memory_space<vmem>>, vector<8x128xf32>
    %98 = arith.mulf %97, %97 : vector<8x128xf32>
    %99 = arith.addf %96, %98 : vector<8x128xf32>
    %c0_35 = arith.constant 0 : index
    %c4096 = arith.constant 4096 : index
    %100 = vector.load %arg3[%c0_35, %c4096] : memref<8x32768xf32, #tpu.memory_space<vmem>>, vector<8x128xf32>
    %101 = arith.mulf %100, %100 : vector<8x128xf32>
    %102 = arith.addf %99, %101 : vector<8x128xf32>
    %c0_36 = arith.constant 0 : index
    %c4224 = arith.constant 4224 : index
    %103 = vector.load %arg3[%c0_36, %c4224] : memref<8x32768xf32, #tpu.memory_space<vmem>>, vector<8x128xf32>
    %104 = arith.mulf %103, %103 : vector<8x128xf32>
    %105 = arith.addf %102, %104 : vector<8x128xf32>
    %c0_37 = arith.constant 0 : index
    %c4352 = arith.constant 4352 : index
    %106 = vector.load %arg3[%c0_37, %c4352] : memref<8x32768xf32, #tpu.memory_space<vmem>>, vector<8x128xf32>
    %107 = arith.mulf %106, %106 : vector<8x128xf32>
    %108 = arith.addf %105, %107 : vector<8x128xf32>
    %c0_38 = arith.constant 0 : index
    %c4480 = arith.constant 4480 : index
    %109 = vector.load %arg3[%c0_38, %c4480] : memref<8x32768xf32, #tpu.memory_space<vmem>>, vector<8x128xf32>
    %110 = arith.mulf %109, %109 : vector<8x128xf32>
    %111 = arith.addf %108, %110 : vector<8x128xf32>
    %c0_39 = arith.constant 0 : index
    %c4608 = arith.constant 4608 : index
    %112 = vector.load %arg3[%c0_39, %c4608] : memref<8x32768xf32, #tpu.memory_space<vmem>>, vector<8x128xf32>
    %113 = arith.mulf %112, %112 : vector<8x128xf32>
    %114 = arith.addf %111, %113 : vector<8x128xf32>
    %c0_40 = arith.constant 0 : index
    %c4736 = arith.constant 4736 : index
    %115 = vector.load %arg3[%c0_40, %c4736] : memref<8x32768xf32, #tpu.memory_space<vmem>>, vector<8x128xf32>
    %116 = arith.mulf %115, %115 : vector<8x128xf32>
    %117 = arith.addf %114, %116 : vector<8x128xf32>
    %c0_41 = arith.constant 0 : index
    %c4864 = arith.constant 4864 : index
    %118 = vector.load %arg3[%c0_41, %c4864] : memref<8x32768xf32, #tpu.memory_space<vmem>>, vector<8x128xf32>
    %119 = arith.mulf %118, %118 : vector<8x128xf32>
    %120 = arith.addf %117, %119 : vector<8x128xf32>
    %c0_42 = arith.constant 0 : index
    %c4992 = arith.constant 4992 : index
    %121 = vector.load %arg3[%c0_42, %c4992] : memref<8x32768xf32, #tpu.memory_space<vmem>>, vector<8x128xf32>
    %122 = arith.mulf %121, %121 : vector<8x128xf32>
    %123 = arith.addf %120, %122 : vector<8x128xf32>
    %c0_43 = arith.constant 0 : index
    %c5120 = arith.constant 5120 : index
    %124 = vector.load %arg3[%c0_43, %c5120] : memref<8x32768xf32, #tpu.memory_space<vmem>>, vector<8x128xf32>
    %125 = arith.mulf %124, %124 : vector<8x128xf32>
    %126 = arith.addf %123, %125 : vector<8x128xf32>
    %c0_44 = arith.constant 0 : index
    %c5248 = arith.constant 5248 : index
    %127 = vector.load %arg3[%c0_44, %c5248] : memref<8x32768xf32, #tpu.memory_space<vmem>>, vector<8x128xf32>
    %128 = arith.mulf %127, %127 : vector<8x128xf32>
    %129 = arith.addf %126, %128 : vector<8x128xf32>
    %c0_45 = arith.constant 0 : index
    %c5376 = arith.constant 5376 : index
    %130 = vector.load %arg3[%c0_45, %c5376] : memref<8x32768xf32, #tpu.memory_space<vmem>>, vector<8x128xf32>
    %131 = arith.mulf %130, %130 : vector<8x128xf32>
    %132 = arith.addf %129, %131 : vector<8x128xf32>
    %c0_46 = arith.constant 0 : index
    %c5504 = arith.constant 5504 : index
    %133 = vector.load %arg3[%c0_46, %c5504] : memref<8x32768xf32, #tpu.memory_space<vmem>>, vector<8x128xf32>
    %134 = arith.mulf %133, %133 : vector<8x128xf32>
    %135 = arith.addf %132, %134 : vector<8x128xf32>
    %c0_47 = arith.constant 0 : index
    %c5632 = arith.constant 5632 : index
    %136 = vector.load %arg3[%c0_47, %c5632] : memref<8x32768xf32, #tpu.memory_space<vmem>>, vector<8x128xf32>
    %137 = arith.mulf %136, %136 : vector<8x128xf32>
    %138 = arith.addf %135, %137 : vector<8x128xf32>
    %c0_48 = arith.constant 0 : index
    %c5760 = arith.constant 5760 : index
    %139 = vector.load %arg3[%c0_48, %c5760] : memref<8x32768xf32, #tpu.memory_space<vmem>>, vector<8x128xf32>
    %140 = arith.mulf %139, %139 : vector<8x128xf32>
    %141 = arith.addf %138, %140 : vector<8x128xf32>
    %c0_49 = arith.constant 0 : index
    %c5888 = arith.constant 5888 : index
    %142 = vector.load %arg3[%c0_49, %c5888] : memref<8x32768xf32, #tpu.memory_space<vmem>>, vector<8x128xf32>
    %143 = arith.mulf %142, %142 : vector<8x128xf32>
    %144 = arith.addf %141, %143 : vector<8x128xf32>
    %c0_50 = arith.constant 0 : index
    %c6016 = arith.constant 6016 : index
    %145 = vector.load %arg3[%c0_50, %c6016] : memref<8x32768xf32, #tpu.memory_space<vmem>>, vector<8x128xf32>
    %146 = arith.mulf %145, %145 : vector<8x128xf32>
    %147 = arith.addf %144, %146 : vector<8x128xf32>
    %c0_51 = arith.constant 0 : index
    %c6144 = arith.constant 6144 : index
    %148 = vector.load %arg3[%c0_51, %c6144] : memref<8x32768xf32, #tpu.memory_space<vmem>>, vector<8x128xf32>
    %149 = arith.mulf %148, %148 : vector<8x128xf32>
    %150 = arith.addf %147, %149 : vector<8x128xf32>
    %c0_52 = arith.constant 0 : index
    %c6272 = arith.constant 6272 : index
    %151 = vector.load %arg3[%c0_52, %c6272] : memref<8x32768xf32, #tpu.memory_space<vmem>>, vector<8x128xf32>
    %152 = arith.mulf %151, %151 : vector<8x128xf32>
    %153 = arith.addf %150, %152 : vector<8x128xf32>
    %c0_53 = arith.constant 0 : index
    %c6400 = arith.constant 6400 : index
    %154 = vector.load %arg3[%c0_53, %c6400] : memref<8x32768xf32, #tpu.memory_space<vmem>>, vector<8x128xf32>
    %155 = arith.mulf %154, %154 : vector<8x128xf32>
    %156 = arith.addf %153, %155 : vector<8x128xf32>
    %c0_54 = arith.constant 0 : index
    %c6528 = arith.constant 6528 : index
    %157 = vector.load %arg3[%c0_54, %c6528] : memref<8x32768xf32, #tpu.memory_space<vmem>>, vector<8x128xf32>
    %158 = arith.mulf %157, %157 : vector<8x128xf32>
    %159 = arith.addf %156, %158 : vector<8x128xf32>
    %c0_55 = arith.constant 0 : index
    %c6656 = arith.constant 6656 : index
    %160 = vector.load %arg3[%c0_55, %c6656] : memref<8x32768xf32, #tpu.memory_space<vmem>>, vector<8x128xf32>
    %161 = arith.mulf %160, %160 : vector<8x128xf32>
    %162 = arith.addf %159, %161 : vector<8x128xf32>
    %c0_56 = arith.constant 0 : index
    %c6784 = arith.constant 6784 : index
    %163 = vector.load %arg3[%c0_56, %c6784] : memref<8x32768xf32, #tpu.memory_space<vmem>>, vector<8x128xf32>
    %164 = arith.mulf %163, %163 : vector<8x128xf32>
    %165 = arith.addf %162, %164 : vector<8x128xf32>
    %c0_57 = arith.constant 0 : index
    %c6912 = arith.constant 6912 : index
    %166 = vector.load %arg3[%c0_57, %c6912] : memref<8x32768xf32, #tpu.memory_space<vmem>>, vector<8x128xf32>
    %167 = arith.mulf %166, %166 : vector<8x128xf32>
    %168 = arith.addf %165, %167 : vector<8x128xf32>
    %c0_58 = arith.constant 0 : index
    %c7040 = arith.constant 7040 : index
    %169 = vector.load %arg3[%c0_58, %c7040] : memref<8x32768xf32, #tpu.memory_space<vmem>>, vector<8x128xf32>
    %170 = arith.mulf %169, %169 : vector<8x128xf32>
    %171 = arith.addf %168, %170 : vector<8x128xf32>
    %c0_59 = arith.constant 0 : index
    %c7168 = arith.constant 7168 : index
    %172 = vector.load %arg3[%c0_59, %c7168] : memref<8x32768xf32, #tpu.memory_space<vmem>>, vector<8x128xf32>
    %173 = arith.mulf %172, %172 : vector<8x128xf32>
    %174 = arith.addf %171, %173 : vector<8x128xf32>
    %c0_60 = arith.constant 0 : index
    %c7296 = arith.constant 7296 : index
    %175 = vector.load %arg3[%c0_60, %c7296] : memref<8x32768xf32, #tpu.memory_space<vmem>>, vector<8x128xf32>
    %176 = arith.mulf %175, %175 : vector<8x128xf32>
    %177 = arith.addf %174, %176 : vector<8x128xf32>
    %c0_61 = arith.constant 0 : index
    %c7424 = arith.constant 7424 : index
    %178 = vector.load %arg3[%c0_61, %c7424] : memref<8x32768xf32, #tpu.memory_space<vmem>>, vector<8x128xf32>
    %179 = arith.mulf %178, %178 : vector<8x128xf32>
    %180 = arith.addf %177, %179 : vector<8x128xf32>
    %c0_62 = arith.constant 0 : index
    %c7552 = arith.constant 7552 : index
    %181 = vector.load %arg3[%c0_62, %c7552] : memref<8x32768xf32, #tpu.memory_space<vmem>>, vector<8x128xf32>
    %182 = arith.mulf %181, %181 : vector<8x128xf32>
    %183 = arith.addf %180, %182 : vector<8x128xf32>
    %c0_63 = arith.constant 0 : index
    %c7680 = arith.constant 7680 : index
    %184 = vector.load %arg3[%c0_63, %c7680] : memref<8x32768xf32, #tpu.memory_space<vmem>>, vector<8x128xf32>
    %185 = arith.mulf %184, %184 : vector<8x128xf32>
    %186 = arith.addf %183, %185 : vector<8x128xf32>
    %c0_64 = arith.constant 0 : index
    %c7808 = arith.constant 7808 : index
    %187 = vector.load %arg3[%c0_64, %c7808] : memref<8x32768xf32, #tpu.memory_space<vmem>>, vector<8x128xf32>
    %188 = arith.mulf %187, %187 : vector<8x128xf32>
    %189 = arith.addf %186, %188 : vector<8x128xf32>
    %c0_65 = arith.constant 0 : index
    %c7936 = arith.constant 7936 : index
    %190 = vector.load %arg3[%c0_65, %c7936] : memref<8x32768xf32, #tpu.memory_space<vmem>>, vector<8x128xf32>
    %191 = arith.mulf %190, %190 : vector<8x128xf32>
    %192 = arith.addf %189, %191 : vector<8x128xf32>
    %c0_66 = arith.constant 0 : index
    %c8064 = arith.constant 8064 : index
    %193 = vector.load %arg3[%c0_66, %c8064] : memref<8x32768xf32, #tpu.memory_space<vmem>>, vector<8x128xf32>
    %194 = arith.mulf %193, %193 : vector<8x128xf32>
    %195 = arith.addf %192, %194 : vector<8x128xf32>
    %c0_67 = arith.constant 0 : index
    %c8192 = arith.constant 8192 : index
    %196 = vector.load %arg3[%c0_67, %c8192] : memref<8x32768xf32, #tpu.memory_space<vmem>>, vector<8x128xf32>
    %197 = arith.mulf %196, %196 : vector<8x128xf32>
    %198 = arith.addf %195, %197 : vector<8x128xf32>
    %c0_68 = arith.constant 0 : index
    %c8320 = arith.constant 8320 : index
    %199 = vector.load %arg3[%c0_68, %c8320] : memref<8x32768xf32, #tpu.memory_space<vmem>>, vector<8x128xf32>
    %200 = arith.mulf %199, %199 : vector<8x128xf32>
    %201 = arith.addf %198, %200 : vector<8x128xf32>
    %c0_69 = arith.constant 0 : index
    %c8448 = arith.constant 8448 : index
    %202 = vector.load %arg3[%c0_69, %c8448] : memref<8x32768xf32, #tpu.memory_space<vmem>>, vector<8x128xf32>
    %203 = arith.mulf %202, %202 : vector<8x128xf32>
    %204 = arith.addf %201, %203 : vector<8x128xf32>
    %c0_70 = arith.constant 0 : index
    %c8576 = arith.constant 8576 : index
    %205 = vector.load %arg3[%c0_70, %c8576] : memref<8x32768xf32, #tpu.memory_space<vmem>>, vector<8x128xf32>
    %206 = arith.mulf %205, %205 : vector<8x128xf32>
    %207 = arith.addf %204, %206 : vector<8x128xf32>
    %c0_71 = arith.constant 0 : index
    %c8704 = arith.constant 8704 : index
    %208 = vector.load %arg3[%c0_71, %c8704] : memref<8x32768xf32, #tpu.memory_space<vmem>>, vector<8x128xf32>
    %209 = arith.mulf %208, %208 : vector<8x128xf32>
    %210 = arith.addf %207, %209 : vector<8x128xf32>
    %c0_72 = arith.constant 0 : index
    %c8832 = arith.constant 8832 : index
    %211 = vector.load %arg3[%c0_72, %c8832] : memref<8x32768xf32, #tpu.memory_space<vmem>>, vector<8x128xf32>
    %212 = arith.mulf %211, %211 : vector<8x128xf32>
    %213 = arith.addf %210, %212 : vector<8x128xf32>
    %c0_73 = arith.constant 0 : index
    %c8960 = arith.constant 8960 : index
    %214 = vector.load %arg3[%c0_73, %c8960] : memref<8x32768xf32, #tpu.memory_space<vmem>>, vector<8x128xf32>
    %215 = arith.mulf %214, %214 : vector<8x128xf32>
    %216 = arith.addf %213, %215 : vector<8x128xf32>
    %c0_74 = arith.constant 0 : index
    %c9088 = arith.constant 9088 : index
    %217 = vector.load %arg3[%c0_74, %c9088] : memref<8x32768xf32, #tpu.memory_space<vmem>>, vector<8x128xf32>
    %218 = arith.mulf %217, %217 : vector<8x128xf32>
    %219 = arith.addf %216, %218 : vector<8x128xf32>
    %c0_75 = arith.constant 0 : index
    %c9216 = arith.constant 9216 : index
    %220 = vector.load %arg3[%c0_75, %c9216] : memref<8x32768xf32, #tpu.memory_space<vmem>>, vector<8x128xf32>
    %221 = arith.mulf %220, %220 : vector<8x128xf32>
    %222 = arith.addf %219, %221 : vector<8x128xf32>
    %c0_76 = arith.constant 0 : index
    %c9344 = arith.constant 9344 : index
    %223 = vector.load %arg3[%c0_76, %c9344] : memref<8x32768xf32, #tpu.memory_space<vmem>>, vector<8x128xf32>
    %224 = arith.mulf %223, %223 : vector<8x128xf32>
    %225 = arith.addf %222, %224 : vector<8x128xf32>
    %c0_77 = arith.constant 0 : index
    %c9472 = arith.constant 9472 : index
    %226 = vector.load %arg3[%c0_77, %c9472] : memref<8x32768xf32, #tpu.memory_space<vmem>>, vector<8x128xf32>
    %227 = arith.mulf %226, %226 : vector<8x128xf32>
    %228 = arith.addf %225, %227 : vector<8x128xf32>
    %c0_78 = arith.constant 0 : index
    %c9600 = arith.constant 9600 : index
    %229 = vector.load %arg3[%c0_78, %c9600] : memref<8x32768xf32, #tpu.memory_space<vmem>>, vector<8x128xf32>
    %230 = arith.mulf %229, %229 : vector<8x128xf32>
    %231 = arith.addf %228, %230 : vector<8x128xf32>
    %c0_79 = arith.constant 0 : index
    %c9728 = arith.constant 9728 : index
    %232 = vector.load %arg3[%c0_79, %c9728] : memref<8x32768xf32, #tpu.memory_space<vmem>>, vector<8x128xf32>
    %233 = arith.mulf %232, %232 : vector<8x128xf32>
    %234 = arith.addf %231, %233 : vector<8x128xf32>
    %c0_80 = arith.constant 0 : index
    %c9856 = arith.constant 9856 : index
    %235 = vector.load %arg3[%c0_80, %c9856] : memref<8x32768xf32, #tpu.memory_space<vmem>>, vector<8x128xf32>
    %236 = arith.mulf %235, %235 : vector<8x128xf32>
    %237 = arith.addf %234, %236 : vector<8x128xf32>
    %c0_81 = arith.constant 0 : index
    %c9984 = arith.constant 9984 : index
    %238 = vector.load %arg3[%c0_81, %c9984] : memref<8x32768xf32, #tpu.memory_space<vmem>>, vector<8x128xf32>
    %239 = arith.mulf %238, %238 : vector<8x128xf32>
    %240 = arith.addf %237, %239 : vector<8x128xf32>
    %c0_82 = arith.constant 0 : index
    %c10112 = arith.constant 10112 : index
    %241 = vector.load %arg3[%c0_82, %c10112] : memref<8x32768xf32, #tpu.memory_space<vmem>>, vector<8x128xf32>
    %242 = arith.mulf %241, %241 : vector<8x128xf32>
    %243 = arith.addf %240, %242 : vector<8x128xf32>
    %c0_83 = arith.constant 0 : index
    %c10240 = arith.constant 10240 : index
    %244 = vector.load %arg3[%c0_83, %c10240] : memref<8x32768xf32, #tpu.memory_space<vmem>>, vector<8x128xf32>
    %245 = arith.mulf %244, %244 : vector<8x128xf32>
    %246 = arith.addf %243, %245 : vector<8x128xf32>
    %c0_84 = arith.constant 0 : index
    %c10368 = arith.constant 10368 : index
    %247 = vector.load %arg3[%c0_84, %c10368] : memref<8x32768xf32, #tpu.memory_space<vmem>>, vector<8x128xf32>
    %248 = arith.mulf %247, %247 : vector<8x128xf32>
    %249 = arith.addf %246, %248 : vector<8x128xf32>
    %c0_85 = arith.constant 0 : index
    %c10496 = arith.constant 10496 : index
    %250 = vector.load %arg3[%c0_85, %c10496] : memref<8x32768xf32, #tpu.memory_space<vmem>>, vector<8x128xf32>
    %251 = arith.mulf %250, %250 : vector<8x128xf32>
    %252 = arith.addf %249, %251 : vector<8x128xf32>
    %c0_86 = arith.constant 0 : index
    %c10624 = arith.constant 10624 : index
    %253 = vector.load %arg3[%c0_86, %c10624] : memref<8x32768xf32, #tpu.memory_space<vmem>>, vector<8x128xf32>
    %254 = arith.mulf %253, %253 : vector<8x128xf32>
    %255 = arith.addf %252, %254 : vector<8x128xf32>
    %c0_87 = arith.constant 0 : index
    %c10752 = arith.constant 10752 : index
    %256 = vector.load %arg3[%c0_87, %c10752] : memref<8x32768xf32, #tpu.memory_space<vmem>>, vector<8x128xf32>
    %257 = arith.mulf %256, %256 : vector<8x128xf32>
    %258 = arith.addf %255, %257 : vector<8x128xf32>
    %c0_88 = arith.constant 0 : index
    %c10880 = arith.constant 10880 : index
    %259 = vector.load %arg3[%c0_88, %c10880] : memref<8x32768xf32, #tpu.memory_space<vmem>>, vector<8x128xf32>
    %260 = arith.mulf %259, %259 : vector<8x128xf32>
    %261 = arith.addf %258, %260 : vector<8x128xf32>
    %c0_89 = arith.constant 0 : index
    %c11008 = arith.constant 11008 : index
    %262 = vector.load %arg3[%c0_89, %c11008] : memref<8x32768xf32, #tpu.memory_space<vmem>>, vector<8x128xf32>
    %263 = arith.mulf %262, %262 : vector<8x128xf32>
    %264 = arith.addf %261, %263 : vector<8x128xf32>
    %c0_90 = arith.constant 0 : index
    %c11136 = arith.constant 11136 : index
    %265 = vector.load %arg3[%c0_90, %c11136] : memref<8x32768xf32, #tpu.memory_space<vmem>>, vector<8x128xf32>
    %266 = arith.mulf %265, %265 : vector<8x128xf32>
    %267 = arith.addf %264, %266 : vector<8x128xf32>
    %c0_91 = arith.constant 0 : index
    %c11264 = arith.constant 11264 : index
    %268 = vector.load %arg3[%c0_91, %c11264] : memref<8x32768xf32, #tpu.memory_space<vmem>>, vector<8x128xf32>
    %269 = arith.mulf %268, %268 : vector<8x128xf32>
    %270 = arith.addf %267, %269 : vector<8x128xf32>
    %c0_92 = arith.constant 0 : index
    %c11392 = arith.constant 11392 : index
    %271 = vector.load %arg3[%c0_92, %c11392] : memref<8x32768xf32, #tpu.memory_space<vmem>>, vector<8x128xf32>
    %272 = arith.mulf %271, %271 : vector<8x128xf32>
    %273 = arith.addf %270, %272 : vector<8x128xf32>
    %c0_93 = arith.constant 0 : index
    %c11520 = arith.constant 11520 : index
    %274 = vector.load %arg3[%c0_93, %c11520] : memref<8x32768xf32, #tpu.memory_space<vmem>>, vector<8x128xf32>
    %275 = arith.mulf %274, %274 : vector<8x128xf32>
    %276 = arith.addf %273, %275 : vector<8x128xf32>
    %c0_94 = arith.constant 0 : index
    %c11648 = arith.constant 11648 : index
    %277 = vector.load %arg3[%c0_94, %c11648] : memref<8x32768xf32, #tpu.memory_space<vmem>>, vector<8x128xf32>
    %278 = arith.mulf %277, %277 : vector<8x128xf32>
    %279 = arith.addf %276, %278 : vector<8x128xf32>
    %c0_95 = arith.constant 0 : index
    %c11776 = arith.constant 11776 : index
    %280 = vector.load %arg3[%c0_95, %c11776] : memref<8x32768xf32, #tpu.memory_space<vmem>>, vector<8x128xf32>
    %281 = arith.mulf %280, %280 : vector<8x128xf32>
    %282 = arith.addf %279, %281 : vector<8x128xf32>
    %c0_96 = arith.constant 0 : index
    %c11904 = arith.constant 11904 : index
    %283 = vector.load %arg3[%c0_96, %c11904] : memref<8x32768xf32, #tpu.memory_space<vmem>>, vector<8x128xf32>
    %284 = arith.mulf %283, %283 : vector<8x128xf32>
    %285 = arith.addf %282, %284 : vector<8x128xf32>
    %c0_97 = arith.constant 0 : index
    %c12032 = arith.constant 12032 : index
    %286 = vector.load %arg3[%c0_97, %c12032] : memref<8x32768xf32, #tpu.memory_space<vmem>>, vector<8x128xf32>
    %287 = arith.mulf %286, %286 : vector<8x128xf32>
    %288 = arith.addf %285, %287 : vector<8x128xf32>
    %c0_98 = arith.constant 0 : index
    %c12160 = arith.constant 12160 : index
    %289 = vector.load %arg3[%c0_98, %c12160] : memref<8x32768xf32, #tpu.memory_space<vmem>>, vector<8x128xf32>
    %290 = arith.mulf %289, %289 : vector<8x128xf32>
    %291 = arith.addf %288, %290 : vector<8x128xf32>
    %c0_99 = arith.constant 0 : index
    %c12288 = arith.constant 12288 : index
    %292 = vector.load %arg3[%c0_99, %c12288] : memref<8x32768xf32, #tpu.memory_space<vmem>>, vector<8x128xf32>
    %293 = arith.mulf %292, %292 : vector<8x128xf32>
    %294 = arith.addf %291, %293 : vector<8x128xf32>
    %c0_100 = arith.constant 0 : index
    %c12416 = arith.constant 12416 : index
    %295 = vector.load %arg3[%c0_100, %c12416] : memref<8x32768xf32, #tpu.memory_space<vmem>>, vector<8x128xf32>
    %296 = arith.mulf %295, %295 : vector<8x128xf32>
    %297 = arith.addf %294, %296 : vector<8x128xf32>
    %c0_101 = arith.constant 0 : index
    %c12544 = arith.constant 12544 : index
    %298 = vector.load %arg3[%c0_101, %c12544] : memref<8x32768xf32, #tpu.memory_space<vmem>>, vector<8x128xf32>
    %299 = arith.mulf %298, %298 : vector<8x128xf32>
    %300 = arith.addf %297, %299 : vector<8x128xf32>
    %c0_102 = arith.constant 0 : index
    %c12672 = arith.constant 12672 : index
    %301 = vector.load %arg3[%c0_102, %c12672] : memref<8x32768xf32, #tpu.memory_space<vmem>>, vector<8x128xf32>
    %302 = arith.mulf %301, %301 : vector<8x128xf32>
    %303 = arith.addf %300, %302 : vector<8x128xf32>
    %c0_103 = arith.constant 0 : index
    %c12800 = arith.constant 12800 : index
    %304 = vector.load %arg3[%c0_103, %c12800] : memref<8x32768xf32, #tpu.memory_space<vmem>>, vector<8x128xf32>
    %305 = arith.mulf %304, %304 : vector<8x128xf32>
    %306 = arith.addf %303, %305 : vector<8x128xf32>
    %c0_104 = arith.constant 0 : index
    %c12928 = arith.constant 12928 : index
    %307 = vector.load %arg3[%c0_104, %c12928] : memref<8x32768xf32, #tpu.memory_space<vmem>>, vector<8x128xf32>
    %308 = arith.mulf %307, %307 : vector<8x128xf32>
    %309 = arith.addf %306, %308 : vector<8x128xf32>
    %c0_105 = arith.constant 0 : index
    %c13056 = arith.constant 13056 : index
    %310 = vector.load %arg3[%c0_105, %c13056] : memref<8x32768xf32, #tpu.memory_space<vmem>>, vector<8x128xf32>
    %311 = arith.mulf %310, %310 : vector<8x128xf32>
    %312 = arith.addf %309, %311 : vector<8x128xf32>
    %c0_106 = arith.constant 0 : index
    %c13184 = arith.constant 13184 : index
    %313 = vector.load %arg3[%c0_106, %c13184] : memref<8x32768xf32, #tpu.memory_space<vmem>>, vector<8x128xf32>
    %314 = arith.mulf %313, %313 : vector<8x128xf32>
    %315 = arith.addf %312, %314 : vector<8x128xf32>
    %c0_107 = arith.constant 0 : index
    %c13312 = arith.constant 13312 : index
    %316 = vector.load %arg3[%c0_107, %c13312] : memref<8x32768xf32, #tpu.memory_space<vmem>>, vector<8x128xf32>
    %317 = arith.mulf %316, %316 : vector<8x128xf32>
    %318 = arith.addf %315, %317 : vector<8x128xf32>
    %c0_108 = arith.constant 0 : index
    %c13440 = arith.constant 13440 : index
    %319 = vector.load %arg3[%c0_108, %c13440] : memref<8x32768xf32, #tpu.memory_space<vmem>>, vector<8x128xf32>
    %320 = arith.mulf %319, %319 : vector<8x128xf32>
    %321 = arith.addf %318, %320 : vector<8x128xf32>
    %c0_109 = arith.constant 0 : index
    %c13568 = arith.constant 13568 : index
    %322 = vector.load %arg3[%c0_109, %c13568] : memref<8x32768xf32, #tpu.memory_space<vmem>>, vector<8x128xf32>
    %323 = arith.mulf %322, %322 : vector<8x128xf32>
    %324 = arith.addf %321, %323 : vector<8x128xf32>
    %c0_110 = arith.constant 0 : index
    %c13696 = arith.constant 13696 : index
    %325 = vector.load %arg3[%c0_110, %c13696] : memref<8x32768xf32, #tpu.memory_space<vmem>>, vector<8x128xf32>
    %326 = arith.mulf %325, %325 : vector<8x128xf32>
    %327 = arith.addf %324, %326 : vector<8x128xf32>
    %c0_111 = arith.constant 0 : index
    %c13824 = arith.constant 13824 : index
    %328 = vector.load %arg3[%c0_111, %c13824] : memref<8x32768xf32, #tpu.memory_space<vmem>>, vector<8x128xf32>
    %329 = arith.mulf %328, %328 : vector<8x128xf32>
    %330 = arith.addf %327, %329 : vector<8x128xf32>
    %c0_112 = arith.constant 0 : index
    %c13952 = arith.constant 13952 : index
    %331 = vector.load %arg3[%c0_112, %c13952] : memref<8x32768xf32, #tpu.memory_space<vmem>>, vector<8x128xf32>
    %332 = arith.mulf %331, %331 : vector<8x128xf32>
    %333 = arith.addf %330, %332 : vector<8x128xf32>
    %c0_113 = arith.constant 0 : index
    %c14080 = arith.constant 14080 : index
    %334 = vector.load %arg3[%c0_113, %c14080] : memref<8x32768xf32, #tpu.memory_space<vmem>>, vector<8x128xf32>
    %335 = arith.mulf %334, %334 : vector<8x128xf32>
    %336 = arith.addf %333, %335 : vector<8x128xf32>
    %c0_114 = arith.constant 0 : index
    %c14208 = arith.constant 14208 : index
    %337 = vector.load %arg3[%c0_114, %c14208] : memref<8x32768xf32, #tpu.memory_space<vmem>>, vector<8x128xf32>
    %338 = arith.mulf %337, %337 : vector<8x128xf32>
    %339 = arith.addf %336, %338 : vector<8x128xf32>
    %c0_115 = arith.constant 0 : index
    %c14336 = arith.constant 14336 : index
    %340 = vector.load %arg3[%c0_115, %c14336] : memref<8x32768xf32, #tpu.memory_space<vmem>>, vector<8x128xf32>
    %341 = arith.mulf %340, %340 : vector<8x128xf32>
    %342 = arith.addf %339, %341 : vector<8x128xf32>
    %c0_116 = arith.constant 0 : index
    %c14464 = arith.constant 14464 : index
    %343 = vector.load %arg3[%c0_116, %c14464] : memref<8x32768xf32, #tpu.memory_space<vmem>>, vector<8x128xf32>
    %344 = arith.mulf %343, %343 : vector<8x128xf32>
    %345 = arith.addf %342, %344 : vector<8x128xf32>
    %c0_117 = arith.constant 0 : index
    %c14592 = arith.constant 14592 : index
    %346 = vector.load %arg3[%c0_117, %c14592] : memref<8x32768xf32, #tpu.memory_space<vmem>>, vector<8x128xf32>
    %347 = arith.mulf %346, %346 : vector<8x128xf32>
    %348 = arith.addf %345, %347 : vector<8x128xf32>
    %c0_118 = arith.constant 0 : index
    %c14720 = arith.constant 14720 : index
    %349 = vector.load %arg3[%c0_118, %c14720] : memref<8x32768xf32, #tpu.memory_space<vmem>>, vector<8x128xf32>
    %350 = arith.mulf %349, %349 : vector<8x128xf32>
    %351 = arith.addf %348, %350 : vector<8x128xf32>
    %c0_119 = arith.constant 0 : index
    %c14848 = arith.constant 14848 : index
    %352 = vector.load %arg3[%c0_119, %c14848] : memref<8x32768xf32, #tpu.memory_space<vmem>>, vector<8x128xf32>
    %353 = arith.mulf %352, %352 : vector<8x128xf32>
    %354 = arith.addf %351, %353 : vector<8x128xf32>
    %c0_120 = arith.constant 0 : index
    %c14976 = arith.constant 14976 : index
    %355 = vector.load %arg3[%c0_120, %c14976] : memref<8x32768xf32, #tpu.memory_space<vmem>>, vector<8x128xf32>
    %356 = arith.mulf %355, %355 : vector<8x128xf32>
    %357 = arith.addf %354, %356 : vector<8x128xf32>
    %c0_121 = arith.constant 0 : index
    %c15104 = arith.constant 15104 : index
    %358 = vector.load %arg3[%c0_121, %c15104] : memref<8x32768xf32, #tpu.memory_space<vmem>>, vector<8x128xf32>
    %359 = arith.mulf %358, %358 : vector<8x128xf32>
    %360 = arith.addf %357, %359 : vector<8x128xf32>
    %c0_122 = arith.constant 0 : index
    %c15232 = arith.constant 15232 : index
    %361 = vector.load %arg3[%c0_122, %c15232] : memref<8x32768xf32, #tpu.memory_space<vmem>>, vector<8x128xf32>
    %362 = arith.mulf %361, %361 : vector<8x128xf32>
    %363 = arith.addf %360, %362 : vector<8x128xf32>
    %c0_123 = arith.constant 0 : index
    %c15360 = arith.constant 15360 : index
    %364 = vector.load %arg3[%c0_123, %c15360] : memref<8x32768xf32, #tpu.memory_space<vmem>>, vector<8x128xf32>
    %365 = arith.mulf %364, %364 : vector<8x128xf32>
    %366 = arith.addf %363, %365 : vector<8x128xf32>
    %c0_124 = arith.constant 0 : index
    %c15488 = arith.constant 15488 : index
    %367 = vector.load %arg3[%c0_124, %c15488] : memref<8x32768xf32, #tpu.memory_space<vmem>>, vector<8x128xf32>
    %368 = arith.mulf %367, %367 : vector<8x128xf32>
    %369 = arith.addf %366, %368 : vector<8x128xf32>
    %c0_125 = arith.constant 0 : index
    %c15616 = arith.constant 15616 : index
    %370 = vector.load %arg3[%c0_125, %c15616] : memref<8x32768xf32, #tpu.memory_space<vmem>>, vector<8x128xf32>
    %371 = arith.mulf %370, %370 : vector<8x128xf32>
    %372 = arith.addf %369, %371 : vector<8x128xf32>
    %c0_126 = arith.constant 0 : index
    %c15744 = arith.constant 15744 : index
    %373 = vector.load %arg3[%c0_126, %c15744] : memref<8x32768xf32, #tpu.memory_space<vmem>>, vector<8x128xf32>
    %374 = arith.mulf %373, %373 : vector<8x128xf32>
    %375 = arith.addf %372, %374 : vector<8x128xf32>
    %c0_127 = arith.constant 0 : index
    %c15872 = arith.constant 15872 : index
    %376 = vector.load %arg3[%c0_127, %c15872] : memref<8x32768xf32, #tpu.memory_space<vmem>>, vector<8x128xf32>
    %377 = arith.mulf %376, %376 : vector<8x128xf32>
    %378 = arith.addf %375, %377 : vector<8x128xf32>
    %c0_128 = arith.constant 0 : index
    %c16000 = arith.constant 16000 : index
    %379 = vector.load %arg3[%c0_128, %c16000] : memref<8x32768xf32, #tpu.memory_space<vmem>>, vector<8x128xf32>
    %380 = arith.mulf %379, %379 : vector<8x128xf32>
    %381 = arith.addf %378, %380 : vector<8x128xf32>
    %c0_129 = arith.constant 0 : index
    %c16128 = arith.constant 16128 : index
    %382 = vector.load %arg3[%c0_129, %c16128] : memref<8x32768xf32, #tpu.memory_space<vmem>>, vector<8x128xf32>
    %383 = arith.mulf %382, %382 : vector<8x128xf32>
    %384 = arith.addf %381, %383 : vector<8x128xf32>
    %c0_130 = arith.constant 0 : index
    %c16256 = arith.constant 16256 : index
    %385 = vector.load %arg3[%c0_130, %c16256] : memref<8x32768xf32, #tpu.memory_space<vmem>>, vector<8x128xf32>
    %386 = arith.mulf %385, %385 : vector<8x128xf32>
    %387 = arith.addf %384, %386 : vector<8x128xf32>
    %c0_131 = arith.constant 0 : index
    %c16384 = arith.constant 16384 : index
    %388 = vector.load %arg3[%c0_131, %c16384] : memref<8x32768xf32, #tpu.memory_space<vmem>>, vector<8x128xf32>
    %389 = arith.mulf %388, %388 : vector<8x128xf32>
    %390 = arith.addf %387, %389 : vector<8x128xf32>
    %c0_132 = arith.constant 0 : index
    %c16512 = arith.constant 16512 : index
    %391 = vector.load %arg3[%c0_132, %c16512] : memref<8x32768xf32, #tpu.memory_space<vmem>>, vector<8x128xf32>
    %392 = arith.mulf %391, %391 : vector<8x128xf32>
    %393 = arith.addf %390, %392 : vector<8x128xf32>
    %c0_133 = arith.constant 0 : index
    %c16640 = arith.constant 16640 : index
    %394 = vector.load %arg3[%c0_133, %c16640] : memref<8x32768xf32, #tpu.memory_space<vmem>>, vector<8x128xf32>
    %395 = arith.mulf %394, %394 : vector<8x128xf32>
    %396 = arith.addf %393, %395 : vector<8x128xf32>
    %c0_134 = arith.constant 0 : index
    %c16768 = arith.constant 16768 : index
    %397 = vector.load %arg3[%c0_134, %c16768] : memref<8x32768xf32, #tpu.memory_space<vmem>>, vector<8x128xf32>
    %398 = arith.mulf %397, %397 : vector<8x128xf32>
    %399 = arith.addf %396, %398 : vector<8x128xf32>
    %c0_135 = arith.constant 0 : index
    %c16896 = arith.constant 16896 : index
    %400 = vector.load %arg3[%c0_135, %c16896] : memref<8x32768xf32, #tpu.memory_space<vmem>>, vector<8x128xf32>
    %401 = arith.mulf %400, %400 : vector<8x128xf32>
    %402 = arith.addf %399, %401 : vector<8x128xf32>
    %c0_136 = arith.constant 0 : index
    %c17024 = arith.constant 17024 : index
    %403 = vector.load %arg3[%c0_136, %c17024] : memref<8x32768xf32, #tpu.memory_space<vmem>>, vector<8x128xf32>
    %404 = arith.mulf %403, %403 : vector<8x128xf32>
    %405 = arith.addf %402, %404 : vector<8x128xf32>
    %c0_137 = arith.constant 0 : index
    %c17152 = arith.constant 17152 : index
    %406 = vector.load %arg3[%c0_137, %c17152] : memref<8x32768xf32, #tpu.memory_space<vmem>>, vector<8x128xf32>
    %407 = arith.mulf %406, %406 : vector<8x128xf32>
    %408 = arith.addf %405, %407 : vector<8x128xf32>
    %c0_138 = arith.constant 0 : index
    %c17280 = arith.constant 17280 : index
    %409 = vector.load %arg3[%c0_138, %c17280] : memref<8x32768xf32, #tpu.memory_space<vmem>>, vector<8x128xf32>
    %410 = arith.mulf %409, %409 : vector<8x128xf32>
    %411 = arith.addf %408, %410 : vector<8x128xf32>
    %c0_139 = arith.constant 0 : index
    %c17408 = arith.constant 17408 : index
    %412 = vector.load %arg3[%c0_139, %c17408] : memref<8x32768xf32, #tpu.memory_space<vmem>>, vector<8x128xf32>
    %413 = arith.mulf %412, %412 : vector<8x128xf32>
    %414 = arith.addf %411, %413 : vector<8x128xf32>
    %c0_140 = arith.constant 0 : index
    %c17536 = arith.constant 17536 : index
    %415 = vector.load %arg3[%c0_140, %c17536] : memref<8x32768xf32, #tpu.memory_space<vmem>>, vector<8x128xf32>
    %416 = arith.mulf %415, %415 : vector<8x128xf32>
    %417 = arith.addf %414, %416 : vector<8x128xf32>
    %c0_141 = arith.constant 0 : index
    %c17664 = arith.constant 17664 : index
    %418 = vector.load %arg3[%c0_141, %c17664] : memref<8x32768xf32, #tpu.memory_space<vmem>>, vector<8x128xf32>
    %419 = arith.mulf %418, %418 : vector<8x128xf32>
    %420 = arith.addf %417, %419 : vector<8x128xf32>
    %c0_142 = arith.constant 0 : index
    %c17792 = arith.constant 17792 : index
    %421 = vector.load %arg3[%c0_142, %c17792] : memref<8x32768xf32, #tpu.memory_space<vmem>>, vector<8x128xf32>
    %422 = arith.mulf %421, %421 : vector<8x128xf32>
    %423 = arith.addf %420, %422 : vector<8x128xf32>
    %c0_143 = arith.constant 0 : index
    %c17920 = arith.constant 17920 : index
    %424 = vector.load %arg3[%c0_143, %c17920] : memref<8x32768xf32, #tpu.memory_space<vmem>>, vector<8x128xf32>
    %425 = arith.mulf %424, %424 : vector<8x128xf32>
    %426 = arith.addf %423, %425 : vector<8x128xf32>
    %c0_144 = arith.constant 0 : index
    %c18048 = arith.constant 18048 : index
    %427 = vector.load %arg3[%c0_144, %c18048] : memref<8x32768xf32, #tpu.memory_space<vmem>>, vector<8x128xf32>
    %428 = arith.mulf %427, %427 : vector<8x128xf32>
    %429 = arith.addf %426, %428 : vector<8x128xf32>
    %c0_145 = arith.constant 0 : index
    %c18176 = arith.constant 18176 : index
    %430 = vector.load %arg3[%c0_145, %c18176] : memref<8x32768xf32, #tpu.memory_space<vmem>>, vector<8x128xf32>
    %431 = arith.mulf %430, %430 : vector<8x128xf32>
    %432 = arith.addf %429, %431 : vector<8x128xf32>
    %c0_146 = arith.constant 0 : index
    %c18304 = arith.constant 18304 : index
    %433 = vector.load %arg3[%c0_146, %c18304] : memref<8x32768xf32, #tpu.memory_space<vmem>>, vector<8x128xf32>
    %434 = arith.mulf %433, %433 : vector<8x128xf32>
    %435 = arith.addf %432, %434 : vector<8x128xf32>
    %c0_147 = arith.constant 0 : index
    %c18432 = arith.constant 18432 : index
    %436 = vector.load %arg3[%c0_147, %c18432] : memref<8x32768xf32, #tpu.memory_space<vmem>>, vector<8x128xf32>
    %437 = arith.mulf %436, %436 : vector<8x128xf32>
    %438 = arith.addf %435, %437 : vector<8x128xf32>
    %c0_148 = arith.constant 0 : index
    %c18560 = arith.constant 18560 : index
    %439 = vector.load %arg3[%c0_148, %c18560] : memref<8x32768xf32, #tpu.memory_space<vmem>>, vector<8x128xf32>
    %440 = arith.mulf %439, %439 : vector<8x128xf32>
    %441 = arith.addf %438, %440 : vector<8x128xf32>
    %c0_149 = arith.constant 0 : index
    %c18688 = arith.constant 18688 : index
    %442 = vector.load %arg3[%c0_149, %c18688] : memref<8x32768xf32, #tpu.memory_space<vmem>>, vector<8x128xf32>
    %443 = arith.mulf %442, %442 : vector<8x128xf32>
    %444 = arith.addf %441, %443 : vector<8x128xf32>
    %c0_150 = arith.constant 0 : index
    %c18816 = arith.constant 18816 : index
    %445 = vector.load %arg3[%c0_150, %c18816] : memref<8x32768xf32, #tpu.memory_space<vmem>>, vector<8x128xf32>
    %446 = arith.mulf %445, %445 : vector<8x128xf32>
    %447 = arith.addf %444, %446 : vector<8x128xf32>
    %c0_151 = arith.constant 0 : index
    %c18944 = arith.constant 18944 : index
    %448 = vector.load %arg3[%c0_151, %c18944] : memref<8x32768xf32, #tpu.memory_space<vmem>>, vector<8x128xf32>
    %449 = arith.mulf %448, %448 : vector<8x128xf32>
    %450 = arith.addf %447, %449 : vector<8x128xf32>
    %c0_152 = arith.constant 0 : index
    %c19072 = arith.constant 19072 : index
    %451 = vector.load %arg3[%c0_152, %c19072] : memref<8x32768xf32, #tpu.memory_space<vmem>>, vector<8x128xf32>
    %452 = arith.mulf %451, %451 : vector<8x128xf32>
    %453 = arith.addf %450, %452 : vector<8x128xf32>
    %c0_153 = arith.constant 0 : index
    %c19200 = arith.constant 19200 : index
    %454 = vector.load %arg3[%c0_153, %c19200] : memref<8x32768xf32, #tpu.memory_space<vmem>>, vector<8x128xf32>
    %455 = arith.mulf %454, %454 : vector<8x128xf32>
    %456 = arith.addf %453, %455 : vector<8x128xf32>
    %c0_154 = arith.constant 0 : index
    %c19328 = arith.constant 19328 : index
    %457 = vector.load %arg3[%c0_154, %c19328] : memref<8x32768xf32, #tpu.memory_space<vmem>>, vector<8x128xf32>
    %458 = arith.mulf %457, %457 : vector<8x128xf32>
    %459 = arith.addf %456, %458 : vector<8x128xf32>
    %c0_155 = arith.constant 0 : index
    %c19456 = arith.constant 19456 : index
    %460 = vector.load %arg3[%c0_155, %c19456] : memref<8x32768xf32, #tpu.memory_space<vmem>>, vector<8x128xf32>
    %461 = arith.mulf %460, %460 : vector<8x128xf32>
    %462 = arith.addf %459, %461 : vector<8x128xf32>
    %c0_156 = arith.constant 0 : index
    %c19584 = arith.constant 19584 : index
    %463 = vector.load %arg3[%c0_156, %c19584] : memref<8x32768xf32, #tpu.memory_space<vmem>>, vector<8x128xf32>
    %464 = arith.mulf %463, %463 : vector<8x128xf32>
    %465 = arith.addf %462, %464 : vector<8x128xf32>
    %c0_157 = arith.constant 0 : index
    %c19712 = arith.constant 19712 : index
    %466 = vector.load %arg3[%c0_157, %c19712] : memref<8x32768xf32, #tpu.memory_space<vmem>>, vector<8x128xf32>
    %467 = arith.mulf %466, %466 : vector<8x128xf32>
    %468 = arith.addf %465, %467 : vector<8x128xf32>
    %c0_158 = arith.constant 0 : index
    %c19840 = arith.constant 19840 : index
    %469 = vector.load %arg3[%c0_158, %c19840] : memref<8x32768xf32, #tpu.memory_space<vmem>>, vector<8x128xf32>
    %470 = arith.mulf %469, %469 : vector<8x128xf32>
    %471 = arith.addf %468, %470 : vector<8x128xf32>
    %c0_159 = arith.constant 0 : index
    %c19968 = arith.constant 19968 : index
    %472 = vector.load %arg3[%c0_159, %c19968] : memref<8x32768xf32, #tpu.memory_space<vmem>>, vector<8x128xf32>
    %473 = arith.mulf %472, %472 : vector<8x128xf32>
    %474 = arith.addf %471, %473 : vector<8x128xf32>
    %c0_160 = arith.constant 0 : index
    %c20096 = arith.constant 20096 : index
    %475 = vector.load %arg3[%c0_160, %c20096] : memref<8x32768xf32, #tpu.memory_space<vmem>>, vector<8x128xf32>
    %476 = arith.mulf %475, %475 : vector<8x128xf32>
    %477 = arith.addf %474, %476 : vector<8x128xf32>
    %c0_161 = arith.constant 0 : index
    %c20224 = arith.constant 20224 : index
    %478 = vector.load %arg3[%c0_161, %c20224] : memref<8x32768xf32, #tpu.memory_space<vmem>>, vector<8x128xf32>
    %479 = arith.mulf %478, %478 : vector<8x128xf32>
    %480 = arith.addf %477, %479 : vector<8x128xf32>
    %c0_162 = arith.constant 0 : index
    %c20352 = arith.constant 20352 : index
    %481 = vector.load %arg3[%c0_162, %c20352] : memref<8x32768xf32, #tpu.memory_space<vmem>>, vector<8x128xf32>
    %482 = arith.mulf %481, %481 : vector<8x128xf32>
    %483 = arith.addf %480, %482 : vector<8x128xf32>
    %c0_163 = arith.constant 0 : index
    %c20480 = arith.constant 20480 : index
    %484 = vector.load %arg3[%c0_163, %c20480] : memref<8x32768xf32, #tpu.memory_space<vmem>>, vector<8x128xf32>
    %485 = arith.mulf %484, %484 : vector<8x128xf32>
    %486 = arith.addf %483, %485 : vector<8x128xf32>
    %c0_164 = arith.constant 0 : index
    %c20608 = arith.constant 20608 : index
    %487 = vector.load %arg3[%c0_164, %c20608] : memref<8x32768xf32, #tpu.memory_space<vmem>>, vector<8x128xf32>
    %488 = arith.mulf %487, %487 : vector<8x128xf32>
    %489 = arith.addf %486, %488 : vector<8x128xf32>
    %c0_165 = arith.constant 0 : index
    %c20736 = arith.constant 20736 : index
    %490 = vector.load %arg3[%c0_165, %c20736] : memref<8x32768xf32, #tpu.memory_space<vmem>>, vector<8x128xf32>
    %491 = arith.mulf %490, %490 : vector<8x128xf32>
    %492 = arith.addf %489, %491 : vector<8x128xf32>
    %c0_166 = arith.constant 0 : index
    %c20864 = arith.constant 20864 : index
    %493 = vector.load %arg3[%c0_166, %c20864] : memref<8x32768xf32, #tpu.memory_space<vmem>>, vector<8x128xf32>
    %494 = arith.mulf %493, %493 : vector<8x128xf32>
    %495 = arith.addf %492, %494 : vector<8x128xf32>
    %c0_167 = arith.constant 0 : index
    %c20992 = arith.constant 20992 : index
    %496 = vector.load %arg3[%c0_167, %c20992] : memref<8x32768xf32, #tpu.memory_space<vmem>>, vector<8x128xf32>
    %497 = arith.mulf %496, %496 : vector<8x128xf32>
    %498 = arith.addf %495, %497 : vector<8x128xf32>
    %c0_168 = arith.constant 0 : index
    %c21120 = arith.constant 21120 : index
    %499 = vector.load %arg3[%c0_168, %c21120] : memref<8x32768xf32, #tpu.memory_space<vmem>>, vector<8x128xf32>
    %500 = arith.mulf %499, %499 : vector<8x128xf32>
    %501 = arith.addf %498, %500 : vector<8x128xf32>
    %c0_169 = arith.constant 0 : index
    %c21248 = arith.constant 21248 : index
    %502 = vector.load %arg3[%c0_169, %c21248] : memref<8x32768xf32, #tpu.memory_space<vmem>>, vector<8x128xf32>
    %503 = arith.mulf %502, %502 : vector<8x128xf32>
    %504 = arith.addf %501, %503 : vector<8x128xf32>
    %c0_170 = arith.constant 0 : index
    %c21376 = arith.constant 21376 : index
    %505 = vector.load %arg3[%c0_170, %c21376] : memref<8x32768xf32, #tpu.memory_space<vmem>>, vector<8x128xf32>
    %506 = arith.mulf %505, %505 : vector<8x128xf32>
    %507 = arith.addf %504, %506 : vector<8x128xf32>
    %c0_171 = arith.constant 0 : index
    %c21504 = arith.constant 21504 : index
    %508 = vector.load %arg3[%c0_171, %c21504] : memref<8x32768xf32, #tpu.memory_space<vmem>>, vector<8x128xf32>
    %509 = arith.mulf %508, %508 : vector<8x128xf32>
    %510 = arith.addf %507, %509 : vector<8x128xf32>
    %c0_172 = arith.constant 0 : index
    %c21632 = arith.constant 21632 : index
    %511 = vector.load %arg3[%c0_172, %c21632] : memref<8x32768xf32, #tpu.memory_space<vmem>>, vector<8x128xf32>
    %512 = arith.mulf %511, %511 : vector<8x128xf32>
    %513 = arith.addf %510, %512 : vector<8x128xf32>
    %c0_173 = arith.constant 0 : index
    %c21760 = arith.constant 21760 : index
    %514 = vector.load %arg3[%c0_173, %c21760] : memref<8x32768xf32, #tpu.memory_space<vmem>>, vector<8x128xf32>
    %515 = arith.mulf %514, %514 : vector<8x128xf32>
    %516 = arith.addf %513, %515 : vector<8x128xf32>
    %c0_174 = arith.constant 0 : index
    %c21888 = arith.constant 21888 : index
    %517 = vector.load %arg3[%c0_174, %c21888] : memref<8x32768xf32, #tpu.memory_space<vmem>>, vector<8x128xf32>
    %518 = arith.mulf %517, %517 : vector<8x128xf32>
    %519 = arith.addf %516, %518 : vector<8x128xf32>
    %c0_175 = arith.constant 0 : index
    %c22016 = arith.constant 22016 : index
    %520 = vector.load %arg3[%c0_175, %c22016] : memref<8x32768xf32, #tpu.memory_space<vmem>>, vector<8x128xf32>
    %521 = arith.mulf %520, %520 : vector<8x128xf32>
    %522 = arith.addf %519, %521 : vector<8x128xf32>
    %c0_176 = arith.constant 0 : index
    %c22144 = arith.constant 22144 : index
    %523 = vector.load %arg3[%c0_176, %c22144] : memref<8x32768xf32, #tpu.memory_space<vmem>>, vector<8x128xf32>
    %524 = arith.mulf %523, %523 : vector<8x128xf32>
    %525 = arith.addf %522, %524 : vector<8x128xf32>
    %c0_177 = arith.constant 0 : index
    %c22272 = arith.constant 22272 : index
    %526 = vector.load %arg3[%c0_177, %c22272] : memref<8x32768xf32, #tpu.memory_space<vmem>>, vector<8x128xf32>
    %527 = arith.mulf %526, %526 : vector<8x128xf32>
    %528 = arith.addf %525, %527 : vector<8x128xf32>
    %c0_178 = arith.constant 0 : index
    %c22400 = arith.constant 22400 : index
    %529 = vector.load %arg3[%c0_178, %c22400] : memref<8x32768xf32, #tpu.memory_space<vmem>>, vector<8x128xf32>
    %530 = arith.mulf %529, %529 : vector<8x128xf32>
    %531 = arith.addf %528, %530 : vector<8x128xf32>
    %c0_179 = arith.constant 0 : index
    %c22528 = arith.constant 22528 : index
    %532 = vector.load %arg3[%c0_179, %c22528] : memref<8x32768xf32, #tpu.memory_space<vmem>>, vector<8x128xf32>
    %533 = arith.mulf %532, %532 : vector<8x128xf32>
    %534 = arith.addf %531, %533 : vector<8x128xf32>
    %c0_180 = arith.constant 0 : index
    %c22656 = arith.constant 22656 : index
    %535 = vector.load %arg3[%c0_180, %c22656] : memref<8x32768xf32, #tpu.memory_space<vmem>>, vector<8x128xf32>
    %536 = arith.mulf %535, %535 : vector<8x128xf32>
    %537 = arith.addf %534, %536 : vector<8x128xf32>
    %c0_181 = arith.constant 0 : index
    %c22784 = arith.constant 22784 : index
    %538 = vector.load %arg3[%c0_181, %c22784] : memref<8x32768xf32, #tpu.memory_space<vmem>>, vector<8x128xf32>
    %539 = arith.mulf %538, %538 : vector<8x128xf32>
    %540 = arith.addf %537, %539 : vector<8x128xf32>
    %c0_182 = arith.constant 0 : index
    %c22912 = arith.constant 22912 : index
    %541 = vector.load %arg3[%c0_182, %c22912] : memref<8x32768xf32, #tpu.memory_space<vmem>>, vector<8x128xf32>
    %542 = arith.mulf %541, %541 : vector<8x128xf32>
    %543 = arith.addf %540, %542 : vector<8x128xf32>
    %c0_183 = arith.constant 0 : index
    %c23040 = arith.constant 23040 : index
    %544 = vector.load %arg3[%c0_183, %c23040] : memref<8x32768xf32, #tpu.memory_space<vmem>>, vector<8x128xf32>
    %545 = arith.mulf %544, %544 : vector<8x128xf32>
    %546 = arith.addf %543, %545 : vector<8x128xf32>
    %c0_184 = arith.constant 0 : index
    %c23168 = arith.constant 23168 : index
    %547 = vector.load %arg3[%c0_184, %c23168] : memref<8x32768xf32, #tpu.memory_space<vmem>>, vector<8x128xf32>
    %548 = arith.mulf %547, %547 : vector<8x128xf32>
    %549 = arith.addf %546, %548 : vector<8x128xf32>
    %c0_185 = arith.constant 0 : index
    %c23296 = arith.constant 23296 : index
    %550 = vector.load %arg3[%c0_185, %c23296] : memref<8x32768xf32, #tpu.memory_space<vmem>>, vector<8x128xf32>
    %551 = arith.mulf %550, %550 : vector<8x128xf32>
    %552 = arith.addf %549, %551 : vector<8x128xf32>
    %c0_186 = arith.constant 0 : index
    %c23424 = arith.constant 23424 : index
    %553 = vector.load %arg3[%c0_186, %c23424] : memref<8x32768xf32, #tpu.memory_space<vmem>>, vector<8x128xf32>
    %554 = arith.mulf %553, %553 : vector<8x128xf32>
    %555 = arith.addf %552, %554 : vector<8x128xf32>
    %c0_187 = arith.constant 0 : index
    %c23552 = arith.constant 23552 : index
    %556 = vector.load %arg3[%c0_187, %c23552] : memref<8x32768xf32, #tpu.memory_space<vmem>>, vector<8x128xf32>
    %557 = arith.mulf %556, %556 : vector<8x128xf32>
    %558 = arith.addf %555, %557 : vector<8x128xf32>
    %c0_188 = arith.constant 0 : index
    %c23680 = arith.constant 23680 : index
    %559 = vector.load %arg3[%c0_188, %c23680] : memref<8x32768xf32, #tpu.memory_space<vmem>>, vector<8x128xf32>
    %560 = arith.mulf %559, %559 : vector<8x128xf32>
    %561 = arith.addf %558, %560 : vector<8x128xf32>
    %c0_189 = arith.constant 0 : index
    %c23808 = arith.constant 23808 : index
    %562 = vector.load %arg3[%c0_189, %c23808] : memref<8x32768xf32, #tpu.memory_space<vmem>>, vector<8x128xf32>
    %563 = arith.mulf %562, %562 : vector<8x128xf32>
    %564 = arith.addf %561, %563 : vector<8x128xf32>
    %c0_190 = arith.constant 0 : index
    %c23936 = arith.constant 23936 : index
    %565 = vector.load %arg3[%c0_190, %c23936] : memref<8x32768xf32, #tpu.memory_space<vmem>>, vector<8x128xf32>
    %566 = arith.mulf %565, %565 : vector<8x128xf32>
    %567 = arith.addf %564, %566 : vector<8x128xf32>
    %c0_191 = arith.constant 0 : index
    %c24064 = arith.constant 24064 : index
    %568 = vector.load %arg3[%c0_191, %c24064] : memref<8x32768xf32, #tpu.memory_space<vmem>>, vector<8x128xf32>
    %569 = arith.mulf %568, %568 : vector<8x128xf32>
    %570 = arith.addf %567, %569 : vector<8x128xf32>
    %c0_192 = arith.constant 0 : index
    %c24192 = arith.constant 24192 : index
    %571 = vector.load %arg3[%c0_192, %c24192] : memref<8x32768xf32, #tpu.memory_space<vmem>>, vector<8x128xf32>
    %572 = arith.mulf %571, %571 : vector<8x128xf32>
    %573 = arith.addf %570, %572 : vector<8x128xf32>
    %c0_193 = arith.constant 0 : index
    %c24320 = arith.constant 24320 : index
    %574 = vector.load %arg3[%c0_193, %c24320] : memref<8x32768xf32, #tpu.memory_space<vmem>>, vector<8x128xf32>
    %575 = arith.mulf %574, %574 : vector<8x128xf32>
    %576 = arith.addf %573, %575 : vector<8x128xf32>
    %c0_194 = arith.constant 0 : index
    %c24448 = arith.constant 24448 : index
    %577 = vector.load %arg3[%c0_194, %c24448] : memref<8x32768xf32, #tpu.memory_space<vmem>>, vector<8x128xf32>
    %578 = arith.mulf %577, %577 : vector<8x128xf32>
    %579 = arith.addf %576, %578 : vector<8x128xf32>
    %c0_195 = arith.constant 0 : index
    %c24576 = arith.constant 24576 : index
    %580 = vector.load %arg3[%c0_195, %c24576] : memref<8x32768xf32, #tpu.memory_space<vmem>>, vector<8x128xf32>
    %581 = arith.mulf %580, %580 : vector<8x128xf32>
    %582 = arith.addf %579, %581 : vector<8x128xf32>
    %c0_196 = arith.constant 0 : index
    %c24704 = arith.constant 24704 : index
    %583 = vector.load %arg3[%c0_196, %c24704] : memref<8x32768xf32, #tpu.memory_space<vmem>>, vector<8x128xf32>
    %584 = arith.mulf %583, %583 : vector<8x128xf32>
    %585 = arith.addf %582, %584 : vector<8x128xf32>
    %c0_197 = arith.constant 0 : index
    %c24832 = arith.constant 24832 : index
    %586 = vector.load %arg3[%c0_197, %c24832] : memref<8x32768xf32, #tpu.memory_space<vmem>>, vector<8x128xf32>
    %587 = arith.mulf %586, %586 : vector<8x128xf32>
    %588 = arith.addf %585, %587 : vector<8x128xf32>
    %c0_198 = arith.constant 0 : index
    %c24960 = arith.constant 24960 : index
    %589 = vector.load %arg3[%c0_198, %c24960] : memref<8x32768xf32, #tpu.memory_space<vmem>>, vector<8x128xf32>
    %590 = arith.mulf %589, %589 : vector<8x128xf32>
    %591 = arith.addf %588, %590 : vector<8x128xf32>
    %c0_199 = arith.constant 0 : index
    %c25088 = arith.constant 25088 : index
    %592 = vector.load %arg3[%c0_199, %c25088] : memref<8x32768xf32, #tpu.memory_space<vmem>>, vector<8x128xf32>
    %593 = arith.mulf %592, %592 : vector<8x128xf32>
    %594 = arith.addf %591, %593 : vector<8x128xf32>
    %c0_200 = arith.constant 0 : index
    %c25216 = arith.constant 25216 : index
    %595 = vector.load %arg3[%c0_200, %c25216] : memref<8x32768xf32, #tpu.memory_space<vmem>>, vector<8x128xf32>
    %596 = arith.mulf %595, %595 : vector<8x128xf32>
    %597 = arith.addf %594, %596 : vector<8x128xf32>
    %c0_201 = arith.constant 0 : index
    %c25344 = arith.constant 25344 : index
    %598 = vector.load %arg3[%c0_201, %c25344] : memref<8x32768xf32, #tpu.memory_space<vmem>>, vector<8x128xf32>
    %599 = arith.mulf %598, %598 : vector<8x128xf32>
    %600 = arith.addf %597, %599 : vector<8x128xf32>
    %c0_202 = arith.constant 0 : index
    %c25472 = arith.constant 25472 : index
    %601 = vector.load %arg3[%c0_202, %c25472] : memref<8x32768xf32, #tpu.memory_space<vmem>>, vector<8x128xf32>
    %602 = arith.mulf %601, %601 : vector<8x128xf32>
    %603 = arith.addf %600, %602 : vector<8x128xf32>
    %c0_203 = arith.constant 0 : index
    %c25600 = arith.constant 25600 : index
    %604 = vector.load %arg3[%c0_203, %c25600] : memref<8x32768xf32, #tpu.memory_space<vmem>>, vector<8x128xf32>
    %605 = arith.mulf %604, %604 : vector<8x128xf32>
    %606 = arith.addf %603, %605 : vector<8x128xf32>
    %c0_204 = arith.constant 0 : index
    %c25728 = arith.constant 25728 : index
    %607 = vector.load %arg3[%c0_204, %c25728] : memref<8x32768xf32, #tpu.memory_space<vmem>>, vector<8x128xf32>
    %608 = arith.mulf %607, %607 : vector<8x128xf32>
    %609 = arith.addf %606, %608 : vector<8x128xf32>
    %c0_205 = arith.constant 0 : index
    %c25856 = arith.constant 25856 : index
    %610 = vector.load %arg3[%c0_205, %c25856] : memref<8x32768xf32, #tpu.memory_space<vmem>>, vector<8x128xf32>
    %611 = arith.mulf %610, %610 : vector<8x128xf32>
    %612 = arith.addf %609, %611 : vector<8x128xf32>
    %c0_206 = arith.constant 0 : index
    %c25984 = arith.constant 25984 : index
    %613 = vector.load %arg3[%c0_206, %c25984] : memref<8x32768xf32, #tpu.memory_space<vmem>>, vector<8x128xf32>
    %614 = arith.mulf %613, %613 : vector<8x128xf32>
    %615 = arith.addf %612, %614 : vector<8x128xf32>
    %c0_207 = arith.constant 0 : index
    %c26112 = arith.constant 26112 : index
    %616 = vector.load %arg3[%c0_207, %c26112] : memref<8x32768xf32, #tpu.memory_space<vmem>>, vector<8x128xf32>
    %617 = arith.mulf %616, %616 : vector<8x128xf32>
    %618 = arith.addf %615, %617 : vector<8x128xf32>
    %c0_208 = arith.constant 0 : index
    %c26240 = arith.constant 26240 : index
    %619 = vector.load %arg3[%c0_208, %c26240] : memref<8x32768xf32, #tpu.memory_space<vmem>>, vector<8x128xf32>
    %620 = arith.mulf %619, %619 : vector<8x128xf32>
    %621 = arith.addf %618, %620 : vector<8x128xf32>
    %c0_209 = arith.constant 0 : index
    %c26368 = arith.constant 26368 : index
    %622 = vector.load %arg3[%c0_209, %c26368] : memref<8x32768xf32, #tpu.memory_space<vmem>>, vector<8x128xf32>
    %623 = arith.mulf %622, %622 : vector<8x128xf32>
    %624 = arith.addf %621, %623 : vector<8x128xf32>
    %c0_210 = arith.constant 0 : index
    %c26496 = arith.constant 26496 : index
    %625 = vector.load %arg3[%c0_210, %c26496] : memref<8x32768xf32, #tpu.memory_space<vmem>>, vector<8x128xf32>
    %626 = arith.mulf %625, %625 : vector<8x128xf32>
    %627 = arith.addf %624, %626 : vector<8x128xf32>
    %c0_211 = arith.constant 0 : index
    %c26624 = arith.constant 26624 : index
    %628 = vector.load %arg3[%c0_211, %c26624] : memref<8x32768xf32, #tpu.memory_space<vmem>>, vector<8x128xf32>
    %629 = arith.mulf %628, %628 : vector<8x128xf32>
    %630 = arith.addf %627, %629 : vector<8x128xf32>
    %c0_212 = arith.constant 0 : index
    %c26752 = arith.constant 26752 : index
    %631 = vector.load %arg3[%c0_212, %c26752] : memref<8x32768xf32, #tpu.memory_space<vmem>>, vector<8x128xf32>
    %632 = arith.mulf %631, %631 : vector<8x128xf32>
    %633 = arith.addf %630, %632 : vector<8x128xf32>
    %c0_213 = arith.constant 0 : index
    %c26880 = arith.constant 26880 : index
    %634 = vector.load %arg3[%c0_213, %c26880] : memref<8x32768xf32, #tpu.memory_space<vmem>>, vector<8x128xf32>
    %635 = arith.mulf %634, %634 : vector<8x128xf32>
    %636 = arith.addf %633, %635 : vector<8x128xf32>
    %c0_214 = arith.constant 0 : index
    %c27008 = arith.constant 27008 : index
    %637 = vector.load %arg3[%c0_214, %c27008] : memref<8x32768xf32, #tpu.memory_space<vmem>>, vector<8x128xf32>
    %638 = arith.mulf %637, %637 : vector<8x128xf32>
    %639 = arith.addf %636, %638 : vector<8x128xf32>
    %c0_215 = arith.constant 0 : index
    %c27136 = arith.constant 27136 : index
    %640 = vector.load %arg3[%c0_215, %c27136] : memref<8x32768xf32, #tpu.memory_space<vmem>>, vector<8x128xf32>
    %641 = arith.mulf %640, %640 : vector<8x128xf32>
    %642 = arith.addf %639, %641 : vector<8x128xf32>
    %c0_216 = arith.constant 0 : index
    %c27264 = arith.constant 27264 : index
    %643 = vector.load %arg3[%c0_216, %c27264] : memref<8x32768xf32, #tpu.memory_space<vmem>>, vector<8x128xf32>
    %644 = arith.mulf %643, %643 : vector<8x128xf32>
    %645 = arith.addf %642, %644 : vector<8x128xf32>
    %c0_217 = arith.constant 0 : index
    %c27392 = arith.constant 27392 : index
    %646 = vector.load %arg3[%c0_217, %c27392] : memref<8x32768xf32, #tpu.memory_space<vmem>>, vector<8x128xf32>
    %647 = arith.mulf %646, %646 : vector<8x128xf32>
    %648 = arith.addf %645, %647 : vector<8x128xf32>
    %c0_218 = arith.constant 0 : index
    %c27520 = arith.constant 27520 : index
    %649 = vector.load %arg3[%c0_218, %c27520] : memref<8x32768xf32, #tpu.memory_space<vmem>>, vector<8x128xf32>
    %650 = arith.mulf %649, %649 : vector<8x128xf32>
    %651 = arith.addf %648, %650 : vector<8x128xf32>
    %c0_219 = arith.constant 0 : index
    %c27648 = arith.constant 27648 : index
    %652 = vector.load %arg3[%c0_219, %c27648] : memref<8x32768xf32, #tpu.memory_space<vmem>>, vector<8x128xf32>
    %653 = arith.mulf %652, %652 : vector<8x128xf32>
    %654 = arith.addf %651, %653 : vector<8x128xf32>
    %c0_220 = arith.constant 0 : index
    %c27776 = arith.constant 27776 : index
    %655 = vector.load %arg3[%c0_220, %c27776] : memref<8x32768xf32, #tpu.memory_space<vmem>>, vector<8x128xf32>
    %656 = arith.mulf %655, %655 : vector<8x128xf32>
    %657 = arith.addf %654, %656 : vector<8x128xf32>
    %c0_221 = arith.constant 0 : index
    %c27904 = arith.constant 27904 : index
    %658 = vector.load %arg3[%c0_221, %c27904] : memref<8x32768xf32, #tpu.memory_space<vmem>>, vector<8x128xf32>
    %659 = arith.mulf %658, %658 : vector<8x128xf32>
    %660 = arith.addf %657, %659 : vector<8x128xf32>
    %c0_222 = arith.constant 0 : index
    %c28032 = arith.constant 28032 : index
    %661 = vector.load %arg3[%c0_222, %c28032] : memref<8x32768xf32, #tpu.memory_space<vmem>>, vector<8x128xf32>
    %662 = arith.mulf %661, %661 : vector<8x128xf32>
    %663 = arith.addf %660, %662 : vector<8x128xf32>
    %c0_223 = arith.constant 0 : index
    %c28160 = arith.constant 28160 : index
    %664 = vector.load %arg3[%c0_223, %c28160] : memref<8x32768xf32, #tpu.memory_space<vmem>>, vector<8x128xf32>
    %665 = arith.mulf %664, %664 : vector<8x128xf32>
    %666 = arith.addf %663, %665 : vector<8x128xf32>
    %c0_224 = arith.constant 0 : index
    %c28288 = arith.constant 28288 : index
    %667 = vector.load %arg3[%c0_224, %c28288] : memref<8x32768xf32, #tpu.memory_space<vmem>>, vector<8x128xf32>
    %668 = arith.mulf %667, %667 : vector<8x128xf32>
    %669 = arith.addf %666, %668 : vector<8x128xf32>
    %c0_225 = arith.constant 0 : index
    %c28416 = arith.constant 28416 : index
    %670 = vector.load %arg3[%c0_225, %c28416] : memref<8x32768xf32, #tpu.memory_space<vmem>>, vector<8x128xf32>
    %671 = arith.mulf %670, %670 : vector<8x128xf32>
    %672 = arith.addf %669, %671 : vector<8x128xf32>
    %c0_226 = arith.constant 0 : index
    %c28544 = arith.constant 28544 : index
    %673 = vector.load %arg3[%c0_226, %c28544] : memref<8x32768xf32, #tpu.memory_space<vmem>>, vector<8x128xf32>
    %674 = arith.mulf %673, %673 : vector<8x128xf32>
    %675 = arith.addf %672, %674 : vector<8x128xf32>
    %c0_227 = arith.constant 0 : index
    %c28672 = arith.constant 28672 : index
    %676 = vector.load %arg3[%c0_227, %c28672] : memref<8x32768xf32, #tpu.memory_space<vmem>>, vector<8x128xf32>
    %677 = arith.mulf %676, %676 : vector<8x128xf32>
    %678 = arith.addf %675, %677 : vector<8x128xf32>
    %c0_228 = arith.constant 0 : index
    %c28800 = arith.constant 28800 : index
    %679 = vector.load %arg3[%c0_228, %c28800] : memref<8x32768xf32, #tpu.memory_space<vmem>>, vector<8x128xf32>
    %680 = arith.mulf %679, %679 : vector<8x128xf32>
    %681 = arith.addf %678, %680 : vector<8x128xf32>
    %c0_229 = arith.constant 0 : index
    %c28928 = arith.constant 28928 : index
    %682 = vector.load %arg3[%c0_229, %c28928] : memref<8x32768xf32, #tpu.memory_space<vmem>>, vector<8x128xf32>
    %683 = arith.mulf %682, %682 : vector<8x128xf32>
    %684 = arith.addf %681, %683 : vector<8x128xf32>
    %c0_230 = arith.constant 0 : index
    %c29056 = arith.constant 29056 : index
    %685 = vector.load %arg3[%c0_230, %c29056] : memref<8x32768xf32, #tpu.memory_space<vmem>>, vector<8x128xf32>
    %686 = arith.mulf %685, %685 : vector<8x128xf32>
    %687 = arith.addf %684, %686 : vector<8x128xf32>
    %c0_231 = arith.constant 0 : index
    %c29184 = arith.constant 29184 : index
    %688 = vector.load %arg3[%c0_231, %c29184] : memref<8x32768xf32, #tpu.memory_space<vmem>>, vector<8x128xf32>
    %689 = arith.mulf %688, %688 : vector<8x128xf32>
    %690 = arith.addf %687, %689 : vector<8x128xf32>
    %c0_232 = arith.constant 0 : index
    %c29312 = arith.constant 29312 : index
    %691 = vector.load %arg3[%c0_232, %c29312] : memref<8x32768xf32, #tpu.memory_space<vmem>>, vector<8x128xf32>
    %692 = arith.mulf %691, %691 : vector<8x128xf32>
    %693 = arith.addf %690, %692 : vector<8x128xf32>
    %c0_233 = arith.constant 0 : index
    %c29440 = arith.constant 29440 : index
    %694 = vector.load %arg3[%c0_233, %c29440] : memref<8x32768xf32, #tpu.memory_space<vmem>>, vector<8x128xf32>
    %695 = arith.mulf %694, %694 : vector<8x128xf32>
    %696 = arith.addf %693, %695 : vector<8x128xf32>
    %c0_234 = arith.constant 0 : index
    %c29568 = arith.constant 29568 : index
    %697 = vector.load %arg3[%c0_234, %c29568] : memref<8x32768xf32, #tpu.memory_space<vmem>>, vector<8x128xf32>
    %698 = arith.mulf %697, %697 : vector<8x128xf32>
    %699 = arith.addf %696, %698 : vector<8x128xf32>
    %c0_235 = arith.constant 0 : index
    %c29696 = arith.constant 29696 : index
    %700 = vector.load %arg3[%c0_235, %c29696] : memref<8x32768xf32, #tpu.memory_space<vmem>>, vector<8x128xf32>
    %701 = arith.mulf %700, %700 : vector<8x128xf32>
    %702 = arith.addf %699, %701 : vector<8x128xf32>
    %c0_236 = arith.constant 0 : index
    %c29824 = arith.constant 29824 : index
    %703 = vector.load %arg3[%c0_236, %c29824] : memref<8x32768xf32, #tpu.memory_space<vmem>>, vector<8x128xf32>
    %704 = arith.mulf %703, %703 : vector<8x128xf32>
    %705 = arith.addf %702, %704 : vector<8x128xf32>
    %c0_237 = arith.constant 0 : index
    %c29952 = arith.constant 29952 : index
    %706 = vector.load %arg3[%c0_237, %c29952] : memref<8x32768xf32, #tpu.memory_space<vmem>>, vector<8x128xf32>
    %707 = arith.mulf %706, %706 : vector<8x128xf32>
    %708 = arith.addf %705, %707 : vector<8x128xf32>
    %c0_238 = arith.constant 0 : index
    %c30080 = arith.constant 30080 : index
    %709 = vector.load %arg3[%c0_238, %c30080] : memref<8x32768xf32, #tpu.memory_space<vmem>>, vector<8x128xf32>
    %710 = arith.mulf %709, %709 : vector<8x128xf32>
    %711 = arith.addf %708, %710 : vector<8x128xf32>
    %c0_239 = arith.constant 0 : index
    %c30208 = arith.constant 30208 : index
    %712 = vector.load %arg3[%c0_239, %c30208] : memref<8x32768xf32, #tpu.memory_space<vmem>>, vector<8x128xf32>
    %713 = arith.mulf %712, %712 : vector<8x128xf32>
    %714 = arith.addf %711, %713 : vector<8x128xf32>
    %c0_240 = arith.constant 0 : index
    %c30336 = arith.constant 30336 : index
    %715 = vector.load %arg3[%c0_240, %c30336] : memref<8x32768xf32, #tpu.memory_space<vmem>>, vector<8x128xf32>
    %716 = arith.mulf %715, %715 : vector<8x128xf32>
    %717 = arith.addf %714, %716 : vector<8x128xf32>
    %c0_241 = arith.constant 0 : index
    %c30464 = arith.constant 30464 : index
    %718 = vector.load %arg3[%c0_241, %c30464] : memref<8x32768xf32, #tpu.memory_space<vmem>>, vector<8x128xf32>
    %719 = arith.mulf %718, %718 : vector<8x128xf32>
    %720 = arith.addf %717, %719 : vector<8x128xf32>
    %c0_242 = arith.constant 0 : index
    %c30592 = arith.constant 30592 : index
    %721 = vector.load %arg3[%c0_242, %c30592] : memref<8x32768xf32, #tpu.memory_space<vmem>>, vector<8x128xf32>
    %722 = arith.mulf %721, %721 : vector<8x128xf32>
    %723 = arith.addf %720, %722 : vector<8x128xf32>
    %c0_243 = arith.constant 0 : index
    %c30720 = arith.constant 30720 : index
    %724 = vector.load %arg3[%c0_243, %c30720] : memref<8x32768xf32, #tpu.memory_space<vmem>>, vector<8x128xf32>
    %725 = arith.mulf %724, %724 : vector<8x128xf32>
    %726 = arith.addf %723, %725 : vector<8x128xf32>
    %c0_244 = arith.constant 0 : index
    %c30848 = arith.constant 30848 : index
    %727 = vector.load %arg3[%c0_244, %c30848] : memref<8x32768xf32, #tpu.memory_space<vmem>>, vector<8x128xf32>
    %728 = arith.mulf %727, %727 : vector<8x128xf32>
    %729 = arith.addf %726, %728 : vector<8x128xf32>
    %c0_245 = arith.constant 0 : index
    %c30976 = arith.constant 30976 : index
    %730 = vector.load %arg3[%c0_245, %c30976] : memref<8x32768xf32, #tpu.memory_space<vmem>>, vector<8x128xf32>
    %731 = arith.mulf %730, %730 : vector<8x128xf32>
    %732 = arith.addf %729, %731 : vector<8x128xf32>
    %c0_246 = arith.constant 0 : index
    %c31104 = arith.constant 31104 : index
    %733 = vector.load %arg3[%c0_246, %c31104] : memref<8x32768xf32, #tpu.memory_space<vmem>>, vector<8x128xf32>
    %734 = arith.mulf %733, %733 : vector<8x128xf32>
    %735 = arith.addf %732, %734 : vector<8x128xf32>
    %c0_247 = arith.constant 0 : index
    %c31232 = arith.constant 31232 : index
    %736 = vector.load %arg3[%c0_247, %c31232] : memref<8x32768xf32, #tpu.memory_space<vmem>>, vector<8x128xf32>
    %737 = arith.mulf %736, %736 : vector<8x128xf32>
    %738 = arith.addf %735, %737 : vector<8x128xf32>
    %c0_248 = arith.constant 0 : index
    %c31360 = arith.constant 31360 : index
    %739 = vector.load %arg3[%c0_248, %c31360] : memref<8x32768xf32, #tpu.memory_space<vmem>>, vector<8x128xf32>
    %740 = arith.mulf %739, %739 : vector<8x128xf32>
    %741 = arith.addf %738, %740 : vector<8x128xf32>
    %c0_249 = arith.constant 0 : index
    %c31488 = arith.constant 31488 : index
    %742 = vector.load %arg3[%c0_249, %c31488] : memref<8x32768xf32, #tpu.memory_space<vmem>>, vector<8x128xf32>
    %743 = arith.mulf %742, %742 : vector<8x128xf32>
    %744 = arith.addf %741, %743 : vector<8x128xf32>
    %c0_250 = arith.constant 0 : index
    %c31616 = arith.constant 31616 : index
    %745 = vector.load %arg3[%c0_250, %c31616] : memref<8x32768xf32, #tpu.memory_space<vmem>>, vector<8x128xf32>
    %746 = arith.mulf %745, %745 : vector<8x128xf32>
    %747 = arith.addf %744, %746 : vector<8x128xf32>
    %c0_251 = arith.constant 0 : index
    %c31744 = arith.constant 31744 : index
    %748 = vector.load %arg3[%c0_251, %c31744] : memref<8x32768xf32, #tpu.memory_space<vmem>>, vector<8x128xf32>
    %749 = arith.mulf %748, %748 : vector<8x128xf32>
    %750 = arith.addf %747, %749 : vector<8x128xf32>
    %c0_252 = arith.constant 0 : index
    %c31872 = arith.constant 31872 : index
    %751 = vector.load %arg3[%c0_252, %c31872] : memref<8x32768xf32, #tpu.memory_space<vmem>>, vector<8x128xf32>
    %752 = arith.mulf %751, %751 : vector<8x128xf32>
    %753 = arith.addf %750, %752 : vector<8x128xf32>
    %c0_253 = arith.constant 0 : index
    %c32000 = arith.constant 32000 : index
    %754 = vector.load %arg3[%c0_253, %c32000] : memref<8x32768xf32, #tpu.memory_space<vmem>>, vector<8x128xf32>
    %755 = arith.mulf %754, %754 : vector<8x128xf32>
    %756 = arith.addf %753, %755 : vector<8x128xf32>
    %c0_254 = arith.constant 0 : index
    %c32128 = arith.constant 32128 : index
    %757 = vector.load %arg3[%c0_254, %c32128] : memref<8x32768xf32, #tpu.memory_space<vmem>>, vector<8x128xf32>
    %758 = arith.mulf %757, %757 : vector<8x128xf32>
    %759 = arith.addf %756, %758 : vector<8x128xf32>
    %c0_255 = arith.constant 0 : index
    %c32256 = arith.constant 32256 : index
    %760 = vector.load %arg3[%c0_255, %c32256] : memref<8x32768xf32, #tpu.memory_space<vmem>>, vector<8x128xf32>
    %761 = arith.mulf %760, %760 : vector<8x128xf32>
    %762 = arith.addf %759, %761 : vector<8x128xf32>
    %c0_256 = arith.constant 0 : index
    %c32384 = arith.constant 32384 : index
    %763 = vector.load %arg3[%c0_256, %c32384] : memref<8x32768xf32, #tpu.memory_space<vmem>>, vector<8x128xf32>
    %764 = arith.mulf %763, %763 : vector<8x128xf32>
    %765 = arith.addf %762, %764 : vector<8x128xf32>
    %c0_257 = arith.constant 0 : index
    %c32512 = arith.constant 32512 : index
    %766 = vector.load %arg3[%c0_257, %c32512] : memref<8x32768xf32, #tpu.memory_space<vmem>>, vector<8x128xf32>
    %767 = arith.mulf %766, %766 : vector<8x128xf32>
    %768 = arith.addf %765, %767 : vector<8x128xf32>
    %c0_258 = arith.constant 0 : index
    %c32640 = arith.constant 32640 : index
    %769 = vector.load %arg3[%c0_258, %c32640] : memref<8x32768xf32, #tpu.memory_space<vmem>>, vector<8x128xf32>
    %770 = arith.mulf %769, %769 : vector<8x128xf32>
    %771 = arith.addf %768, %770 : vector<8x128xf32>
    %c0_259 = arith.constant 0 : index
    %c0_260 = arith.constant 0 : index
    %772 = vector.load %arg4[%c0_259, %c0_260] : memref<8x128xf32, #tpu.memory_space<vmem>>, vector<8x128xf32>
    tpu.vector_store %arg4[%c0_259, %c0_260], %771 {strides = array<i32>} : memref<8x128xf32, #tpu.memory_space<vmem>>, vector<8x128xf32>,
    return
  }
  func.func @transform_0(%arg0: i32, %arg1: i32, %arg2: i32) -> (i32, i32) {
    %c2_i32 = arith.constant 2 : i32
    %0 = arith.muli %arg1, %c2_i32 : i32
    %1 = arith.addi %0, %arg2 : i32
    %c0_i32 = arith.constant 0 : i32
    return %arg0, %1 : i32, i32
  }
  func.func @transform_1(%arg0: i32, %arg1: i32, %arg2: i32) -> (i32, i32) {
    %c0_i32 = arith.constant 0 : i32
    return %arg0, %arg1 : i32, i32
  }
}

</mosaic_0001>

<bundles_post_ra>
// kernel: tpu_custom_call.1
= control target key start
LH: loop header
LB: loop body
LE: loop exit
PB: predicated region body
PF: predicated region fallthrough
CT: control target
= control target key end

     0   :  { %6 = vsyncpa [#allocation3], 0  ;;  %s5095_s0 = inlined_call_operand.hbm [shape: f32[4,131072], index: 0, kind: input, shape index: {}]   ;;  %s5096_s1 = inlined_call_operand.hbm [shape: f32[8,256], index: 1, kind: output, shape index: {}]  }
   0x1   :  { %8 = vsyncpa [#allocation3 + $0x1], 0 }
   0x2   :  { %9 = vsyncpa [#allocation4], 0 }
   0x3   :  { %11 = vsyncpa [#allocation4 + $0x1], 0  ;;  %s3651_s6 = smov 0   ;;  %s3653_s7 = smov 0  }
   0x4   :  { %s3655_s8 = smov 0   ;;  %s3657_s9 = smov 0  }
   0x5   :  { %s3659_s10 = smov 0   ;;  %s3661_s11 = smov 0  }
   0x6   :  { %s3663_s12 = smov 0   ;;  %s3665_s13 = smov 0  }
   0x7   :  { %s3667_s14 = smov 0   ;;  %s3669_s15 = smov 0  }
   0x8   :  { %s3671_s16 = smov 0  }
   0x9 LB: > { %s3370_s17 = sadd.s32 4294967295, %s3635_s16   ;;  %s3371_s18 = sadd.s32 4294967294, %s3635_s16   ;;  %s3635_s16 = sphi %s3671_s16, %s17_s16   ;;  %s3631_s15 = sphi %s3669_s15, %s5412_s15   ;;  %s3627_s14 = sphi %s3667_s14, %s5411_s14   ;;  %s3623_s13 = sphi %s3665_s13, %s5410_s13   ;;  %s3619_s12 = sphi %s3663_s12, %s5409_s12   ;;  %s3615_s11 = sphi %s3661_s11, %s5408_s11   ;;  %s3611_s10 = sphi %s3659_s10, %s5407_s10   ;;  %s3607_s9 = sphi %s3657_s9, %s5406_s9   ;;  %s3603_s8 = sphi %s3655_s8, %s5405_s8   ;;  %s3599_s7 = sphi %s3653_s7, %s5404_s7   ;;  %s3595_s6 = sphi %s3651_s6, %s5403_s6  }
   0xa   : > { %s29_s19 = sadd.s32 1, %s3627_s14  ;;  %s32_s20 = sadd.s32 1, %s3631_s15 }
   0xb   : > { %p30_p0 = scmp.ge.s32.totalorder %s29_s19, 2  ;;  %s3372_s21 = sshll.u32 %s3631_s15, 1 }
   0xc   : > { %s3710_s22 = sadd.s32 %s3627_s14, %s3372_s21  ;;  %s49_s23 = sadd.s32 1, %s3615_s11 }
   0xd   : > { %s5414_s19 = smov (%p30_p0, %s29_s19), 0  ;;  %s5416_s20 = smov (!%p30_p0, %s32_s20), %s3631_s15 }
   0xe   : > { %5099 = sst [smem:[#allocation8_spill]] %s5414_s19  ;;  %p56_p1 = scmp.ne.s32.totalorder %s3615_s11, %s3611_s10 }
   0xf   : > { %p57_p2 = scmp.eq.s32.totalorder %s3635_s16, 0  ;;  %p34_p3 = scmp.ge.s32.totalorder %s5416_s20, 2 }
  0x10   : > { %p62_p4 = scmp.ne.s32.totalorder %s3611_s10, %s3607_s9  ;;  %p63_p6 = scmp.eq.s32.totalorder %s3370_s17, 0 }
  0x11   : > { %p3720_p5 = por %p57_p2, %p56_p1  ;;  %s5418_s20 = smov (%p34_p3, %s5416_s20), 0 }
  0x12   : > { %5101 = sst [smem:[#allocation9_spill]] %s5418_s20  ;;  %p3726_p7 = por %p63_p6, %p62_p4 }
  0x13   : > { %s77_s26 = sadd.s32 1, %s3603_s8  ;;  %s3373_s27 = sshll.u32 %s5418_s20, 1 }
  0x14   : > { %s73_s28 = ssub.s32 %s3631_s15, %s5418_s20  ;;  %s43_s29 = sadd.s32 %s3373_s27, %s5414_s19 }
  0x15   : > { %p75_p8 = scmp.eq.s32.totalorder %s73_s28, 0  ;;  %s45_s30 = ssub.s32 %s3710_s22, %s43_s29 }
  0x16   : > { %p87_p9 = scmp.ne.s32.totalorder %s3603_s8, %s3599_s7  ;;  %p47_p10 = scmp.eq.s32.totalorder %s45_s30, 0 }
  0x17   : > { %p88_p11 = scmp.eq.s32.totalorder %s3370_s17, 3  ;;  %p93_p13 = scmp.ne.s32.totalorder %s3599_s7, %s3595_s6 }
  0x18   : > { %s3739_s2 = scalar_select %p75_p8, %s3603_s8, %s77_s26  }
  0x19   : > { %s3742_s3 = scalar_select %p47_p10, %s3615_s11, %s49_s23  }
  0x1a   : > { %p3744_p12 = por %p88_p11, %p87_p9  ;;  %p94_p0 = scmp.eq.s32.totalorder %s3371_s18, 3 }
  0x1b   : > { %p3375_p2 = scmp.ge.s32.totalorder %s3635_s16, 4 }
  0x1c   : > { %p3752_p1 = por %p94_p0, %p93_p13 }
  0x1d   : > { %110 = sbr.rel (%p3375_p2) target bundleno = 44 (0x2c), region = 16 }
  0x22   : > { %113 = sbr.rel (!%p3720_p5) target bundleno = 44 (0x2c), region = 20  ;;  %s114_s9 = sand.u32 (%p3720_p5), 1, %s3615_s11  }
  0x23   : > { %s3376_s17 = sshll.u32 (%p3720_p5), %s114_s9, 11  ;;  %s115_s21 = scalar_lea.sflag (%p3720_p5), [#allocation3], %s114_s9 }
  0x24   : > { %s118_s23 = scalar_lea.vmem (%p3720_p5), [#allocation2], %s3376_s17 }
  0x27   : > { %128 = vsyncadd %s115_s21, 16384  ;;  %s3388_s26 = sshll.u32 %s3710_s22, 10  ;;  %s137_s27 = sshll.u32 %s118_s23, 4  ;;  %s138_s27 = int_to_ptr.vmem [resolvable:$true] %s137_s27 }
  0x28   : > { %s133_s29 = scalar_lea.hbm %s5095_s0, %s3388_s26  ;;  %s3637_s20 = smov 65536  }
  0x29   : > { %s135_s30 = sshll.u32 %s133_s29, 4  ;;  %s3638_s19 = smov 16384   ;;  %s136_s30 = int_to_ptr.hbm [resolvable:$true] %s135_s30 }
  0x2a   : > { %s3639_s24 = smov 1024  }
  0x2b   : > { %143 = dma.hbm_to_vmem [thread:$0]  %s136_s30, 16384, %s138_s27, %s115_s21, %s3637_s20, %s3638_s19, %s3639_s24  }
  0x2c PF: > { %p3380_p3 = scmp.ge.s32.totalorder %s3635_s16, 1  ;;  %p145_p4 = scmp.lt.s32.totalorder %s3635_s16, 5 }
  0x2e   : > { %p146_p5 = pnand %p3380_p3, %p145_p4 }
  0x30   : > { %149 = sbr.rel (%p146_p5) target bundleno = 2526 (0x9de), region = 24 }
  0x35   : > { %s151_s22 = sand.u32 1, %s3611_s10  }
  0x36   : > { %s3381_s9 = sshll.u32 %s151_s22, 11  ;;  %s152_s17 = scalar_lea.sflag [#allocation3], %s151_s22 }
  0x37   : > { %s3767_s23 = scalar_lea.vmem [#allocation2], %s3381_s9 }
  0x38   : > { %3586 = dma.done.wait (%p3726_p7), %s152_s17, 32768  }
  0x39   : > { %3588 = vsyncadd (%p3726_p7), %s152_s17, 4294934528  ;;  %s172_s19 = sand.u32 1, %s3599_s7   ;;  %p3383_p6 = scmp.ne.s32.totalorder %s3619_s12, 0 }
  0x3a   : > { %s3382_s20 = sshll.u32 %s172_s19, 3 }
  0x3b   : > { %s3776_s21 = scalar_lea.vmem [#allocation5], %s3382_s20  ;;  %185 = sbr.rel (%p3383_p6) target bundleno = 66 (0x42), region = 32 }
  0x40   : > { %v3640_v0 = vmov 0.0  }
  0x41   : > { %186 = vst [vmem:[%s3776_s21] sm:$0xff] %v3640_v0 }
  0x42 PF: > { %v188_v1 = vld [vmem:[%s3767_s23] sm:$0xf]  ;;  %v200_v5 = vld [vmem:[%s3767_s23 + $0x4] sm:$0xf]  ;;  %v212_v10 = vld [vmem:[%s3767_s23 + $0x8] sm:$0xf] }
  0x43   : > { %v189_v2 = vld [vmem:[%s3767_s23 + $0x400] sm:$0xf]  ;;  %v190_v3 = vmul.f32 %v188_v1, %v188_v1  ;;  %v201_v6 = vld [vmem:[%s3767_s23 + $0x404] sm:$0xf]  ;;  %v202_v7 = vmul.f32 %v200_v5, %v200_v5  ;;  %v213_v11 = vld [vmem:[%s3767_s23 + $0x408] sm:$0xf]  ;;  %v214_v12 = vmul.f32 %v212_v10, %v212_v10 }
  0x44   : > { %v191_v4 = vmul.f32 %v189_v2, %v189_v2  ;;  %v203_v8 = vmul.f32 %v201_v6, %v201_v6  ;;  %v215_v13 = vmul.f32 %v213_v11, %v213_v11  ;;  %v224_v15 = vld [vmem:[%s3767_s23 + $0xc] sm:$0xf]  ;;  %v236_v20 = vld [vmem:[%s3767_s23 + $0x10] sm:$0xf]  ;;  %v248_v25 = vld [vmem:[%s3767_s23 + $0x14] sm:$0xf] }
  0x45   : > { %194 = vst [vmem:[#allocation1] ss:$2 sm:$0xff] %v190_v3  ;;  %v225_v16 = vld [vmem:[%s3767_s23 + $0x40c] sm:$0xf]  ;;  %v226_v17 = vmul.f32 %v224_v15, %v224_v15  ;;  %v237_v21 = vld [vmem:[%s3767_s23 + $0x410] sm:$0xf]  ;;  %v238_v22 = vmul.f32 %v236_v20, %v236_v20  ;;  %v250_v27 = vmul.f32 %v248_v25, %v248_v25 }
  0x46   : > { %196 = vst [vmem:[#allocation1 + $0x1] ss:$2 sm:$0xff] %v191_v4  ;;  %v227_v18 = vmul.f32 %v225_v16, %v225_v16  ;;  %v239_v23 = vmul.f32 %v237_v21, %v237_v21  ;;  %v249_v26 = vld [vmem:[%s3767_s23 + $0x414] sm:$0xf]  ;;  %v260_v30 = vld [vmem:[%s3767_s23 + $0x18] sm:$0xf] }
  0x47   : > { %v251_v28 = vmul.f32 %v249_v26, %v249_v26  ;;  %v261_v31 = vld [vmem:[%s3767_s23 + $0x418] sm:$0xf]  ;;  %v262_v32 = vmul.f32 %v260_v30, %v260_v30  ;;  %v272_v35 = vld [vmem:[%s3767_s23 + $0x1c] sm:$0xf]  ;;  %v284_v40 = vld [vmem:[%s3767_s23 + $0x20] sm:$0xf] }
  0x48   : > { %v263_v33 = vmul.f32 %v261_v31, %v261_v31  ;;  %v273_v36 = vld [vmem:[%s3767_s23 + $0x41c] sm:$0xf]  ;;  %v274_v37 = vmul.f32 %v272_v35, %v272_v35  ;;  %v285_v41 = vld [vmem:[%s3767_s23 + $0x420] sm:$0xf]  ;;  %v286_v42 = vmul.f32 %v284_v40, %v284_v40  ;;  %v296_v45 = vld [vmem:[%s3767_s23 + $0x24] sm:$0xf] }
  0x49   : > { %v275_v38 = vmul.f32 %v273_v36, %v273_v36  ;;  %v287_v43 = vmul.f32 %v285_v41, %v285_v41  ;;  %v297_v46 = vld [vmem:[%s3767_s23 + $0x424] sm:$0xf]  ;;  %v298_v47 = vmul.f32 %v296_v45, %v296_v45  ;;  %v308_v50 = vld [vmem:[%s3767_s23 + $0x28] sm:$0xf]  ;;  %v320_v55 = vld [vmem:[%s3767_s23 + $0x2c] sm:$0xf] }
  0x4a   : > { %v299_v48 = vmul.f32 %v297_v46, %v297_v46  ;;  %v309_v51 = vld [vmem:[%s3767_s23 + $0x428] sm:$0xf]  ;;  %v310_v52 = vmul.f32 %v308_v50, %v308_v50  ;;  %v321_v56 = vld [vmem:[%s3767_s23 + $0x42c] sm:$0xf]  ;;  %v322_v57 = vmul.f32 %v320_v55, %v320_v55  ;;  %v332_v60 = vld [vmem:[%s3767_s23 + $0x30] sm:$0xf] }
  0x4b   : > { %v311_v53 = vmul.f32 %v309_v51, %v309_v51  ;;  %v323_v58 = vmul.f32 %v321_v56, %v321_v56  ;;  %v333_v61 = vld [vmem:[%s3767_s23 + $0x430] sm:$0xf]  ;;  %v334_v62 = vmul.f32 %v332_v60, %v332_v60  ;;  %v344_v1 = vld [vmem:[%s3767_s23 + $0x34] sm:$0xf]  ;;  %v356_v6 = vld [vmem:[%s3767_s23 + $0x38] sm:$0xf] }
  0x4c   : > { %v335_v63 = vmul.f32 %v333_v61, %v333_v61  ;;  %v345_v2 = vld [vmem:[%s3767_s23 + $0x434] sm:$0xf]  ;;  %v346_v3 = vmul.f32 %v344_v1, %v344_v1  ;;  %v381_v20 = vld [vmem:[%s3767_s23 + $0x440] sm:$0xf]  ;;  %v392_v25 = vld [vmem:[%s3767_s23 + $0x44] sm:$0xf] }
  0x4d   : > { %v3784_v9 = vld.sshfl [vmem:[#allocation1] sm:$0xff pattern:$0x75316420]  ;;  %v347_v4 = vmul.f32 %v345_v2, %v345_v2  ;;  %v393_v26 = vld [vmem:[%s3767_s23 + $0x444] sm:$0xf]  ;;  %s3385_s12 = sshll.u32 %s3623_s13, 3 }
  0x4e   : > { %206 = vst [vmem:[#allocation1] ss:$2 sm:$0xff] %v202_v7  ;;  %v357_v7 = vld [vmem:[%s3767_s23 + $0x438] sm:$0xf]  ;;  %v404_v31 = vld [vmem:[%s3767_s23 + $0x48] sm:$0xf]  ;;  %s3274_s27 = scalar_lea.hbm %s5096_s1, %s3385_s12 }
  0x4f   : > { %208 = vst [vmem:[#allocation1 + $0x1] ss:$2 sm:$0xff] %v203_v8  ;;  %v358_v8 = vmul.f32 %v356_v6, %v356_v6  ;;  %v359_v10 = vmul.f32 %v357_v7, %v357_v7  ;;  %v429_v45 = vld [vmem:[%s3767_s23 + $0x450] sm:$0xf]  ;;  %v440_v50 = vld [vmem:[%s3767_s23 + $0x54] sm:$0xf] }
  0x50   : > { %v441_v51 = vld [vmem:[%s3767_s23 + $0x454] sm:$0xf]  ;;  %v452_v56 = vld [vmem:[%s3767_s23 + $0x58] sm:$0xf]  ;;  %v477_v6 = vld [vmem:[%s3767_s23 + $0x460] sm:$0xf] }
  0x51   : > { %s3276_s18 = sshll.u32 %s3776_s21, 4  ;;  %s3278_s28 = sshll.u32 %s3274_s27, 4  ;;  %s3277_s18 = int_to_ptr.vmem [resolvable:$true] %s3276_s18  ;;  %s3279_s28 = int_to_ptr.hbm [resolvable:$true] %s3278_s28 }
  0x52   : > { %s3262_s29 = scalar_lea.sflag [#allocation4], %s172_s19  ;;  %s3527_s13 = sshra.s32 %s3279_s28, 4  ;;  %s3528_s13 = int_to_ptr.hbm [resolvable:$true] %s3527_s13 }
  0x53   : > { %s3529_s30 = scalar_lea.hbm %s3528_s13, 8  ;;  %s3533_s9 = scalar_lea.hbm %s5096_s1, 16 }
  0x54   : > { %p3530_p7 = scmp.ne.s32.totalorder %s3528_s13, %s3529_s30  ;;  %p3534_p10 = scmp.lt.s32.totalorder %s3528_s13, %s5096_s1 }
  0x55   : > { %p3535_p11 = scmp.lt.s32.totalorder %s3533_s9, %s3529_s30 }
  0x56   : > { %v3788_v14 = vld.sshfl [vmem:[#allocation1] sm:$0xff pattern:$0x75316420]  ;;  %p3531_p8 = pnand %p3530_p7, %p3744_p12 }
  0x57   : > { %218 = vst [vmem:[#allocation1] ss:$2 sm:$0xff] %v214_v12  ;;  %v368_v12 = vld [vmem:[%s3767_s23 + $0x3c] sm:$0xf]  ;;  %p3536_p13 = por %p3535_p11, %p3534_p10 }
  0x58   : > { %220 = vst [vmem:[#allocation1 + $0x1] ss:$2 sm:$0xff] %v215_v13  ;;  %v369_v13 = vld [vmem:[%s3767_s23 + $0x43c] sm:$0xf]  ;;  %v370_v15 = vmul.f32 %v368_v12, %v368_v12  ;;  %v488_v12 = vld [vmem:[%s3767_s23 + $0x64] sm:$0xf]  ;;  %p3532_p9 = pneg %p3531_p8 }
  0x59   : > { %v371_v16 = vmul.f32 %v369_v13, %v369_v13  ;;  %v489_v13 = vld [vmem:[%s3767_s23 + $0x464] sm:$0xf] }
  0x5a   : > { %p3537_p0 = pnand %p3536_p13, %p3532_p9 }
  0x5f   : > { %v3792_v19 = vld.sshfl [vmem:[#allocation1] sm:$0xff pattern:$0x75316420] }
  0x60   : > { %230 = vst [vmem:[#allocation1] ss:$2 sm:$0xff] %v226_v17 }
  0x61   : > { %232 = vst [vmem:[#allocation1 + $0x1] ss:$2 sm:$0xff] %v227_v18  ;;  %v380_v18 = vld [vmem:[%s3767_s23 + $0x40] sm:$0xf] }
  0x62   : > { %v382_v21 = vmul.f32 %v380_v18, %v380_v18 }
  0x68   : > { %v3796_v24 = vld.sshfl [vmem:[#allocation1] sm:$0xff pattern:$0x75316420] }
  0x69   : > { %242 = vst [vmem:[#allocation1] ss:$2 sm:$0xff] %v238_v22  ;;  %v383_v22 = vmul.f32 %v381_v20, %v381_v20  ;;  %v500_v20 = vld [vmem:[%s3767_s23 + $0x68] sm:$0xf] }
  0x6a   : > { %244 = vst [vmem:[#allocation1 + $0x1] ss:$2 sm:$0xff] %v239_v23 }
  0x71   : > { %v3800_v29 = vld.sshfl [vmem:[#allocation1] sm:$0xff pattern:$0x75316420] }
  0x72   : > { %254 = vst [vmem:[#allocation1] ss:$2 sm:$0xff] %v250_v27  ;;  %v394_v27 = vmul.f32 %v392_v25, %v392_v25 }
  0x73   : > { %256 = vst [vmem:[#allocation1 + $0x1] ss:$2 sm:$0xff] %v251_v28  ;;  %v395_v28 = vmul.f32 %v393_v26, %v393_v26 }
  0x7a   : > { %v3804_v34 = vld.sshfl [vmem:[#allocation1] sm:$0xff pattern:$0x75316420] }
  0x7b   : > { %266 = vst [vmem:[#allocation1] ss:$2 sm:$0xff] %v262_v32  ;;  %v405_v32 = vld [vmem:[%s3767_s23 + $0x448] sm:$0xf] }
  0x7c   : > { %268 = vst [vmem:[#allocation1 + $0x1] ss:$2 sm:$0xff] %v263_v33  ;;  %v406_v33 = vmul.f32 %v404_v31, %v404_v31  ;;  %v407_v35 = vmul.f32 %v405_v32, %v405_v32 }
  0x83   : > { %v3808_v39 = vld.sshfl [vmem:[#allocation1] sm:$0xff pattern:$0x75316420] }
  0x84   : > { %278 = vst [vmem:[#allocation1] ss:$2 sm:$0xff] %v274_v37  ;;  %v416_v37 = vld [vmem:[%s3767_s23 + $0x4c] sm:$0xf] }
  0x85   : > { %280 = vst [vmem:[#allocation1 + $0x1] ss:$2 sm:$0xff] %v275_v38  ;;  %v417_v38 = vld [vmem:[%s3767_s23 + $0x44c] sm:$0xf]  ;;  %v418_v40 = vmul.f32 %v416_v37, %v416_v37  ;;  %v525_v37 = vld [vmem:[%s3767_s23 + $0x470] sm:$0xf] }
  0x86   : > { %v419_v41 = vmul.f32 %v417_v38, %v417_v38 }
  0x8c   : > { %v3812_v44 = vld.sshfl [vmem:[#allocation1] sm:$0xff pattern:$0x75316420] }
  0x8d   : > { %290 = vst [vmem:[#allocation1] ss:$2 sm:$0xff] %v286_v42 }
  0x8e   : > { %292 = vst [vmem:[#allocation1 + $0x1] ss:$2 sm:$0xff] %v287_v43  ;;  %v428_v43 = vld [vmem:[%s3767_s23 + $0x50] sm:$0xf] }
  0x8f   : > { %v430_v46 = vmul.f32 %v428_v43, %v428_v43  ;;  %v536_v43 = vld [vmem:[%s3767_s23 + $0x74] sm:$0xf] }
  0x95   : > { %v3816_v49 = vld.sshfl [vmem:[#allocation1] sm:$0xff pattern:$0x75316420] }
  0x96   : > { %302 = vst [vmem:[#allocation1] ss:$2 sm:$0xff] %v298_v47  ;;  %v431_v47 = vmul.f32 %v429_v45, %v429_v45  ;;  %v537_v45 = vld [vmem:[%s3767_s23 + $0x474] sm:$0xf] }
  0x97   : > { %304 = vst [vmem:[#allocation1 + $0x1] ss:$2 sm:$0xff] %v299_v48 }
  0x9e   : > { %v3820_v54 = vld.sshfl [vmem:[#allocation1] sm:$0xff pattern:$0x75316420] }
  0x9f   : > { %314 = vst [vmem:[#allocation1] ss:$2 sm:$0xff] %v310_v52  ;;  %v442_v52 = vmul.f32 %v440_v50, %v440_v50 }
  0xa0   : > { %316 = vst [vmem:[#allocation1 + $0x1] ss:$2 sm:$0xff] %v311_v53  ;;  %v443_v53 = vmul.f32 %v441_v51, %v441_v51  ;;  %v548_v51 = vld [vmem:[%s3767_s23 + $0x78] sm:$0xf] }
  0xa7   : > { %v3824_v59 = vld.sshfl [vmem:[#allocation1] sm:$0xff pattern:$0x75316420] }
  0xa8   : > { %326 = vst [vmem:[#allocation1] ss:$2 sm:$0xff] %v322_v57  ;;  %v453_v57 = vld [vmem:[%s3767_s23 + $0x458] sm:$0xf] }
  0xa9   : > { %328 = vst [vmem:[#allocation1 + $0x1] ss:$2 sm:$0xff] %v323_v58  ;;  %v454_v58 = vmul.f32 %v452_v56, %v452_v56  ;;  %v455_v60 = vmul.f32 %v453_v57, %v453_v57 }
  0xb0   : > { %v3828_v0 = vld.sshfl [vmem:[#allocation1] sm:$0xff pattern:$0x75316420] }
  0xb1   : > { %338 = vst [vmem:[#allocation1] ss:$2 sm:$0xff] %v334_v62  ;;  %v464_v62 = vld [vmem:[%s3767_s23 + $0x5c] sm:$0xf] }
  0xb2   : > { %340 = vst [vmem:[#allocation1 + $0x1] ss:$2 sm:$0xff] %v335_v63  ;;  %v465_v63 = vld [vmem:[%s3767_s23 + $0x45c] sm:$0xf]  ;;  %v466_v1 = vmul.f32 %v464_v62, %v464_v62 }
  0xb3   : > { %v467_v2 = vmul.f32 %v465_v63, %v465_v63 }
  0xb9   : > { %v3832_v5 = vld.sshfl [vmem:[#allocation1] sm:$0xff pattern:$0x75316420] }
  0xba   : > { %350 = vst [vmem:[#allocation1] ss:$2 sm:$0xff] %v346_v3 }
  0xbb   : > { %352 = vst [vmem:[#allocation1 + $0x1] ss:$2 sm:$0xff] %v347_v4  ;;  %v476_v4 = vld [vmem:[%s3767_s23 + $0x60] sm:$0xf] }
  0xbc   : > { %v478_v7 = vmul.f32 %v476_v4, %v476_v4  ;;  %v573_v4 = vld [vmem:[%s3767_s23 + $0x480] sm:$0xf] }
  0xc2   : > { %v3836_v11 = vld.sshfl [vmem:[#allocation1] sm:$0xff pattern:$0x75316420] }
  0xc3   : > { %362 = vst [vmem:[#allocation1] ss:$2 sm:$0xff] %v358_v8  ;;  %v479_v8 = vmul.f32 %v477_v6, %v477_v6 }
  0xc4   : > { %364 = vst [vmem:[#allocation1 + $0x1] ss:$2 sm:$0xff] %v359_v10 }
  0xcb   : > { %v3840_v17 = vld.sshfl [vmem:[#allocation1] sm:$0xff pattern:$0x75316420] }
  0xcc   : > { %374 = vst [vmem:[#allocation1] ss:$2 sm:$0xff] %v370_v15  ;;  %v490_v15 = vmul.f32 %v488_v12, %v488_v12  ;;  %v584_v12 = vld [vmem:[%s3767_s23 + $0x84] sm:$0xf] }
  0xcd   : > { %376 = vst [vmem:[#allocation1 + $0x1] ss:$2 sm:$0xff] %v371_v16  ;;  %v491_v16 = vmul.f32 %v489_v13, %v489_v13  ;;  %v585_v13 = vld [vmem:[%s3767_s23 + $0x484] sm:$0xf] }
  0xd4   : > { %v3844_v23 = vld.sshfl [vmem:[#allocation1] sm:$0xff pattern:$0x75316420] }
  0xd5   : > { %386 = vst [vmem:[#allocation1] ss:$2 sm:$0xff] %v382_v21  ;;  %v501_v21 = vld [vmem:[%s3767_s23 + $0x468] sm:$0xf] }
  0xd6   : > { %388 = vst [vmem:[#allocation1 + $0x1] ss:$2 sm:$0xff] %v383_v22  ;;  %v502_v22 = vmul.f32 %v500_v20, %v500_v20  ;;  %v503_v25 = vmul.f32 %v501_v21, %v501_v21  ;;  %v596_v21 = vld [vmem:[%s3767_s23 + $0x88] sm:$0xf] }
  0xdd   : > { %v3848_v30 = vld.sshfl [vmem:[#allocation1] sm:$0xff pattern:$0x75316420] }
  0xde   : > { %398 = vst [vmem:[#allocation1] ss:$2 sm:$0xff] %v394_v27  ;;  %v512_v27 = vld [vmem:[%s3767_s23 + $0x6c] sm:$0xf] }
  0xdf   : > { %400 = vst [vmem:[#allocation1 + $0x1] ss:$2 sm:$0xff] %v395_v28  ;;  %v513_v28 = vld [vmem:[%s3767_s23 + $0x46c] sm:$0xf]  ;;  %v514_v31 = vmul.f32 %v512_v27, %v512_v27 }
  0xe0   : > { %v515_v32 = vmul.f32 %v513_v28, %v513_v28 }
  0xe6   : > { %v3852_v36 = vld.sshfl [vmem:[#allocation1] sm:$0xff pattern:$0x75316420] }
  0xe7   : > { %410 = vst [vmem:[#allocation1] ss:$2 sm:$0xff] %v406_v33 }
  0xe8   : > { %412 = vst [vmem:[#allocation1 + $0x1] ss:$2 sm:$0xff] %v407_v35  ;;  %v524_v35 = vld [vmem:[%s3767_s23 + $0x70] sm:$0xf] }
  0xe9   : > { %v526_v38 = vmul.f32 %v524_v35, %v524_v35 }
  0xef   : > { %v3856_v42 = vld.sshfl [vmem:[#allocation1] sm:$0xff pattern:$0x75316420] }
  0xf0   : > { %422 = vst [vmem:[#allocation1] ss:$2 sm:$0xff] %v418_v40  ;;  %v527_v40 = vmul.f32 %v525_v37, %v525_v37 }
  0xf1   : > { %424 = vst [vmem:[#allocation1 + $0x1] ss:$2 sm:$0xff] %v419_v41 }
  0xf8   : > { %v3860_v48 = vld.sshfl [vmem:[#allocation1] sm:$0xff pattern:$0x75316420] }
  0xf9   : > { %434 = vst [vmem:[#allocation1] ss:$2 sm:$0xff] %v430_v46  ;;  %v538_v46 = vmul.f32 %v536_v43, %v536_v43  ;;  %v621_v43 = vld [vmem:[%s3767_s23 + $0x490] sm:$0xf] }
  0xfa   : > { %436 = vst [vmem:[#allocation1 + $0x1] ss:$2 sm:$0xff] %v431_v47  ;;  %v539_v47 = vmul.f32 %v537_v45, %v537_v45 }
 0x101   : > { %v3864_v55 = vld.sshfl [vmem:[#allocation1] sm:$0xff pattern:$0x75316420] }
 0x102   : > { %446 = vst [vmem:[#allocation1] ss:$2 sm:$0xff] %v442_v52  ;;  %v549_v52 = vld [vmem:[%s3767_s23 + $0x478] sm:$0xf] }
 0x103   : > { %448 = vst [vmem:[#allocation1 + $0x1] ss:$2 sm:$0xff] %v443_v53  ;;  %v550_v53 = vmul.f32 %v548_v51, %v548_v51  ;;  %v551_v56 = vmul.f32 %v549_v52, %v549_v52  ;;  %v632_v51 = vld [vmem:[%s3767_s23 + $0x94] sm:$0xf] }
 0x104   : > { %v633_v52 = vld [vmem:[%s3767_s23 + $0x494] sm:$0xf] }
 0x10a   : > { %v3868_v61 = vld.sshfl [vmem:[#allocation1] sm:$0xff pattern:$0x75316420] }
 0x10b   : > { %458 = vst [vmem:[#allocation1] ss:$2 sm:$0xff] %v454_v58  ;;  %v560_v58 = vld [vmem:[%s3767_s23 + $0x7c] sm:$0xf] }
 0x10c   : > { %460 = vst [vmem:[#allocation1 + $0x1] ss:$2 sm:$0xff] %v455_v60  ;;  %v561_v60 = vld [vmem:[%s3767_s23 + $0x47c] sm:$0xf]  ;;  %v562_v62 = vmul.f32 %v560_v58, %v560_v58 }
 0x10d   : > { %v563_v63 = vmul.f32 %v561_v60, %v561_v60  ;;  %v644_v60 = vld [vmem:[%s3767_s23 + $0x98] sm:$0xf] }
 0x113   : > { %v3872_v3 = vld.sshfl [vmem:[#allocation1] sm:$0xff pattern:$0x75316420] }
 0x114   : > { %470 = vst [vmem:[#allocation1] ss:$2 sm:$0xff] %v466_v1 }
 0x115   : > { %472 = vst [vmem:[#allocation1 + $0x1] ss:$2 sm:$0xff] %v467_v2  ;;  %v572_v2 = vld [vmem:[%s3767_s23 + $0x80] sm:$0xf] }
 0x116   : > { %v574_v6 = vmul.f32 %v572_v2, %v572_v2 }
 0x11c   : > { %v3876_v10 = vld.sshfl [vmem:[#allocation1] sm:$0xff pattern:$0x75316420] }
 0x11d   : > { %482 = vst [vmem:[#allocation1] ss:$2 sm:$0xff] %v478_v7  ;;  %v575_v7 = vmul.f32 %v573_v4, %v573_v4 }
 0x11e   : > { %484 = vst [vmem:[#allocation1 + $0x1] ss:$2 sm:$0xff] %v479_v8 }
 0x125   : > { %v3880_v18 = vld.sshfl [vmem:[#allocation1] sm:$0xff pattern:$0x75316420] }
 0x126   : > { %494 = vst [vmem:[#allocation1] ss:$2 sm:$0xff] %v490_v15  ;;  %v586_v15 = vmul.f32 %v584_v12, %v584_v12 }
 0x127   : > { %496 = vst [vmem:[#allocation1 + $0x1] ss:$2 sm:$0xff] %v491_v16  ;;  %v587_v16 = vmul.f32 %v585_v13, %v585_v13 }
 0x12e   : > { %v3884_v26 = vld.sshfl [vmem:[#allocation1] sm:$0xff pattern:$0x75316420] }
 0x12f   : > { %506 = vst [vmem:[#allocation1] ss:$2 sm:$0xff] %v502_v22  ;;  %v597_v22 = vld [vmem:[%s3767_s23 + $0x488] sm:$0xf] }
 0x130   : > { %508 = vst [vmem:[#allocation1 + $0x1] ss:$2 sm:$0xff] %v503_v25  ;;  %v598_v25 = vmul.f32 %v596_v21, %v596_v21  ;;  %v599_v27 = vmul.f32 %v597_v22, %v597_v22  ;;  %v669_v21 = vld [vmem:[%s3767_s23 + $0x4a0] sm:$0xf] }
 0x137   : > { %v3888_v33 = vld.sshfl [vmem:[#allocation1] sm:$0xff pattern:$0x75316420] }
 0x138   : > { %518 = vst [vmem:[#allocation1] ss:$2 sm:$0xff] %v514_v31  ;;  %v608_v31 = vld [vmem:[%s3767_s23 + $0x8c] sm:$0xf] }
 0x139   : > { %520 = vst [vmem:[#allocation1 + $0x1] ss:$2 sm:$0xff] %v515_v32  ;;  %v609_v32 = vld [vmem:[%s3767_s23 + $0x48c] sm:$0xf]  ;;  %v610_v35 = vmul.f32 %v608_v31, %v608_v31  ;;  %v680_v31 = vld [vmem:[%s3767_s23 + $0xa4] sm:$0xf] }
 0x13a   : > { %v611_v37 = vmul.f32 %v609_v32, %v609_v32  ;;  %v681_v32 = vld [vmem:[%s3767_s23 + $0x4a4] sm:$0xf] }
 0x140   : > { %v3892_v41 = vld.sshfl [vmem:[#allocation1] sm:$0xff pattern:$0x75316420] }
 0x141   : > { %530 = vst [vmem:[#allocation1] ss:$2 sm:$0xff] %v526_v38 }
 0x142   : > { %532 = vst [vmem:[#allocation1 + $0x1] ss:$2 sm:$0xff] %v527_v40  ;;  %v620_v40 = vld [vmem:[%s3767_s23 + $0x90] sm:$0xf] }
 0x143   : > { %v622_v45 = vmul.f32 %v620_v40, %v620_v40 }
 0x149   : > { %v3896_v50 = vld.sshfl [vmem:[#allocation1] sm:$0xff pattern:$0x75316420] }
 0x14a   : > { %542 = vst [vmem:[#allocation1] ss:$2 sm:$0xff] %v538_v46  ;;  %v623_v46 = vmul.f32 %v621_v43, %v621_v43  ;;  %v692_v43 = vld [vmem:[%s3767_s23 + $0xa8] sm:$0xf] }
 0x14b   : > { %544 = vst [vmem:[#allocation1 + $0x1] ss:$2 sm:$0xff] %v539_v47 }
 0x152   : > { %v3900_v57 = vld.sshfl [vmem:[#allocation1] sm:$0xff pattern:$0x75316420] }
 0x153   : > { %554 = vst [vmem:[#allocation1] ss:$2 sm:$0xff] %v550_v53  ;;  %v634_v53 = vmul.f32 %v632_v51, %v632_v51 }
 0x154   : > { %556 = vst [vmem:[#allocation1 + $0x1] ss:$2 sm:$0xff] %v551_v56  ;;  %v635_v56 = vmul.f32 %v633_v52, %v633_v52 }
 0x15b   : > { %v3904_v1 = vld.sshfl [vmem:[#allocation1] sm:$0xff pattern:$0x75316420] }
 0x15c   : > { %566 = vst [vmem:[#allocation1] ss:$2 sm:$0xff] %v562_v62  ;;  %v645_v62 = vld [vmem:[%s3767_s23 + $0x498] sm:$0xf] }
 0x15d   : > { %568 = vst [vmem:[#allocation1 + $0x1] ss:$2 sm:$0xff] %v563_v63  ;;  %v646_v63 = vmul.f32 %v644_v60, %v644_v60  ;;  %v647_v2 = vmul.f32 %v645_v62, %v645_v62 }
 0x164   : > { %v3908_v8 = vld.sshfl [vmem:[#allocation1] sm:$0xff pattern:$0x75316420] }
 0x165   : > { %578 = vst [vmem:[#allocation1] ss:$2 sm:$0xff] %v574_v6  ;;  %v656_v6 = vld [vmem:[%s3767_s23 + $0x9c] sm:$0xf] }
 0x166   : > { %580 = vst [vmem:[#allocation1 + $0x1] ss:$2 sm:$0xff] %v575_v7  ;;  %v657_v7 = vld [vmem:[%s3767_s23 + $0x49c] sm:$0xf]  ;;  %v658_v12 = vmul.f32 %v656_v6, %v656_v6  ;;  %v717_v6 = vld [vmem:[%s3767_s23 + $0x4b0] sm:$0xf] }
 0x167   : > { %v659_v13 = vmul.f32 %v657_v7, %v657_v7 }
 0x16d   : > { %v3912_v20 = vld.sshfl [vmem:[#allocation1] sm:$0xff pattern:$0x75316420] }
 0x16e   : > { %590 = vst [vmem:[#allocation1] ss:$2 sm:$0xff] %v586_v15 }
 0x16f   : > { %592 = vst [vmem:[#allocation1 + $0x1] ss:$2 sm:$0xff] %v587_v16  ;;  %v668_v16 = vld [vmem:[%s3767_s23 + $0xa0] sm:$0xf] }
 0x170   : > { %v670_v22 = vmul.f32 %v668_v16, %v668_v16  ;;  %v728_v16 = vld [vmem:[%s3767_s23 + $0xb4] sm:$0xf] }
 0x176   : > { %v3916_v28 = vld.sshfl [vmem:[#allocation1] sm:$0xff pattern:$0x75316420] }
 0x177   : > { %602 = vst [vmem:[#allocation1] ss:$2 sm:$0xff] %v598_v25  ;;  %v671_v25 = vmul.f32 %v669_v21, %v669_v21  ;;  %v729_v21 = vld [vmem:[%s3767_s23 + $0x4b4] sm:$0xf] }
 0x178   : > { %604 = vst [vmem:[#allocation1 + $0x1] ss:$2 sm:$0xff] %v599_v27 }
 0x17f   : > { %v3920_v38 = vld.sshfl [vmem:[#allocation1] sm:$0xff pattern:$0x75316420] }
 0x180   : > { %614 = vst [vmem:[#allocation1] ss:$2 sm:$0xff] %v610_v35  ;;  %v682_v35 = vmul.f32 %v680_v31, %v680_v31 }
 0x181   : > { %616 = vst [vmem:[#allocation1 + $0x1] ss:$2 sm:$0xff] %v611_v37  ;;  %v683_v37 = vmul.f32 %v681_v32, %v681_v32  ;;  %v740_v32 = vld [vmem:[%s3767_s23 + $0xb8] sm:$0xf] }
 0x188   : > { %v3924_v47 = vld.sshfl [vmem:[#allocation1] sm:$0xff pattern:$0x75316420] }
 0x189   : > { %626 = vst [vmem:[#allocation1] ss:$2 sm:$0xff] %v622_v45  ;;  %v693_v45 = vld [vmem:[%s3767_s23 + $0x4a8] sm:$0xf] }
 0x18a   : > { %628 = vst [vmem:[#allocation1 + $0x1] ss:$2 sm:$0xff] %v623_v46  ;;  %v694_v46 = vmul.f32 %v692_v43, %v692_v43  ;;  %v695_v51 = vmul.f32 %v693_v45, %v693_v45 }
 0x191   : > { %v3928_v58 = vld.sshfl [vmem:[#allocation1] sm:$0xff pattern:$0x75316420] }
 0x192   : > { %638 = vst [vmem:[#allocation1] ss:$2 sm:$0xff] %v634_v53  ;;  %v704_v53 = vld [vmem:[%s3767_s23 + $0xac] sm:$0xf] }
 0x193   : > { %640 = vst [vmem:[#allocation1 + $0x1] ss:$2 sm:$0xff] %v635_v56  ;;  %v705_v56 = vld [vmem:[%s3767_s23 + $0x4ac] sm:$0xf]  ;;  %v706_v60 = vmul.f32 %v704_v53, %v704_v53 }
 0x194   : > { %v707_v62 = vmul.f32 %v705_v56, %v705_v56 }
 0x19a   : > { %v3932_v4 = vld.sshfl [vmem:[#allocation1] sm:$0xff pattern:$0x75316420] }
 0x19b   : > { %650 = vst [vmem:[#allocation1] ss:$2 sm:$0xff] %v646_v63 }
 0x19c   : > { %652 = vst [vmem:[#allocation1 + $0x1] ss:$2 sm:$0xff] %v647_v2  ;;  %v716_v2 = vld [vmem:[%s3767_s23 + $0xb0] sm:$0xf] }
 0x19d   : > { %v718_v7 = vmul.f32 %v716_v2, %v716_v2  ;;  %v765_v2 = vld [vmem:[%s3767_s23 + $0x4c0] sm:$0xf] }
 0x1a3   : > { %v3936_v15 = vld.sshfl [vmem:[#allocation1] sm:$0xff pattern:$0x75316420] }
 0x1a4   : > { %662 = vst [vmem:[#allocation1] ss:$2 sm:$0xff] %v658_v12  ;;  %v719_v12 = vmul.f32 %v717_v6, %v717_v6 }
 0x1a5   : > { %664 = vst [vmem:[#allocation1 + $0x1] ss:$2 sm:$0xff] %v659_v13 }
 0x1ac   : > { %v3940_v27 = vld.sshfl [vmem:[#allocation1] sm:$0xff pattern:$0x75316420] }
 0x1ad   : > { %674 = vst [vmem:[#allocation1] ss:$2 sm:$0xff] %v670_v22  ;;  %v730_v22 = vmul.f32 %v728_v16, %v728_v16  ;;  %v776_v16 = vld [vmem:[%s3767_s23 + $0xc4] sm:$0xf] }
 0x1ae   : > { %676 = vst [vmem:[#allocation1 + $0x1] ss:$2 sm:$0xff] %v671_v25  ;;  %v731_v25 = vmul.f32 %v729_v21, %v729_v21  ;;  %v777_v21 = vld [vmem:[%s3767_s23 + $0x4c4] sm:$0xf] }
 0x1b5   : > { %v3944_v40 = vld.sshfl [vmem:[#allocation1] sm:$0xff pattern:$0x75316420] }
 0x1b6   : > { %686 = vst [vmem:[#allocation1] ss:$2 sm:$0xff] %v682_v35  ;;  %v741_v35 = vld [vmem:[%s3767_s23 + $0x4b8] sm:$0xf] }
 0x1b7   : > { %688 = vst [vmem:[#allocation1 + $0x1] ss:$2 sm:$0xff] %v683_v37  ;;  %v742_v37 = vmul.f32 %v740_v32, %v740_v32  ;;  %v743_v43 = vmul.f32 %v741_v35, %v741_v35  ;;  %v788_v35 = vld [vmem:[%s3767_s23 + $0xc8] sm:$0xf] }
 0x1be   : > { %v3948_v52 = vld.sshfl [vmem:[#allocation1] sm:$0xff pattern:$0x75316420] }
 0x1bf   : > { %698 = vst [vmem:[#allocation1] ss:$2 sm:$0xff] %v694_v46  ;;  %v752_v46 = vld [vmem:[%s3767_s23 + $0xbc] sm:$0xf] }
 0x1c0   : > { %700 = vst [vmem:[#allocation1 + $0x1] ss:$2 sm:$0xff] %v695_v51  ;;  %v753_v51 = vld [vmem:[%s3767_s23 + $0x4bc] sm:$0xf]  ;;  %v754_v53 = vmul.f32 %v752_v46, %v752_v46 }
 0x1c1   : > { %v755_v56 = vmul.f32 %v753_v51, %v753_v51 }
 0x1c7   : > { %v3952_v63 = vld.sshfl [vmem:[#allocation1] sm:$0xff pattern:$0x75316420] }
 0x1c8   : > { %710 = vst [vmem:[#allocation1] ss:$2 sm:$0xff] %v706_v60 }
 0x1c9   : > { %712 = vst [vmem:[#allocation1 + $0x1] ss:$2 sm:$0xff] %v707_v62  ;;  %v764_v62 = vld [vmem:[%s3767_s23 + $0xc0] sm:$0xf] }
 0x1ca   : > { %v766_v6 = vmul.f32 %v764_v62, %v764_v62 }
 0x1d0   : > { %v3956_v13 = vld.sshfl [vmem:[#allocation1] sm:$0xff pattern:$0x75316420] }
 0x1d1   : > { %722 = vst [vmem:[#allocation1] ss:$2 sm:$0xff] %v718_v7  ;;  %v767_v7 = vmul.f32 %v765_v2, %v765_v2 }
 0x1d2   : > { %724 = vst [vmem:[#allocation1 + $0x1] ss:$2 sm:$0xff] %v719_v12 }
 0x1d9   : > { %v3960_v31 = vld.sshfl [vmem:[#allocation1] sm:$0xff pattern:$0x75316420] }
 0x1da   : > { %734 = vst [vmem:[#allocation1] ss:$2 sm:$0xff] %v730_v22  ;;  %v778_v22 = vmul.f32 %v776_v16, %v776_v16  ;;  %v813_v16 = vld [vmem:[%s3767_s23 + $0x4d0] sm:$0xf] }
 0x1db   : > { %736 = vst [vmem:[#allocation1 + $0x1] ss:$2 sm:$0xff] %v731_v25  ;;  %v779_v25 = vmul.f32 %v777_v21, %v777_v21 }
 0x1e2   : > { %v3964_v45 = vld.sshfl [vmem:[#allocation1] sm:$0xff pattern:$0x75316420] }
 0x1e3   : > { %746 = vst [vmem:[#allocation1] ss:$2 sm:$0xff] %v742_v37  ;;  %v789_v37 = vld [vmem:[%s3767_s23 + $0x4c8] sm:$0xf] }
 0x1e4   : > { %748 = vst [vmem:[#allocation1 + $0x1] ss:$2 sm:$0xff] %v743_v43  ;;  %v790_v43 = vmul.f32 %v788_v35, %v788_v35  ;;  %v791_v46 = vmul.f32 %v789_v37, %v789_v37  ;;  %v824_v35 = vld [vmem:[%s3767_s23 + $0xd4] sm:$0xf] }
 0x1e5   : > { %v825_v37 = vld [vmem:[%s3767_s23 + $0x4d4] sm:$0xf] }
 0x1eb   : > { %v3968_v60 = vld.sshfl [vmem:[#allocation1] sm:$0xff pattern:$0x75316420] }
 0x1ec   : > { %758 = vst [vmem:[#allocation1] ss:$2 sm:$0xff] %v754_v53  ;;  %v800_v53 = vld [vmem:[%s3767_s23 + $0xcc] sm:$0xf] }
 0x1ed   : > { %760 = vst [vmem:[#allocation1 + $0x1] ss:$2 sm:$0xff] %v755_v56  ;;  %v801_v56 = vld [vmem:[%s3767_s23 + $0x4cc] sm:$0xf]  ;;  %v802_v62 = vmul.f32 %v800_v53, %v800_v53 }
 0x1ee   : > { %v803_v2 = vmul.f32 %v801_v56, %v801_v56  ;;  %v836_v56 = vld [vmem:[%s3767_s23 + $0xd8] sm:$0xf] }
 0x1f4   : > { %v3972_v12 = vld.sshfl [vmem:[#allocation1] sm:$0xff pattern:$0x75316420] }
 0x1f5   : > { %770 = vst [vmem:[#allocation1] ss:$2 sm:$0xff] %v766_v6 }
 0x1f6   : > { %772 = vst [vmem:[#allocation1 + $0x1] ss:$2 sm:$0xff] %v767_v7  ;;  %v812_v7 = vld [vmem:[%s3767_s23 + $0xd0] sm:$0xf] }
 0x1f7   : > { %v814_v21 = vmul.f32 %v812_v7, %v812_v7 }
 0x1fd   : > { %v3976_v32 = vld.sshfl [vmem:[#allocation1] sm:$0xff pattern:$0x75316420] }
 0x1fe   : > { %782 = vst [vmem:[#allocation1] ss:$2 sm:$0xff] %v778_v22  ;;  %v815_v22 = vmul.f32 %v813_v16, %v813_v16 }
 0x1ff   : > { %784 = vst [vmem:[#allocation1 + $0x1] ss:$2 sm:$0xff] %v779_v25 }
 0x206   : > { %v3980_v51 = vld.sshfl [vmem:[#allocation1] sm:$0xff pattern:$0x75316420] }
 0x207   : > { %794 = vst [vmem:[#allocation1] ss:$2 sm:$0xff] %v790_v43  ;;  %v826_v43 = vmul.f32 %v824_v35, %v824_v35 }
 0x208   : > { %796 = vst [vmem:[#allocation1 + $0x1] ss:$2 sm:$0xff] %v791_v46  ;;  %v827_v46 = vmul.f32 %v825_v37, %v825_v37 }
 0x20f   : > { %v3984_v6 = vld.sshfl [vmem:[#allocation1] sm:$0xff pattern:$0x75316420] }
 0x210   : > { %5105 = vst [vmem:[#allocation10_spill] sm:$0xff] %v3984_v6 }
 0x211   : > { %806 = vst [vmem:[#allocation1] ss:$2 sm:$0xff] %v802_v62  ;;  %v837_v62 = vld [vmem:[%s3767_s23 + $0x4d8] sm:$0xf] }
 0x212   : > { %808 = vst [vmem:[#allocation1 + $0x1] ss:$2 sm:$0xff] %v803_v2  ;;  %v838_v2 = vmul.f32 %v836_v56, %v836_v56  ;;  %v839_v7 = vmul.f32 %v837_v62, %v837_v62 }
 0x219   : > { %v3988_v25 = vld.sshfl [vmem:[#allocation1] sm:$0xff pattern:$0x75316420] }
 0x21a   : > { %5106 = vst [vmem:[#allocation11_spill] sm:$0xff] %v3988_v25 }
 0x21b   : > { %818 = vst [vmem:[#allocation1] ss:$2 sm:$0xff] %v814_v21  ;;  %v848_v21 = vld [vmem:[%s3767_s23 + $0xdc] sm:$0xf] }
 0x21c   : > { %820 = vst [vmem:[#allocation1 + $0x1] ss:$2 sm:$0xff] %v815_v22  ;;  %v849_v22 = vld [vmem:[%s3767_s23 + $0x4dc] sm:$0xf]  ;;  %v850_v35 = vmul.f32 %v848_v21, %v848_v21 }
 0x21d   : > { %v851_v37 = vmul.f32 %v849_v22, %v849_v22 }
 0x223   : > { %v3992_v53 = vld.sshfl [vmem:[#allocation1] sm:$0xff pattern:$0x75316420] }
 0x224   : > { %5107 = vst [vmem:[#allocation12_spill] sm:$0xff] %v3992_v53 }
 0x225   : > { %830 = vst [vmem:[#allocation1] ss:$2 sm:$0xff] %v826_v43  ;;  %v860_v43 = vld [vmem:[%s3767_s23 + $0xe0] sm:$0xf] }
 0x226   : > { %832 = vst [vmem:[#allocation1 + $0x1] ss:$2 sm:$0xff] %v827_v46  ;;  %v861_v46 = vld [vmem:[%s3767_s23 + $0x4e0] sm:$0xf]  ;;  %v862_v56 = vmul.f32 %v860_v43, %v860_v43 }
 0x227   : > { %v863_v62 = vmul.f32 %v861_v46, %v861_v46 }
 0x22d   : > { %v3996_v16 = vld.sshfl [vmem:[#allocation1] sm:$0xff pattern:$0x75316420] }
 0x22e   : > { %5108 = vst [vmem:[#allocation13_spill] sm:$0xff] %v3996_v16 }
 0x22f   : > { %842 = vst [vmem:[#allocation1] ss:$2 sm:$0xff] %v838_v2  ;;  %v872_v2 = vld [vmem:[%s3767_s23 + $0xe4] sm:$0xf] }
 0x230   : > { %844 = vst [vmem:[#allocation1 + $0x1] ss:$2 sm:$0xff] %v839_v7  ;;  %v873_v7 = vld [vmem:[%s3767_s23 + $0x4e4] sm:$0xf]  ;;  %v874_v21 = vmul.f32 %v872_v2, %v872_v2 }
 0x231   : > { %v875_v22 = vmul.f32 %v873_v7, %v873_v7 }
 0x237   : > { %v4000_v25 = vld.sshfl [vmem:[#allocation1] sm:$0xff pattern:$0x75316420] }
 0x238   : > { %5109 = vst [vmem:[#allocation14_spill] sm:$0xff] %v4000_v25 }
 0x239   : > { %854 = vst [vmem:[#allocation1] ss:$2 sm:$0xff] %v850_v35  ;;  %v884_v35 = vld [vmem:[%s3767_s23 + $0xe8] sm:$0xf] }
 0x23a   : > { %856 = vst [vmem:[#allocation1 + $0x1] ss:$2 sm:$0xff] %v851_v37  ;;  %v885_v37 = vld [vmem:[%s3767_s23 + $0x4e8] sm:$0xf]  ;;  %v886_v43 = vmul.f32 %v884_v35, %v884_v35 }
 0x23b   : > { %v887_v46 = vmul.f32 %v885_v37, %v885_v37 }
 0x241   : > { %v4004_v53 = vld.sshfl [vmem:[#allocation1] sm:$0xff pattern:$0x75316420] }
 0x242   : > { %5110 = vst [vmem:[#allocation15_spill] sm:$0xff] %v4004_v53 }
 0x243   : > { %866 = vst [vmem:[#allocation1] ss:$2 sm:$0xff] %v862_v56  ;;  %v896_v56 = vld [vmem:[%s3767_s23 + $0xec] sm:$0xf] }
 0x244   : > { %868 = vst [vmem:[#allocation1 + $0x1] ss:$2 sm:$0xff] %v863_v62  ;;  %v897_v62 = vld [vmem:[%s3767_s23 + $0x4ec] sm:$0xf]  ;;  %v898_v2 = vmul.f32 %v896_v56, %v896_v56 }
 0x245   : > { %v899_v7 = vmul.f32 %v897_v62, %v897_v62 }
 0x24b   : > { %v4008_v16 = vld.sshfl [vmem:[#allocation1] sm:$0xff pattern:$0x75316420] }
 0x24c   : > { %5111 = vst [vmem:[#allocation16_spill] sm:$0xff] %v4008_v16 }
 0x24d   : > { %878 = vst [vmem:[#allocation1] ss:$2 sm:$0xff] %v874_v21  ;;  %v908_v21 = vld [vmem:[%s3767_s23 + $0xf0] sm:$0xf] }
 0x24e   : > { %880 = vst [vmem:[#allocation1 + $0x1] ss:$2 sm:$0xff] %v875_v22  ;;  %v909_v22 = vld [vmem:[%s3767_s23 + $0x4f0] sm:$0xf]  ;;  %v910_v35 = vmul.f32 %v908_v21, %v908_v21 }
 0x24f   : > { %v911_v37 = vmul.f32 %v909_v22, %v909_v22 }
 0x255   : > { %v4012_v25 = vld.sshfl [vmem:[#allocation1] sm:$0xff pattern:$0x75316420] }
 0x256   : > { %5112 = vst [vmem:[#allocation17_spill] sm:$0xff] %v4012_v25 }
 0x257   : > { %890 = vst [vmem:[#allocation1] ss:$2 sm:$0xff] %v886_v43  ;;  %v920_v43 = vld [vmem:[%s3767_s23 + $0xf4] sm:$0xf] }
 0x258   : > { %892 = vst [vmem:[#allocation1 + $0x1] ss:$2 sm:$0xff] %v887_v46  ;;  %v921_v46 = vld [vmem:[%s3767_s23 + $0x4f4] sm:$0xf]  ;;  %v922_v56 = vmul.f32 %v920_v43, %v920_v43 }
 0x259   : > { %v923_v62 = vmul.f32 %v921_v46, %v921_v46 }
 0x25f   : > { %v4016_v53 = vld.sshfl [vmem:[#allocation1] sm:$0xff pattern:$0x75316420] }
 0x260   : > { %5113 = vst [vmem:[#allocation18_spill] sm:$0xff] %v4016_v53 }
 0x261   : > { %902 = vst [vmem:[#allocation1] ss:$2 sm:$0xff] %v898_v2  ;;  %v932_v2 = vld [vmem:[%s3767_s23 + $0xf8] sm:$0xf] }
 0x262   : > { %904 = vst [vmem:[#allocation1 + $0x1] ss:$2 sm:$0xff] %v899_v7  ;;  %v933_v7 = vld [vmem:[%s3767_s23 + $0x4f8] sm:$0xf]  ;;  %v934_v21 = vmul.f32 %v932_v2, %v932_v2 }
 0x263   : > { %v935_v22 = vmul.f32 %v933_v7, %v933_v7 }
 0x269   : > { %v4020_v16 = vld.sshfl [vmem:[#allocation1] sm:$0xff pattern:$0x75316420] }
 0x26a   : > { %5114 = vst [vmem:[#allocation19_spill] sm:$0xff] %v4020_v16 }
 0x26b   : > { %914 = vst [vmem:[#allocation1] ss:$2 sm:$0xff] %v910_v35  ;;  %v944_v35 = vld [vmem:[%s3767_s23 + $0xfc] sm:$0xf] }
 0x26c   : > { %916 = vst [vmem:[#allocation1 + $0x1] ss:$2 sm:$0xff] %v911_v37  ;;  %v945_v37 = vld [vmem:[%s3767_s23 + $0x4fc] sm:$0xf]  ;;  %v946_v43 = vmul.f32 %v944_v35, %v944_v35 }
 0x26d   : > { %v947_v46 = vmul.f32 %v945_v37, %v945_v37 }
 0x273   : > { %v4024_v25 = vld.sshfl [vmem:[#allocation1] sm:$0xff pattern:$0x75316420] }
 0x274   : > { %5115 = vst [vmem:[#allocation20_spill] sm:$0xff] %v4024_v25 }
 0x275   : > { %926 = vst [vmem:[#allocation1] ss:$2 sm:$0xff] %v922_v56  ;;  %v956_v56 = vld [vmem:[%s3767_s23 + $0x100] sm:$0xf] }
 0x276   : > { %928 = vst [vmem:[#allocation1 + $0x1] ss:$2 sm:$0xff] %v923_v62  ;;  %v957_v62 = vld [vmem:[%s3767_s23 + $0x500] sm:$0xf]  ;;  %v958_v2 = vmul.f32 %v956_v56, %v956_v56 }
 0x277   : > { %v959_v7 = vmul.f32 %v957_v62, %v957_v62 }
 0x27d   : > { %v4028_v53 = vld.sshfl [vmem:[#allocation1] sm:$0xff pattern:$0x75316420] }
 0x27e   : > { %5116 = vst [vmem:[#allocation21_spill] sm:$0xff] %v4028_v53 }
 0x27f   : > { %938 = vst [vmem:[#allocation1] ss:$2 sm:$0xff] %v934_v21  ;;  %v968_v21 = vld [vmem:[%s3767_s23 + $0x104] sm:$0xf] }
 0x280   : > { %940 = vst [vmem:[#allocation1 + $0x1] ss:$2 sm:$0xff] %v935_v22  ;;  %v969_v22 = vld [vmem:[%s3767_s23 + $0x504] sm:$0xf]  ;;  %v970_v35 = vmul.f32 %v968_v21, %v968_v21 }
 0x281   : > { %v971_v37 = vmul.f32 %v969_v22, %v969_v22 }
 0x287   : > { %v4032_v16 = vld.sshfl [vmem:[#allocation1] sm:$0xff pattern:$0x75316420] }
 0x288   : > { %5117 = vst [vmem:[#allocation22_spill] sm:$0xff] %v4032_v16 }
 0x289   : > { %950 = vst [vmem:[#allocation1] ss:$2 sm:$0xff] %v946_v43  ;;  %v980_v43 = vld [vmem:[%s3767_s23 + $0x108] sm:$0xf] }
 0x28a   : > { %952 = vst [vmem:[#allocation1 + $0x1] ss:$2 sm:$0xff] %v947_v46  ;;  %v981_v46 = vld [vmem:[%s3767_s23 + $0x508] sm:$0xf]  ;;  %v982_v56 = vmul.f32 %v980_v43, %v980_v43 }
 0x28b   : > { %v983_v62 = vmul.f32 %v981_v46, %v981_v46 }
 0x291   : > { %v4036_v25 = vld.sshfl [vmem:[#allocation1] sm:$0xff pattern:$0x75316420] }
 0x292   : > { %5118 = vst [vmem:[#allocation23_spill] sm:$0xff] %v4036_v25 }
 0x293   : > { %962 = vst [vmem:[#allocation1] ss:$2 sm:$0xff] %v958_v2  ;;  %v992_v2 = vld [vmem:[%s3767_s23 + $0x10c] sm:$0xf] }
 0x294   : > { %964 = vst [vmem:[#allocation1 + $0x1] ss:$2 sm:$0xff] %v959_v7  ;;  %v993_v7 = vld [vmem:[%s3767_s23 + $0x50c] sm:$0xf]  ;;  %v994_v21 = vmul.f32 %v992_v2, %v992_v2 }
 0x295   : > { %v995_v22 = vmul.f32 %v993_v7, %v993_v7 }
 0x29b   : > { %v4040_v53 = vld.sshfl [vmem:[#allocation1] sm:$0xff pattern:$0x75316420] }
 0x29c   : > { %5119 = vst [vmem:[#allocation24_spill] sm:$0xff] %v4040_v53 }
 0x29d   : > { %974 = vst [vmem:[#allocation1] ss:$2 sm:$0xff] %v970_v35  ;;  %v1004_v35 = vld [vmem:[%s3767_s23 + $0x110] sm:$0xf] }
 0x29e   : > { %976 = vst [vmem:[#allocation1 + $0x1] ss:$2 sm:$0xff] %v971_v37  ;;  %v1005_v37 = vld [vmem:[%s3767_s23 + $0x510] sm:$0xf]  ;;  %v1006_v43 = vmul.f32 %v1004_v35, %v1004_v35 }
 0x29f   : > { %v1007_v46 = vmul.f32 %v1005_v37, %v1005_v37 }
 0x2a5   : > { %v4044_v16 = vld.sshfl [vmem:[#allocation1] sm:$0xff pattern:$0x75316420] }
 0x2a6   : > { %5120 = vst [vmem:[#allocation25_spill] sm:$0xff] %v4044_v16 }
 0x2a7   : > { %986 = vst [vmem:[#allocation1] ss:$2 sm:$0xff] %v982_v56  ;;  %v1016_v56 = vld [vmem:[%s3767_s23 + $0x114] sm:$0xf] }
 0x2a8   : > { %988 = vst [vmem:[#allocation1 + $0x1] ss:$2 sm:$0xff] %v983_v62  ;;  %v1017_v62 = vld [vmem:[%s3767_s23 + $0x514] sm:$0xf]  ;;  %v1018_v2 = vmul.f32 %v1016_v56, %v1016_v56 }
 0x2a9   : > { %v1019_v7 = vmul.f32 %v1017_v62, %v1017_v62 }
 0x2af   : > { %v4048_v25 = vld.sshfl [vmem:[#allocation1] sm:$0xff pattern:$0x75316420] }
 0x2b0   : > { %5121 = vst [vmem:[#allocation26_spill] sm:$0xff] %v4048_v25 }
 0x2b1   : > { %998 = vst [vmem:[#allocation1] ss:$2 sm:$0xff] %v994_v21  ;;  %v1028_v21 = vld [vmem:[%s3767_s23 + $0x118] sm:$0xf] }
 0x2b2   : > { %1000 = vst [vmem:[#allocation1 + $0x1] ss:$2 sm:$0xff] %v995_v22  ;;  %v1029_v22 = vld [vmem:[%s3767_s23 + $0x518] sm:$0xf]  ;;  %v1030_v35 = vmul.f32 %v1028_v21, %v1028_v21 }
 0x2b3   : > { %v1031_v37 = vmul.f32 %v1029_v22, %v1029_v22 }
 0x2b9   : > { %v4052_v53 = vld.sshfl [vmem:[#allocation1] sm:$0xff pattern:$0x75316420] }
 0x2ba   : > { %5122 = vst [vmem:[#allocation27_spill] sm:$0xff] %v4052_v53 }
 0x2bb   : > { %1010 = vst [vmem:[#allocation1] ss:$2 sm:$0xff] %v1006_v43  ;;  %v1040_v43 = vld [vmem:[%s3767_s23 + $0x11c] sm:$0xf] }
 0x2bc   : > { %1012 = vst [vmem:[#allocation1 + $0x1] ss:$2 sm:$0xff] %v1007_v46  ;;  %v1041_v46 = vld [vmem:[%s3767_s23 + $0x51c] sm:$0xf]  ;;  %v1042_v56 = vmul.f32 %v1040_v43, %v1040_v43 }
 0x2bd   : > { %v1043_v62 = vmul.f32 %v1041_v46, %v1041_v46 }
 0x2c3   : > { %v4056_v16 = vld.sshfl [vmem:[#allocation1] sm:$0xff pattern:$0x75316420] }
 0x2c4   : > { %5123 = vst [vmem:[#allocation28_spill] sm:$0xff] %v4056_v16 }
 0x2c5   : > { %1022 = vst [vmem:[#allocation1] ss:$2 sm:$0xff] %v1018_v2  ;;  %v1052_v2 = vld [vmem:[%s3767_s23 + $0x120] sm:$0xf] }
 0x2c6   : > { %1024 = vst [vmem:[#allocation1 + $0x1] ss:$2 sm:$0xff] %v1019_v7  ;;  %v1053_v7 = vld [vmem:[%s3767_s23 + $0x520] sm:$0xf]  ;;  %v1054_v21 = vmul.f32 %v1052_v2, %v1052_v2 }
 0x2c7   : > { %v1055_v22 = vmul.f32 %v1053_v7, %v1053_v7 }
 0x2cd   : > { %v4060_v25 = vld.sshfl [vmem:[#allocation1] sm:$0xff pattern:$0x75316420] }
 0x2ce   : > { %5124 = vst [vmem:[#allocation29_spill] sm:$0xff] %v4060_v25 }
 0x2cf   : > { %1034 = vst [vmem:[#allocation1] ss:$2 sm:$0xff] %v1030_v35  ;;  %v1064_v35 = vld [vmem:[%s3767_s23 + $0x124] sm:$0xf] }
 0x2d0   : > { %1036 = vst [vmem:[#allocation1 + $0x1] ss:$2 sm:$0xff] %v1031_v37  ;;  %v1065_v37 = vld [vmem:[%s3767_s23 + $0x524] sm:$0xf]  ;;  %v1066_v43 = vmul.f32 %v1064_v35, %v1064_v35 }
 0x2d1   : > { %v1067_v46 = vmul.f32 %v1065_v37, %v1065_v37 }
 0x2d7   : > { %v4064_v53 = vld.sshfl [vmem:[#allocation1] sm:$0xff pattern:$0x75316420] }
 0x2d8   : > { %5125 = vst [vmem:[#allocation30_spill] sm:$0xff] %v4064_v53 }
 0x2d9   : > { %1046 = vst [vmem:[#allocation1] ss:$2 sm:$0xff] %v1042_v56  ;;  %v1076_v56 = vld [vmem:[%s3767_s23 + $0x128] sm:$0xf] }
 0x2da   : > { %1048 = vst [vmem:[#allocation1 + $0x1] ss:$2 sm:$0xff] %v1043_v62  ;;  %v1077_v62 = vld [vmem:[%s3767_s23 + $0x528] sm:$0xf]  ;;  %v1078_v2 = vmul.f32 %v1076_v56, %v1076_v56 }
 0x2db   : > { %v1079_v7 = vmul.f32 %v1077_v62, %v1077_v62 }
 0x2e1   : > { %v4068_v16 = vld.sshfl [vmem:[#allocation1] sm:$0xff pattern:$0x75316420] }
 0x2e2   : > { %5126 = vst [vmem:[#allocation31_spill] sm:$0xff] %v4068_v16 }
 0x2e3   : > { %1058 = vst [vmem:[#allocation1] ss:$2 sm:$0xff] %v1054_v21  ;;  %v1088_v21 = vld [vmem:[%s3767_s23 + $0x12c] sm:$0xf] }
 0x2e4   : > { %1060 = vst [vmem:[#allocation1 + $0x1] ss:$2 sm:$0xff] %v1055_v22  ;;  %v1089_v22 = vld [vmem:[%s3767_s23 + $0x52c] sm:$0xf]  ;;  %v1090_v35 = vmul.f32 %v1088_v21, %v1088_v21 }
 0x2e5   : > { %v1091_v37 = vmul.f32 %v1089_v22, %v1089_v22 }
 0x2eb   : > { %v4072_v25 = vld.sshfl [vmem:[#allocation1] sm:$0xff pattern:$0x75316420] }
 0x2ec   : > { %5127 = vst [vmem:[#allocation32_spill] sm:$0xff] %v4072_v25 }
 0x2ed   : > { %1070 = vst [vmem:[#allocation1] ss:$2 sm:$0xff] %v1066_v43  ;;  %v1100_v43 = vld [vmem:[%s3767_s23 + $0x130] sm:$0xf] }
 0x2ee   : > { %1072 = vst [vmem:[#allocation1 + $0x1] ss:$2 sm:$0xff] %v1067_v46  ;;  %v1101_v46 = vld [vmem:[%s3767_s23 + $0x530] sm:$0xf]  ;;  %v1102_v56 = vmul.f32 %v1100_v43, %v1100_v43 }
 0x2ef   : > { %v1103_v62 = vmul.f32 %v1101_v46, %v1101_v46 }
 0x2f5   : > { %v4076_v53 = vld.sshfl [vmem:[#allocation1] sm:$0xff pattern:$0x75316420] }
 0x2f6   : > { %5128 = vst [vmem:[#allocation33_spill] sm:$0xff] %v4076_v53 }
 0x2f7   : > { %1082 = vst [vmem:[#allocation1] ss:$2 sm:$0xff] %v1078_v2  ;;  %v1112_v2 = vld [vmem:[%s3767_s23 + $0x134] sm:$0xf] }
 0x2f8   : > { %1084 = vst [vmem:[#allocation1 + $0x1] ss:$2 sm:$0xff] %v1079_v7  ;;  %v1113_v7 = vld [vmem:[%s3767_s23 + $0x534] sm:$0xf]  ;;  %v1114_v21 = vmul.f32 %v1112_v2, %v1112_v2 }
 0x2f9   : > { %v1115_v22 = vmul.f32 %v1113_v7, %v1113_v7 }
 0x2ff   : > { %v4080_v16 = vld.sshfl [vmem:[#allocation1] sm:$0xff pattern:$0x75316420] }
 0x300   : > { %5129 = vst [vmem:[#allocation34_spill] sm:$0xff] %v4080_v16 }
 0x301   : > { %1094 = vst [vmem:[#allocation1] ss:$2 sm:$0xff] %v1090_v35  ;;  %v1124_v35 = vld [vmem:[%s3767_s23 + $0x138] sm:$0xf] }
 0x302   : > { %1096 = vst [vmem:[#allocation1 + $0x1] ss:$2 sm:$0xff] %v1091_v37  ;;  %v1125_v37 = vld [vmem:[%s3767_s23 + $0x538] sm:$0xf]  ;;  %v1126_v43 = vmul.f32 %v1124_v35, %v1124_v35 }
 0x303   : > { %v1127_v46 = vmul.f32 %v1125_v37, %v1125_v37 }
 0x309   : > { %v4084_v25 = vld.sshfl [vmem:[#allocation1] sm:$0xff pattern:$0x75316420] }
 0x30a   : > { %5130 = vst [vmem:[#allocation35_spill] sm:$0xff] %v4084_v25 }
 0x30b   : > { %1106 = vst [vmem:[#allocation1] ss:$2 sm:$0xff] %v1102_v56  ;;  %v1136_v56 = vld [vmem:[%s3767_s23 + $0x13c] sm:$0xf] }
 0x30c   : > { %1108 = vst [vmem:[#allocation1 + $0x1] ss:$2 sm:$0xff] %v1103_v62  ;;  %v1137_v62 = vld [vmem:[%s3767_s23 + $0x53c] sm:$0xf]  ;;  %v1138_v2 = vmul.f32 %v1136_v56, %v1136_v56 }
 0x30d   : > { %v1139_v7 = vmul.f32 %v1137_v62, %v1137_v62 }
 0x313   : > { %v4088_v53 = vld.sshfl [vmem:[#allocation1] sm:$0xff pattern:$0x75316420] }
 0x314   : > { %5131 = vst [vmem:[#allocation36_spill] sm:$0xff] %v4088_v53 }
 0x315   : > { %1118 = vst [vmem:[#allocation1] ss:$2 sm:$0xff] %v1114_v21  ;;  %v1148_v21 = vld [vmem:[%s3767_s23 + $0x140] sm:$0xf] }
 0x316   : > { %1120 = vst [vmem:[#allocation1 + $0x1] ss:$2 sm:$0xff] %v1115_v22  ;;  %v1149_v22 = vld [vmem:[%s3767_s23 + $0x540] sm:$0xf]  ;;  %v1150_v35 = vmul.f32 %v1148_v21, %v1148_v21 }
 0x317   : > { %v1151_v37 = vmul.f32 %v1149_v22, %v1149_v22 }
 0x31d   : > { %v4092_v16 = vld.sshfl [vmem:[#allocation1] sm:$0xff pattern:$0x75316420] }
 0x31e   : > { %5132 = vst [vmem:[#allocation37_spill] sm:$0xff] %v4092_v16 }
 0x31f   : > { %1130 = vst [vmem:[#allocation1] ss:$2 sm:$0xff] %v1126_v43  ;;  %v1160_v43 = vld [vmem:[%s3767_s23 + $0x144] sm:$0xf] }
 0x320   : > { %1132 = vst [vmem:[#allocation1 + $0x1] ss:$2 sm:$0xff] %v1127_v46  ;;  %v1161_v46 = vld [vmem:[%s3767_s23 + $0x544] sm:$0xf]  ;;  %v1162_v56 = vmul.f32 %v1160_v43, %v1160_v43 }
 0x321   : > { %v1163_v62 = vmul.f32 %v1161_v46, %v1161_v46 }
 0x327   : > { %v4096_v25 = vld.sshfl [vmem:[#allocation1] sm:$0xff pattern:$0x75316420] }
 0x328   : > { %5133 = vst [vmem:[#allocation38_spill] sm:$0xff] %v4096_v25 }
 0x329   : > { %1142 = vst [vmem:[#allocation1] ss:$2 sm:$0xff] %v1138_v2  ;;  %v1172_v2 = vld [vmem:[%s3767_s23 + $0x148] sm:$0xf] }
 0x32a   : > { %1144 = vst [vmem:[#allocation1 + $0x1] ss:$2 sm:$0xff] %v1139_v7  ;;  %v1173_v7 = vld [vmem:[%s3767_s23 + $0x548] sm:$0xf]  ;;  %v1174_v21 = vmul.f32 %v1172_v2, %v1172_v2 }
 0x32b   : > { %v1175_v22 = vmul.f32 %v1173_v7, %v1173_v7 }
 0x331   : > { %v4100_v53 = vld.sshfl [vmem:[#allocation1] sm:$0xff pattern:$0x75316420] }
 0x332   : > { %5134 = vst [vmem:[#allocation39_spill] sm:$0xff] %v4100_v53 }
 0x333   : > { %1154 = vst [vmem:[#allocation1] ss:$2 sm:$0xff] %v1150_v35  ;;  %v1184_v35 = vld [vmem:[%s3767_s23 + $0x14c] sm:$0xf] }
 0x334   : > { %1156 = vst [vmem:[#allocation1 + $0x1] ss:$2 sm:$0xff] %v1151_v37  ;;  %v1185_v37 = vld [vmem:[%s3767_s23 + $0x54c] sm:$0xf]  ;;  %v1186_v43 = vmul.f32 %v1184_v35, %v1184_v35 }
 0x335   : > { %v1187_v46 = vmul.f32 %v1185_v37, %v1185_v37 }
 0x33b   : > { %v4104_v16 = vld.sshfl [vmem:[#allocation1] sm:$0xff pattern:$0x75316420] }
 0x33c   : > { %5135 = vst [vmem:[#allocation40_spill] sm:$0xff] %v4104_v16 }
 0x33d   : > { %1166 = vst [vmem:[#allocation1] ss:$2 sm:$0xff] %v1162_v56  ;;  %v1196_v56 = vld [vmem:[%s3767_s23 + $0x150] sm:$0xf] }
 0x33e   : > { %1168 = vst [vmem:[#allocation1 + $0x1] ss:$2 sm:$0xff] %v1163_v62  ;;  %v1197_v62 = vld [vmem:[%s3767_s23 + $0x550] sm:$0xf]  ;;  %v1198_v2 = vmul.f32 %v1196_v56, %v1196_v56 }
 0x33f   : > { %v1199_v7 = vmul.f32 %v1197_v62, %v1197_v62 }
 0x345   : > { %v4108_v25 = vld.sshfl [vmem:[#allocation1] sm:$0xff pattern:$0x75316420] }
 0x346   : > { %5136 = vst [vmem:[#allocation41_spill] sm:$0xff] %v4108_v25 }
 0x347   : > { %1178 = vst [vmem:[#allocation1] ss:$2 sm:$0xff] %v1174_v21  ;;  %v1208_v21 = vld [vmem:[%s3767_s23 + $0x154] sm:$0xf] }
 0x348   : > { %1180 = vst [vmem:[#allocation1 + $0x1] ss:$2 sm:$0xff] %v1175_v22  ;;  %v1209_v22 = vld [vmem:[%s3767_s23 + $0x554] sm:$0xf]  ;;  %v1210_v35 = vmul.f32 %v1208_v21, %v1208_v21 }
 0x349   : > { %v1211_v37 = vmul.f32 %v1209_v22, %v1209_v22 }
 0x34f   : > { %v4112_v53 = vld.sshfl [vmem:[#allocation1] sm:$0xff pattern:$0x75316420] }
 0x350   : > { %5137 = vst [vmem:[#allocation42_spill] sm:$0xff] %v4112_v53 }
 0x351   : > { %1190 = vst [vmem:[#allocation1] ss:$2 sm:$0xff] %v1186_v43  ;;  %v1220_v43 = vld [vmem:[%s3767_s23 + $0x158] sm:$0xf] }
 0x352   : > { %1192 = vst [vmem:[#allocation1 + $0x1] ss:$2 sm:$0xff] %v1187_v46  ;;  %v1221_v46 = vld [vmem:[%s3767_s23 + $0x558] sm:$0xf]  ;;  %v1222_v56 = vmul.f32 %v1220_v43, %v1220_v43 }
 0x353   : > { %v1223_v62 = vmul.f32 %v1221_v46, %v1221_v46 }
 0x359   : > { %v4116_v16 = vld.sshfl [vmem:[#allocation1] sm:$0xff pattern:$0x75316420] }
 0x35a   : > { %5138 = vst [vmem:[#allocation43_spill] sm:$0xff] %v4116_v16 }
 0x35b   : > { %1202 = vst [vmem:[#allocation1] ss:$2 sm:$0xff] %v1198_v2  ;;  %v1232_v2 = vld [vmem:[%s3767_s23 + $0x15c] sm:$0xf] }
 0x35c   : > { %1204 = vst [vmem:[#allocation1 + $0x1] ss:$2 sm:$0xff] %v1199_v7  ;;  %v1233_v7 = vld [vmem:[%s3767_s23 + $0x55c] sm:$0xf]  ;;  %v1234_v21 = vmul.f32 %v1232_v2, %v1232_v2 }
 0x35d   : > { %v1235_v22 = vmul.f32 %v1233_v7, %v1233_v7 }
 0x363   : > { %v4120_v25 = vld.sshfl [vmem:[#allocation1] sm:$0xff pattern:$0x75316420] }
 0x364   : > { %5139 = vst [vmem:[#allocation44_spill] sm:$0xff] %v4120_v25 }
 0x365   : > { %1214 = vst [vmem:[#allocation1] ss:$2 sm:$0xff] %v1210_v35  ;;  %v1244_v35 = vld [vmem:[%s3767_s23 + $0x160] sm:$0xf] }
 0x366   : > { %1216 = vst [vmem:[#allocation1 + $0x1] ss:$2 sm:$0xff] %v1211_v37  ;;  %v1245_v37 = vld [vmem:[%s3767_s23 + $0x560] sm:$0xf]  ;;  %v1246_v43 = vmul.f32 %v1244_v35, %v1244_v35 }
 0x367   : > { %v1247_v46 = vmul.f32 %v1245_v37, %v1245_v37 }
 0x36d   : > { %v4124_v53 = vld.sshfl [vmem:[#allocation1] sm:$0xff pattern:$0x75316420] }
 0x36e   : > { %5140 = vst [vmem:[#allocation45_spill] sm:$0xff] %v4124_v53 }
 0x36f   : > { %1226 = vst [vmem:[#allocation1] ss:$2 sm:$0xff] %v1222_v56  ;;  %v1256_v56 = vld [vmem:[%s3767_s23 + $0x164] sm:$0xf] }
 0x370   : > { %1228 = vst [vmem:[#allocation1 + $0x1] ss:$2 sm:$0xff] %v1223_v62  ;;  %v1257_v62 = vld [vmem:[%s3767_s23 + $0x564] sm:$0xf]  ;;  %v1258_v2 = vmul.f32 %v1256_v56, %v1256_v56 }
 0x371   : > { %v1259_v7 = vmul.f32 %v1257_v62, %v1257_v62 }
 0x377   : > { %v4128_v16 = vld.sshfl [vmem:[#allocation1] sm:$0xff pattern:$0x75316420] }
 0x378   : > { %5141 = vst [vmem:[#allocation46_spill] sm:$0xff] %v4128_v16 }
 0x379   : > { %1238 = vst [vmem:[#allocation1] ss:$2 sm:$0xff] %v1234_v21  ;;  %v1268_v21 = vld [vmem:[%s3767_s23 + $0x168] sm:$0xf] }
 0x37a   : > { %1240 = vst [vmem:[#allocation1 + $0x1] ss:$2 sm:$0xff] %v1235_v22  ;;  %v1269_v22 = vld [vmem:[%s3767_s23 + $0x568] sm:$0xf]  ;;  %v1270_v35 = vmul.f32 %v1268_v21, %v1268_v21 }
 0x37b   : > { %v1271_v37 = vmul.f32 %v1269_v22, %v1269_v22 }
 0x381   : > { %v4132_v25 = vld.sshfl [vmem:[#allocation1] sm:$0xff pattern:$0x75316420] }
 0x382   : > { %5142 = vst [vmem:[#allocation47_spill] sm:$0xff] %v4132_v25 }
 0x383   : > { %1250 = vst [vmem:[#allocation1] ss:$2 sm:$0xff] %v1246_v43  ;;  %v1280_v43 = vld [vmem:[%s3767_s23 + $0x16c] sm:$0xf] }
 0x384   : > { %1252 = vst [vmem:[#allocation1 + $0x1] ss:$2 sm:$0xff] %v1247_v46  ;;  %v1281_v46 = vld [vmem:[%s3767_s23 + $0x56c] sm:$0xf]  ;;  %v1282_v56 = vmul.f32 %v1280_v43, %v1280_v43 }
 0x385   : > { %v1283_v62 = vmul.f32 %v1281_v46, %v1281_v46 }
 0x38b   : > { %v4136_v53 = vld.sshfl [vmem:[#allocation1] sm:$0xff pattern:$0x75316420] }
 0x38c   : > { %5143 = vst [vmem:[#allocation48_spill] sm:$0xff] %v4136_v53 }
 0x38d   : > { %1262 = vst [vmem:[#allocation1] ss:$2 sm:$0xff] %v1258_v2  ;;  %v1292_v2 = vld [vmem:[%s3767_s23 + $0x170] sm:$0xf] }
 0x38e   : > { %1264 = vst [vmem:[#allocation1 + $0x1] ss:$2 sm:$0xff] %v1259_v7  ;;  %v1293_v7 = vld [vmem:[%s3767_s23 + $0x570] sm:$0xf]  ;;  %v1294_v21 = vmul.f32 %v1292_v2, %v1292_v2 }
 0x38f   : > { %v1295_v22 = vmul.f32 %v1293_v7, %v1293_v7 }
 0x395   : > { %v4140_v16 = vld.sshfl [vmem:[#allocation1] sm:$0xff pattern:$0x75316420] }
 0x396   : > { %5144 = vst [vmem:[#allocation49_spill] sm:$0xff] %v4140_v16 }
 0x397   : > { %1274 = vst [vmem:[#allocation1] ss:$2 sm:$0xff] %v1270_v35  ;;  %v1304_v35 = vld [vmem:[%s3767_s23 + $0x174] sm:$0xf] }
 0x398   : > { %1276 = vst [vmem:[#allocation1 + $0x1] ss:$2 sm:$0xff] %v1271_v37  ;;  %v1305_v37 = vld [vmem:[%s3767_s23 + $0x574] sm:$0xf]  ;;  %v1306_v43 = vmul.f32 %v1304_v35, %v1304_v35 }
 0x399   : > { %v1307_v46 = vmul.f32 %v1305_v37, %v1305_v37 }
 0x39f   : > { %v4144_v25 = vld.sshfl [vmem:[#allocation1] sm:$0xff pattern:$0x75316420] }
 0x3a0   : > { %5145 = vst [vmem:[#allocation50_spill] sm:$0xff] %v4144_v25 }
 0x3a1   : > { %1286 = vst [vmem:[#allocation1] ss:$2 sm:$0xff] %v1282_v56  ;;  %v1316_v56 = vld [vmem:[%s3767_s23 + $0x178] sm:$0xf] }
 0x3a2   : > { %1288 = vst [vmem:[#allocation1 + $0x1] ss:$2 sm:$0xff] %v1283_v62  ;;  %v1317_v62 = vld [vmem:[%s3767_s23 + $0x578] sm:$0xf]  ;;  %v1318_v2 = vmul.f32 %v1316_v56, %v1316_v56 }
 0x3a3   : > { %v1319_v7 = vmul.f32 %v1317_v62, %v1317_v62 }
 0x3a9   : > { %v4148_v53 = vld.sshfl [vmem:[#allocation1] sm:$0xff pattern:$0x75316420] }
 0x3aa   : > { %5146 = vst [vmem:[#allocation51_spill] sm:$0xff] %v4148_v53 }
 0x3ab   : > { %1298 = vst [vmem:[#allocation1] ss:$2 sm:$0xff] %v1294_v21  ;;  %v1328_v21 = vld [vmem:[%s3767_s23 + $0x17c] sm:$0xf] }
 0x3ac   : > { %1300 = vst [vmem:[#allocation1 + $0x1] ss:$2 sm:$0xff] %v1295_v22  ;;  %v1329_v22 = vld [vmem:[%s3767_s23 + $0x57c] sm:$0xf]  ;;  %v1330_v35 = vmul.f32 %v1328_v21, %v1328_v21 }
 0x3ad   : > { %v1331_v37 = vmul.f32 %v1329_v22, %v1329_v22 }
 0x3b3   : > { %v4152_v16 = vld.sshfl [vmem:[#allocation1] sm:$0xff pattern:$0x75316420] }
 0x3b4   : > { %5147 = vst [vmem:[#allocation52_spill] sm:$0xff] %v4152_v16 }
 0x3b5   : > { %1310 = vst [vmem:[#allocation1] ss:$2 sm:$0xff] %v1306_v43  ;;  %v1340_v43 = vld [vmem:[%s3767_s23 + $0x180] sm:$0xf] }
 0x3b6   : > { %1312 = vst [vmem:[#allocation1 + $0x1] ss:$2 sm:$0xff] %v1307_v46  ;;  %v1341_v46 = vld [vmem:[%s3767_s23 + $0x580] sm:$0xf]  ;;  %v1342_v56 = vmul.f32 %v1340_v43, %v1340_v43 }
 0x3b7   : > { %v1343_v62 = vmul.f32 %v1341_v46, %v1341_v46 }
 0x3bd   : > { %v4156_v25 = vld.sshfl [vmem:[#allocation1] sm:$0xff pattern:$0x75316420] }
 0x3be   : > { %5148 = vst [vmem:[#allocation53_spill] sm:$0xff] %v4156_v25 }
 0x3bf   : > { %1322 = vst [vmem:[#allocation1] ss:$2 sm:$0xff] %v1318_v2  ;;  %v1352_v2 = vld [vmem:[%s3767_s23 + $0x184] sm:$0xf] }
 0x3c0   : > { %1324 = vst [vmem:[#allocation1 + $0x1] ss:$2 sm:$0xff] %v1319_v7  ;;  %v1353_v7 = vld [vmem:[%s3767_s23 + $0x584] sm:$0xf]  ;;  %v1354_v21 = vmul.f32 %v1352_v2, %v1352_v2 }
 0x3c1   : > { %v1355_v22 = vmul.f32 %v1353_v7, %v1353_v7 }
 0x3c7   : > { %v4160_v53 = vld.sshfl [vmem:[#allocation1] sm:$0xff pattern:$0x75316420] }
 0x3c8   : > { %5149 = vst [vmem:[#allocation54_spill] sm:$0xff] %v4160_v53 }
 0x3c9   : > { %1334 = vst [vmem:[#allocation1] ss:$2 sm:$0xff] %v1330_v35  ;;  %v1364_v35 = vld [vmem:[%s3767_s23 + $0x188] sm:$0xf] }
 0x3ca   : > { %1336 = vst [vmem:[#allocation1 + $0x1] ss:$2 sm:$0xff] %v1331_v37  ;;  %v1365_v37 = vld [vmem:[%s3767_s23 + $0x588] sm:$0xf]  ;;  %v1366_v43 = vmul.f32 %v1364_v35, %v1364_v35 }
 0x3cb   : > { %v1367_v46 = vmul.f32 %v1365_v37, %v1365_v37 }
 0x3d1   : > { %v4164_v16 = vld.sshfl [vmem:[#allocation1] sm:$0xff pattern:$0x75316420] }
 0x3d2   : > { %5150 = vst [vmem:[#allocation55_spill] sm:$0xff] %v4164_v16 }
 0x3d3   : > { %1346 = vst [vmem:[#allocation1] ss:$2 sm:$0xff] %v1342_v56  ;;  %v1376_v56 = vld [vmem:[%s3767_s23 + $0x18c] sm:$0xf] }
 0x3d4   : > { %1348 = vst [vmem:[#allocation1 + $0x1] ss:$2 sm:$0xff] %v1343_v62  ;;  %v1377_v62 = vld [vmem:[%s3767_s23 + $0x58c] sm:$0xf]  ;;  %v1378_v2 = vmul.f32 %v1376_v56, %v1376_v56 }
 0x3d5   : > { %v1379_v7 = vmul.f32 %v1377_v62, %v1377_v62 }
 0x3db   : > { %v4168_v25 = vld.sshfl [vmem:[#allocation1] sm:$0xff pattern:$0x75316420] }
 0x3dc   : > { %5151 = vst [vmem:[#allocation56_spill] sm:$0xff] %v4168_v25 }
 0x3dd   : > { %1358 = vst [vmem:[#allocation1] ss:$2 sm:$0xff] %v1354_v21  ;;  %v1388_v21 = vld [vmem:[%s3767_s23 + $0x190] sm:$0xf] }
 0x3de   : > { %1360 = vst [vmem:[#allocation1 + $0x1] ss:$2 sm:$0xff] %v1355_v22  ;;  %v1389_v22 = vld [vmem:[%s3767_s23 + $0x590] sm:$0xf]  ;;  %v1390_v35 = vmul.f32 %v1388_v21, %v1388_v21 }
 0x3df   : > { %v1391_v37 = vmul.f32 %v1389_v22, %v1389_v22 }
 0x3e5   : > { %v4172_v53 = vld.sshfl [vmem:[#allocation1] sm:$0xff pattern:$0x75316420] }
 0x3e6   : > { %5152 = vst [vmem:[#allocation57_spill] sm:$0xff] %v4172_v53 }
 0x3e7   : > { %1370 = vst [vmem:[#allocation1] ss:$2 sm:$0xff] %v1366_v43  ;;  %v1400_v43 = vld [vmem:[%s3767_s23 + $0x194] sm:$0xf] }
 0x3e8   : > { %1372 = vst [vmem:[#allocation1 + $0x1] ss:$2 sm:$0xff] %v1367_v46  ;;  %v1401_v46 = vld [vmem:[%s3767_s23 + $0x594] sm:$0xf]  ;;  %v1402_v56 = vmul.f32 %v1400_v43, %v1400_v43 }
 0x3e9   : > { %v1403_v62 = vmul.f32 %v1401_v46, %v1401_v46 }
 0x3ef   : > { %v4176_v16 = vld.sshfl [vmem:[#allocation1] sm:$0xff pattern:$0x75316420] }
 0x3f0   : > { %5153 = vst [vmem:[#allocation58_spill] sm:$0xff] %v4176_v16 }
 0x3f1   : > { %1382 = vst [vmem:[#allocation1] ss:$2 sm:$0xff] %v1378_v2  ;;  %v1412_v2 = vld [vmem:[%s3767_s23 + $0x198] sm:$0xf] }
 0x3f2   : > { %1384 = vst [vmem:[#allocation1 + $0x1] ss:$2 sm:$0xff] %v1379_v7  ;;  %v1413_v7 = vld [vmem:[%s3767_s23 + $0x598] sm:$0xf]  ;;  %v1414_v21 = vmul.f32 %v1412_v2, %v1412_v2 }
 0x3f3   : > { %v1415_v22 = vmul.f32 %v1413_v7, %v1413_v7 }
 0x3f9   : > { %v4180_v25 = vld.sshfl [vmem:[#allocation1] sm:$0xff pattern:$0x75316420] }
 0x3fa   : > { %5154 = vst [vmem:[#allocation59_spill] sm:$0xff] %v4180_v25 }
 0x3fb   : > { %1394 = vst [vmem:[#allocation1] ss:$2 sm:$0xff] %v1390_v35  ;;  %v1424_v35 = vld [vmem:[%s3767_s23 + $0x19c] sm:$0xf] }
 0x3fc   : > { %1396 = vst [vmem:[#allocation1 + $0x1] ss:$2 sm:$0xff] %v1391_v37  ;;  %v1425_v37 = vld [vmem:[%s3767_s23 + $0x59c] sm:$0xf]  ;;  %v1426_v43 = vmul.f32 %v1424_v35, %v1424_v35 }
 0x3fd   : > { %v1427_v46 = vmul.f32 %v1425_v37, %v1425_v37 }
 0x403   : > { %v4184_v53 = vld.sshfl [vmem:[#allocation1] sm:$0xff pattern:$0x75316420] }
 0x404   : > { %5155 = vst [vmem:[#allocation60_spill] sm:$0xff] %v4184_v53 }
 0x405   : > { %1406 = vst [vmem:[#allocation1] ss:$2 sm:$0xff] %v1402_v56  ;;  %v1436_v56 = vld [vmem:[%s3767_s23 + $0x1a0] sm:$0xf] }
 0x406   : > { %1408 = vst [vmem:[#allocation1 + $0x1] ss:$2 sm:$0xff] %v1403_v62  ;;  %v1437_v62 = vld [vmem:[%s3767_s23 + $0x5a0] sm:$0xf]  ;;  %v1438_v2 = vmul.f32 %v1436_v56, %v1436_v56 }
 0x407   : > { %v1439_v7 = vmul.f32 %v1437_v62, %v1437_v62 }
 0x40d   : > { %v4188_v16 = vld.sshfl [vmem:[#allocation1] sm:$0xff pattern:$0x75316420] }
 0x40e   : > { %5156 = vst [vmem:[#allocation61_spill] sm:$0xff] %v4188_v16 }
 0x40f   : > { %1418 = vst [vmem:[#allocation1] ss:$2 sm:$0xff] %v1414_v21  ;;  %v1448_v21 = vld [vmem:[%s3767_s23 + $0x1a4] sm:$0xf] }
 0x410   : > { %1420 = vst [vmem:[#allocation1 + $0x1] ss:$2 sm:$0xff] %v1415_v22  ;;  %v1449_v22 = vld [vmem:[%s3767_s23 + $0x5a4] sm:$0xf]  ;;  %v1450_v35 = vmul.f32 %v1448_v21, %v1448_v21 }
 0x411   : > { %v1451_v37 = vmul.f32 %v1449_v22, %v1449_v22 }
 0x417   : > { %v4192_v25 = vld.sshfl [vmem:[#allocation1] sm:$0xff pattern:$0x75316420] }
 0x418   : > { %5157 = vst [vmem:[#allocation62_spill] sm:$0xff] %v4192_v25 }
 0x419   : > { %1430 = vst [vmem:[#allocation1] ss:$2 sm:$0xff] %v1426_v43  ;;  %v1460_v43 = vld [vmem:[%s3767_s23 + $0x1a8] sm:$0xf] }
 0x41a   : > { %1432 = vst [vmem:[#allocation1 + $0x1] ss:$2 sm:$0xff] %v1427_v46  ;;  %v1461_v46 = vld [vmem:[%s3767_s23 + $0x5a8] sm:$0xf]  ;;  %v1462_v56 = vmul.f32 %v1460_v43, %v1460_v43 }
 0x41b   : > { %v1463_v62 = vmul.f32 %v1461_v46, %v1461_v46 }
 0x421   : > { %v4196_v53 = vld.sshfl [vmem:[#allocation1] sm:$0xff pattern:$0x75316420] }
 0x422   : > { %5158 = vst [vmem:[#allocation63_spill] sm:$0xff] %v4196_v53 }
 0x423   : > { %1442 = vst [vmem:[#allocation1] ss:$2 sm:$0xff] %v1438_v2  ;;  %v1472_v2 = vld [vmem:[%s3767_s23 + $0x1ac] sm:$0xf] }
 0x424   : > { %1444 = vst [vmem:[#allocation1 + $0x1] ss:$2 sm:$0xff] %v1439_v7  ;;  %v1473_v7 = vld [vmem:[%s3767_s23 + $0x5ac] sm:$0xf]  ;;  %v1474_v21 = vmul.f32 %v1472_v2, %v1472_v2 }
 0x425   : > { %v1475_v22 = vmul.f32 %v1473_v7, %v1473_v7 }
 0x42b   : > { %v4200_v16 = vld.sshfl [vmem:[#allocation1] sm:$0xff pattern:$0x75316420] }
 0x42c   : > { %5159 = vst [vmem:[#allocation64_spill] sm:$0xff] %v4200_v16 }
 0x42d   : > { %1454 = vst [vmem:[#allocation1] ss:$2 sm:$0xff] %v1450_v35  ;;  %v1484_v35 = vld [vmem:[%s3767_s23 + $0x1b0] sm:$0xf] }
 0x42e   : > { %1456 = vst [vmem:[#allocation1 + $0x1] ss:$2 sm:$0xff] %v1451_v37  ;;  %v1485_v37 = vld [vmem:[%s3767_s23 + $0x5b0] sm:$0xf]  ;;  %v1486_v43 = vmul.f32 %v1484_v35, %v1484_v35 }
 0x42f   : > { %v1487_v46 = vmul.f32 %v1485_v37, %v1485_v37 }
 0x435   : > { %v4204_v25 = vld.sshfl [vmem:[#allocation1] sm:$0xff pattern:$0x75316420] }
 0x436   : > { %5160 = vst [vmem:[#allocation65_spill] sm:$0xff] %v4204_v25 }
 0x437   : > { %1466 = vst [vmem:[#allocation1] ss:$2 sm:$0xff] %v1462_v56  ;;  %v1496_v56 = vld [vmem:[%s3767_s23 + $0x1b4] sm:$0xf] }
 0x438   : > { %1468 = vst [vmem:[#allocation1 + $0x1] ss:$2 sm:$0xff] %v1463_v62  ;;  %v1497_v62 = vld [vmem:[%s3767_s23 + $0x5b4] sm:$0xf]  ;;  %v1498_v2 = vmul.f32 %v1496_v56, %v1496_v56 }
 0x439   : > { %v1499_v7 = vmul.f32 %v1497_v62, %v1497_v62 }
 0x43f   : > { %v4208_v53 = vld.sshfl [vmem:[#allocation1] sm:$0xff pattern:$0x75316420] }
 0x440   : > { %5161 = vst [vmem:[#allocation66_spill] sm:$0xff] %v4208_v53 }
 0x441   : > { %1478 = vst [vmem:[#allocation1] ss:$2 sm:$0xff] %v1474_v21  ;;  %v1508_v21 = vld [vmem:[%s3767_s23 + $0x1b8] sm:$0xf] }
 0x442   : > { %1480 = vst [vmem:[#allocation1 + $0x1] ss:$2 sm:$0xff] %v1475_v22  ;;  %v1509_v22 = vld [vmem:[%s3767_s23 + $0x5b8] sm:$0xf]  ;;  %v1510_v35 = vmul.f32 %v1508_v21, %v1508_v21 }
 0x443   : > { %v1511_v37 = vmul.f32 %v1509_v22, %v1509_v22 }
 0x449   : > { %v4212_v16 = vld.sshfl [vmem:[#allocation1] sm:$0xff pattern:$0x75316420] }
 0x44a   : > { %5162 = vst [vmem:[#allocation67_spill] sm:$0xff] %v4212_v16 }
 0x44b   : > { %1490 = vst [vmem:[#allocation1] ss:$2 sm:$0xff] %v1486_v43  ;;  %v1520_v43 = vld [vmem:[%s3767_s23 + $0x1bc] sm:$0xf] }
 0x44c   : > { %1492 = vst [vmem:[#allocation1 + $0x1] ss:$2 sm:$0xff] %v1487_v46  ;;  %v1521_v46 = vld [vmem:[%s3767_s23 + $0x5bc] sm:$0xf]  ;;  %v1522_v56 = vmul.f32 %v1520_v43, %v1520_v43 }
 0x44d   : > { %v1523_v62 = vmul.f32 %v1521_v46, %v1521_v46 }
 0x453   : > { %v4216_v25 = vld.sshfl [vmem:[#allocation1] sm:$0xff pattern:$0x75316420] }
 0x454   : > { %5163 = vst [vmem:[#allocation68_spill] sm:$0xff] %v4216_v25 }
 0x455   : > { %1502 = vst [vmem:[#allocation1] ss:$2 sm:$0xff] %v1498_v2  ;;  %v1532_v2 = vld [vmem:[%s3767_s23 + $0x1c0] sm:$0xf] }
 0x456   : > { %1504 = vst [vmem:[#allocation1 + $0x1] ss:$2 sm:$0xff] %v1499_v7  ;;  %v1533_v7 = vld [vmem:[%s3767_s23 + $0x5c0] sm:$0xf]  ;;  %v1534_v21 = vmul.f32 %v1532_v2, %v1532_v2 }
 0x457   : > { %v1535_v22 = vmul.f32 %v1533_v7, %v1533_v7 }
 0x45d   : > { %v4220_v53 = vld.sshfl [vmem:[#allocation1] sm:$0xff pattern:$0x75316420] }
 0x45e   : > { %5164 = vst [vmem:[#allocation69_spill] sm:$0xff] %v4220_v53 }
 0x45f   : > { %1514 = vst [vmem:[#allocation1] ss:$2 sm:$0xff] %v1510_v35  ;;  %v1544_v35 = vld [vmem:[%s3767_s23 + $0x1c4] sm:$0xf] }
 0x460   : > { %1516 = vst [vmem:[#allocation1 + $0x1] ss:$2 sm:$0xff] %v1511_v37  ;;  %v1545_v37 = vld [vmem:[%s3767_s23 + $0x5c4] sm:$0xf]  ;;  %v1546_v43 = vmul.f32 %v1544_v35, %v1544_v35 }
 0x461   : > { %v1547_v46 = vmul.f32 %v1545_v37, %v1545_v37 }
 0x467   : > { %v4224_v16 = vld.sshfl [vmem:[#allocation1] sm:$0xff pattern:$0x75316420] }
 0x468   : > { %5165 = vst [vmem:[#allocation70_spill] sm:$0xff] %v4224_v16 }
 0x469   : > { %1526 = vst [vmem:[#allocation1] ss:$2 sm:$0xff] %v1522_v56  ;;  %v1556_v56 = vld [vmem:[%s3767_s23 + $0x1c8] sm:$0xf] }
 0x46a   : > { %1528 = vst [vmem:[#allocation1 + $0x1] ss:$2 sm:$0xff] %v1523_v62  ;;  %v1557_v62 = vld [vmem:[%s3767_s23 + $0x5c8] sm:$0xf]  ;;  %v1558_v2 = vmul.f32 %v1556_v56, %v1556_v56 }
 0x46b   : > { %v1559_v7 = vmul.f32 %v1557_v62, %v1557_v62 }
 0x471   : > { %v4228_v25 = vld.sshfl [vmem:[#allocation1] sm:$0xff pattern:$0x75316420] }
 0x472   : > { %5166 = vst [vmem:[#allocation71_spill] sm:$0xff] %v4228_v25 }
 0x473   : > { %1538 = vst [vmem:[#allocation1] ss:$2 sm:$0xff] %v1534_v21  ;;  %v1568_v21 = vld [vmem:[%s3767_s23 + $0x1cc] sm:$0xf] }
 0x474   : > { %1540 = vst [vmem:[#allocation1 + $0x1] ss:$2 sm:$0xff] %v1535_v22  ;;  %v1569_v22 = vld [vmem:[%s3767_s23 + $0x5cc] sm:$0xf]  ;;  %v1570_v35 = vmul.f32 %v1568_v21, %v1568_v21 }
 0x475   : > { %v1571_v37 = vmul.f32 %v1569_v22, %v1569_v22 }
 0x47b   : > { %v4232_v53 = vld.sshfl [vmem:[#allocation1] sm:$0xff pattern:$0x75316420] }
 0x47c   : > { %5167 = vst [vmem:[#allocation72_spill] sm:$0xff] %v4232_v53 }
 0x47d   : > { %1550 = vst [vmem:[#allocation1] ss:$2 sm:$0xff] %v1546_v43  ;;  %v1580_v43 = vld [vmem:[%s3767_s23 + $0x1d0] sm:$0xf] }
 0x47e   : > { %1552 = vst [vmem:[#allocation1 + $0x1] ss:$2 sm:$0xff] %v1547_v46  ;;  %v1581_v46 = vld [vmem:[%s3767_s23 + $0x5d0] sm:$0xf]  ;;  %v1582_v56 = vmul.f32 %v1580_v43, %v1580_v43 }
 0x47f   : > { %v1583_v62 = vmul.f32 %v1581_v46, %v1581_v46 }
 0x485   : > { %v4236_v16 = vld.sshfl [vmem:[#allocation1] sm:$0xff pattern:$0x75316420] }
 0x486   : > { %5168 = vst [vmem:[#allocation73_spill] sm:$0xff] %v4236_v16 }
 0x487   : > { %1562 = vst [vmem:[#allocation1] ss:$2 sm:$0xff] %v1558_v2  ;;  %v1592_v2 = vld [vmem:[%s3767_s23 + $0x1d4] sm:$0xf] }
 0x488   : > { %1564 = vst [vmem:[#allocation1 + $0x1] ss:$2 sm:$0xff] %v1559_v7  ;;  %v1593_v7 = vld [vmem:[%s3767_s23 + $0x5d4] sm:$0xf]  ;;  %v1594_v21 = vmul.f32 %v1592_v2, %v1592_v2 }
 0x489   : > { %v1595_v22 = vmul.f32 %v1593_v7, %v1593_v7 }
 0x48f   : > { %v4240_v25 = vld.sshfl [vmem:[#allocation1] sm:$0xff pattern:$0x75316420] }
 0x490   : > { %5169 = vst [vmem:[#allocation74_spill] sm:$0xff] %v4240_v25 }
 0x491   : > { %1574 = vst [vmem:[#allocation1] ss:$2 sm:$0xff] %v1570_v35  ;;  %v1604_v35 = vld [vmem:[%s3767_s23 + $0x1d8] sm:$0xf] }
 0x492   : > { %1576 = vst [vmem:[#allocation1 + $0x1] ss:$2 sm:$0xff] %v1571_v37  ;;  %v1605_v37 = vld [vmem:[%s3767_s23 + $0x5d8] sm:$0xf]  ;;  %v1606_v43 = vmul.f32 %v1604_v35, %v1604_v35 }
 0x493   : > { %v1607_v46 = vmul.f32 %v1605_v37, %v1605_v37 }
 0x499   : > { %v4244_v53 = vld.sshfl [vmem:[#allocation1] sm:$0xff pattern:$0x75316420] }
 0x49a   : > { %5170 = vst [vmem:[#allocation75_spill] sm:$0xff] %v4244_v53 }
 0x49b   : > { %1586 = vst [vmem:[#allocation1] ss:$2 sm:$0xff] %v1582_v56  ;;  %v1616_v56 = vld [vmem:[%s3767_s23 + $0x1dc] sm:$0xf] }
 0x49c   : > { %1588 = vst [vmem:[#allocation1 + $0x1] ss:$2 sm:$0xff] %v1583_v62  ;;  %v1617_v62 = vld [vmem:[%s3767_s23 + $0x5dc] sm:$0xf]  ;;  %v1618_v2 = vmul.f32 %v1616_v56, %v1616_v56 }
 0x49d   : > { %v1619_v7 = vmul.f32 %v1617_v62, %v1617_v62 }
 0x4a3   : > { %v4248_v16 = vld.sshfl [vmem:[#allocation1] sm:$0xff pattern:$0x75316420] }
 0x4a4   : > { %5171 = vst [vmem:[#allocation76_spill] sm:$0xff] %v4248_v16 }
 0x4a5   : > { %1598 = vst [vmem:[#allocation1] ss:$2 sm:$0xff] %v1594_v21  ;;  %v1628_v21 = vld [vmem:[%s3767_s23 + $0x1e0] sm:$0xf] }
 0x4a6   : > { %1600 = vst [vmem:[#allocation1 + $0x1] ss:$2 sm:$0xff] %v1595_v22  ;;  %v1629_v22 = vld [vmem:[%s3767_s23 + $0x5e0] sm:$0xf]  ;;  %v1630_v35 = vmul.f32 %v1628_v21, %v1628_v21 }
 0x4a7   : > { %v1631_v37 = vmul.f32 %v1629_v22, %v1629_v22 }
 0x4ad   : > { %v4252_v25 = vld.sshfl [vmem:[#allocation1] sm:$0xff pattern:$0x75316420] }
 0x4ae   : > { %5172 = vst [vmem:[#allocation77_spill] sm:$0xff] %v4252_v25 }
 0x4af   : > { %1610 = vst [vmem:[#allocation1] ss:$2 sm:$0xff] %v1606_v43  ;;  %v1640_v43 = vld [vmem:[%s3767_s23 + $0x1e4] sm:$0xf] }
 0x4b0   : > { %1612 = vst [vmem:[#allocation1 + $0x1] ss:$2 sm:$0xff] %v1607_v46  ;;  %v1641_v46 = vld [vmem:[%s3767_s23 + $0x5e4] sm:$0xf]  ;;  %v1642_v56 = vmul.f32 %v1640_v43, %v1640_v43 }
 0x4b1   : > { %v1643_v62 = vmul.f32 %v1641_v46, %v1641_v46 }
 0x4b7   : > { %v4256_v53 = vld.sshfl [vmem:[#allocation1] sm:$0xff pattern:$0x75316420] }
 0x4b8   : > { %5173 = vst [vmem:[#allocation78_spill] sm:$0xff] %v4256_v53 }
 0x4b9   : > { %1622 = vst [vmem:[#allocation1] ss:$2 sm:$0xff] %v1618_v2  ;;  %v1652_v2 = vld [vmem:[%s3767_s23 + $0x1e8] sm:$0xf] }
 0x4ba   : > { %1624 = vst [vmem:[#allocation1 + $0x1] ss:$2 sm:$0xff] %v1619_v7  ;;  %v1653_v7 = vld [vmem:[%s3767_s23 + $0x5e8] sm:$0xf]  ;;  %v1654_v21 = vmul.f32 %v1652_v2, %v1652_v2 }
 0x4bb   : > { %v1655_v22 = vmul.f32 %v1653_v7, %v1653_v7 }
 0x4c1   : > { %v4260_v16 = vld.sshfl [vmem:[#allocation1] sm:$0xff pattern:$0x75316420] }
 0x4c2   : > { %5174 = vst [vmem:[#allocation79_spill] sm:$0xff] %v4260_v16 }
 0x4c3   : > { %1634 = vst [vmem:[#allocation1] ss:$2 sm:$0xff] %v1630_v35  ;;  %v1664_v35 = vld [vmem:[%s3767_s23 + $0x1ec] sm:$0xf] }
 0x4c4   : > { %1636 = vst [vmem:[#allocation1 + $0x1] ss:$2 sm:$0xff] %v1631_v37  ;;  %v1665_v37 = vld [vmem:[%s3767_s23 + $0x5ec] sm:$0xf]  ;;  %v1666_v43 = vmul.f32 %v1664_v35, %v1664_v35 }
 0x4c5   : > { %v1667_v46 = vmul.f32 %v1665_v37, %v1665_v37 }
 0x4cb   : > { %v4264_v25 = vld.sshfl [vmem:[#allocation1] sm:$0xff pattern:$0x75316420] }
 0x4cc   : > { %5175 = vst [vmem:[#allocation80_spill] sm:$0xff] %v4264_v25 }
 0x4cd   : > { %1646 = vst [vmem:[#allocation1] ss:$2 sm:$0xff] %v1642_v56  ;;  %v1676_v56 = vld [vmem:[%s3767_s23 + $0x1f0] sm:$0xf] }
 0x4ce   : > { %1648 = vst [vmem:[#allocation1 + $0x1] ss:$2 sm:$0xff] %v1643_v62  ;;  %v1677_v62 = vld [vmem:[%s3767_s23 + $0x5f0] sm:$0xf]  ;;  %v1678_v2 = vmul.f32 %v1676_v56, %v1676_v56 }
 0x4cf   : > { %v1679_v7 = vmul.f32 %v1677_v62, %v1677_v62 }
 0x4d5   : > { %v4268_v53 = vld.sshfl [vmem:[#allocation1] sm:$0xff pattern:$0x75316420] }
 0x4d6   : > { %5176 = vst [vmem:[#allocation81_spill] sm:$0xff] %v4268_v53 }
 0x4d7   : > { %1658 = vst [vmem:[#allocation1] ss:$2 sm:$0xff] %v1654_v21  ;;  %v1688_v21 = vld [vmem:[%s3767_s23 + $0x1f4] sm:$0xf] }
 0x4d8   : > { %1660 = vst [vmem:[#allocation1 + $0x1] ss:$2 sm:$0xff] %v1655_v22  ;;  %v1689_v22 = vld [vmem:[%s3767_s23 + $0x5f4] sm:$0xf]  ;;  %v1690_v35 = vmul.f32 %v1688_v21, %v1688_v21 }
 0x4d9   : > { %v1691_v37 = vmul.f32 %v1689_v22, %v1689_v22 }
 0x4df   : > { %v4272_v16 = vld.sshfl [vmem:[#allocation1] sm:$0xff pattern:$0x75316420] }
 0x4e0   : > { %5177 = vst [vmem:[#allocation82_spill] sm:$0xff] %v4272_v16 }
 0x4e1   : > { %1670 = vst [vmem:[#allocation1] ss:$2 sm:$0xff] %v1666_v43  ;;  %v1700_v43 = vld [vmem:[%s3767_s23 + $0x1f8] sm:$0xf] }
 0x4e2   : > { %1672 = vst [vmem:[#allocation1 + $0x1] ss:$2 sm:$0xff] %v1667_v46  ;;  %v1701_v46 = vld [vmem:[%s3767_s23 + $0x5f8] sm:$0xf]  ;;  %v1702_v56 = vmul.f32 %v1700_v43, %v1700_v43 }
 0x4e3   : > { %v1703_v62 = vmul.f32 %v1701_v46, %v1701_v46 }
 0x4e9   : > { %v4276_v25 = vld.sshfl [vmem:[#allocation1] sm:$0xff pattern:$0x75316420] }
 0x4ea   : > { %5178 = vst [vmem:[#allocation83_spill] sm:$0xff] %v4276_v25 }
 0x4eb   : > { %1682 = vst [vmem:[#allocation1] ss:$2 sm:$0xff] %v1678_v2  ;;  %v1712_v2 = vld [vmem:[%s3767_s23 + $0x1fc] sm:$0xf] }
 0x4ec   : > { %1684 = vst [vmem:[#allocation1 + $0x1] ss:$2 sm:$0xff] %v1679_v7  ;;  %v1713_v7 = vld [vmem:[%s3767_s23 + $0x5fc] sm:$0xf]  ;;  %v1714_v21 = vmul.f32 %v1712_v2, %v1712_v2 }
 0x4ed   : > { %v1715_v22 = vmul.f32 %v1713_v7, %v1713_v7 }
 0x4f3   : > { %v4280_v53 = vld.sshfl [vmem:[#allocation1] sm:$0xff pattern:$0x75316420] }
 0x4f4   : > { %5179 = vst [vmem:[#allocation84_spill] sm:$0xff] %v4280_v53 }
 0x4f5   : > { %1694 = vst [vmem:[#allocation1] ss:$2 sm:$0xff] %v1690_v35  ;;  %v1724_v35 = vld [vmem:[%s3767_s23 + $0x200] sm:$0xf] }
 0x4f6   : > { %1696 = vst [vmem:[#allocation1 + $0x1] ss:$2 sm:$0xff] %v1691_v37  ;;  %v1725_v37 = vld [vmem:[%s3767_s23 + $0x600] sm:$0xf]  ;;  %v1726_v43 = vmul.f32 %v1724_v35, %v1724_v35 }
 0x4f7   : > { %v1727_v46 = vmul.f32 %v1725_v37, %v1725_v37 }
 0x4fd   : > { %v4284_v16 = vld.sshfl [vmem:[#allocation1] sm:$0xff pattern:$0x75316420] }
 0x4fe   : > { %5180 = vst [vmem:[#allocation85_spill] sm:$0xff] %v4284_v16 }
 0x4ff   : > { %1706 = vst [vmem:[#allocation1] ss:$2 sm:$0xff] %v1702_v56  ;;  %v1736_v56 = vld [vmem:[%s3767_s23 + $0x204] sm:$0xf] }
 0x500   : > { %1708 = vst [vmem:[#allocation1 + $0x1] ss:$2 sm:$0xff] %v1703_v62  ;;  %v1737_v62 = vld [vmem:[%s3767_s23 + $0x604] sm:$0xf]  ;;  %v1738_v2 = vmul.f32 %v1736_v56, %v1736_v56 }
 0x501   : > { %v1739_v7 = vmul.f32 %v1737_v62, %v1737_v62 }
 0x507   : > { %v4288_v25 = vld.sshfl [vmem:[#allocation1] sm:$0xff pattern:$0x75316420] }
 0x508   : > { %5181 = vst [vmem:[#allocation86_spill] sm:$0xff] %v4288_v25 }
 0x509   : > { %1718 = vst [vmem:[#allocation1] ss:$2 sm:$0xff] %v1714_v21  ;;  %v1748_v21 = vld [vmem:[%s3767_s23 + $0x208] sm:$0xf] }
 0x50a   : > { %1720 = vst [vmem:[#allocation1 + $0x1] ss:$2 sm:$0xff] %v1715_v22  ;;  %v1749_v22 = vld [vmem:[%s3767_s23 + $0x608] sm:$0xf]  ;;  %v1750_v35 = vmul.f32 %v1748_v21, %v1748_v21 }
 0x50b   : > { %v1751_v37 = vmul.f32 %v1749_v22, %v1749_v22 }
 0x511   : > { %v4292_v53 = vld.sshfl [vmem:[#allocation1] sm:$0xff pattern:$0x75316420] }
 0x512   : > { %5182 = vst [vmem:[#allocation87_spill] sm:$0xff] %v4292_v53 }
 0x513   : > { %1730 = vst [vmem:[#allocation1] ss:$2 sm:$0xff] %v1726_v43  ;;  %v1760_v43 = vld [vmem:[%s3767_s23 + $0x20c] sm:$0xf] }
 0x514   : > { %1732 = vst [vmem:[#allocation1 + $0x1] ss:$2 sm:$0xff] %v1727_v46  ;;  %v1761_v46 = vld [vmem:[%s3767_s23 + $0x60c] sm:$0xf]  ;;  %v1762_v56 = vmul.f32 %v1760_v43, %v1760_v43 }
 0x515   : > { %v1763_v62 = vmul.f32 %v1761_v46, %v1761_v46 }
 0x51b   : > { %v4296_v16 = vld.sshfl [vmem:[#allocation1] sm:$0xff pattern:$0x75316420] }
 0x51c   : > { %5183 = vst [vmem:[#allocation88_spill] sm:$0xff] %v4296_v16 }
 0x51d   : > { %1742 = vst [vmem:[#allocation1] ss:$2 sm:$0xff] %v1738_v2  ;;  %v1772_v2 = vld [vmem:[%s3767_s23 + $0x210] sm:$0xf] }
 0x51e   : > { %1744 = vst [vmem:[#allocation1 + $0x1] ss:$2 sm:$0xff] %v1739_v7  ;;  %v1773_v7 = vld [vmem:[%s3767_s23 + $0x610] sm:$0xf]  ;;  %v1774_v21 = vmul.f32 %v1772_v2, %v1772_v2 }
 0x51f   : > { %v1775_v22 = vmul.f32 %v1773_v7, %v1773_v7 }
 0x525   : > { %v4300_v25 = vld.sshfl [vmem:[#allocation1] sm:$0xff pattern:$0x75316420] }
 0x526   : > { %5184 = vst [vmem:[#allocation89_spill] sm:$0xff] %v4300_v25 }
 0x527   : > { %1754 = vst [vmem:[#allocation1] ss:$2 sm:$0xff] %v1750_v35  ;;  %v1784_v35 = vld [vmem:[%s3767_s23 + $0x214] sm:$0xf] }
 0x528   : > { %1756 = vst [vmem:[#allocation1 + $0x1] ss:$2 sm:$0xff] %v1751_v37  ;;  %v1785_v37 = vld [vmem:[%s3767_s23 + $0x614] sm:$0xf]  ;;  %v1786_v43 = vmul.f32 %v1784_v35, %v1784_v35 }
 0x529   : > { %v1787_v46 = vmul.f32 %v1785_v37, %v1785_v37 }
 0x52f   : > { %v4304_v53 = vld.sshfl [vmem:[#allocation1] sm:$0xff pattern:$0x75316420] }
 0x530   : > { %5185 = vst [vmem:[#allocation90_spill] sm:$0xff] %v4304_v53 }
 0x531   : > { %1766 = vst [vmem:[#allocation1] ss:$2 sm:$0xff] %v1762_v56  ;;  %v1796_v56 = vld [vmem:[%s3767_s23 + $0x218] sm:$0xf] }
 0x532   : > { %1768 = vst [vmem:[#allocation1 + $0x1] ss:$2 sm:$0xff] %v1763_v62  ;;  %v1797_v62 = vld [vmem:[%s3767_s23 + $0x618] sm:$0xf]  ;;  %v1798_v2 = vmul.f32 %v1796_v56, %v1796_v56 }
 0x533   : > { %v1799_v7 = vmul.f32 %v1797_v62, %v1797_v62 }
 0x539   : > { %v4308_v16 = vld.sshfl [vmem:[#allocation1] sm:$0xff pattern:$0x75316420] }
 0x53a   : > { %5186 = vst [vmem:[#allocation91_spill] sm:$0xff] %v4308_v16 }
 0x53b   : > { %1778 = vst [vmem:[#allocation1] ss:$2 sm:$0xff] %v1774_v21  ;;  %v1808_v21 = vld [vmem:[%s3767_s23 + $0x21c] sm:$0xf] }
 0x53c   : > { %1780 = vst [vmem:[#allocation1 + $0x1] ss:$2 sm:$0xff] %v1775_v22  ;;  %v1809_v22 = vld [vmem:[%s3767_s23 + $0x61c] sm:$0xf]  ;;  %v1810_v35 = vmul.f32 %v1808_v21, %v1808_v21 }
 0x53d   : > { %v1811_v37 = vmul.f32 %v1809_v22, %v1809_v22 }
 0x543   : > { %v4312_v25 = vld.sshfl [vmem:[#allocation1] sm:$0xff pattern:$0x75316420] }
 0x544   : > { %5187 = vst [vmem:[#allocation92_spill] sm:$0xff] %v4312_v25 }
 0x545   : > { %1790 = vst [vmem:[#allocation1] ss:$2 sm:$0xff] %v1786_v43  ;;  %v1820_v43 = vld [vmem:[%s3767_s23 + $0x220] sm:$0xf] }
 0x546   : > { %1792 = vst [vmem:[#allocation1 + $0x1] ss:$2 sm:$0xff] %v1787_v46  ;;  %v1821_v46 = vld [vmem:[%s3767_s23 + $0x620] sm:$0xf]  ;;  %v1822_v56 = vmul.f32 %v1820_v43, %v1820_v43 }
 0x547   : > { %v1823_v62 = vmul.f32 %v1821_v46, %v1821_v46 }
 0x54d   : > { %v4316_v53 = vld.sshfl [vmem:[#allocation1] sm:$0xff pattern:$0x75316420] }
 0x54e   : > { %5188 = vst [vmem:[#allocation93_spill] sm:$0xff] %v4316_v53 }
 0x54f   : > { %1802 = vst [vmem:[#allocation1] ss:$2 sm:$0xff] %v1798_v2  ;;  %v1832_v2 = vld [vmem:[%s3767_s23 + $0x224] sm:$0xf] }
 0x550   : > { %1804 = vst [vmem:[#allocation1 + $0x1] ss:$2 sm:$0xff] %v1799_v7  ;;  %v1833_v7 = vld [vmem:[%s3767_s23 + $0x624] sm:$0xf]  ;;  %v1834_v21 = vmul.f32 %v1832_v2, %v1832_v2 }
 0x551   : > { %v1835_v22 = vmul.f32 %v1833_v7, %v1833_v7 }
 0x557   : > { %v4320_v16 = vld.sshfl [vmem:[#allocation1] sm:$0xff pattern:$0x75316420] }
 0x558   : > { %5189 = vst [vmem:[#allocation94_spill] sm:$0xff] %v4320_v16 }
 0x559   : > { %1814 = vst [vmem:[#allocation1] ss:$2 sm:$0xff] %v1810_v35  ;;  %v1844_v35 = vld [vmem:[%s3767_s23 + $0x228] sm:$0xf] }
 0x55a   : > { %1816 = vst [vmem:[#allocation1 + $0x1] ss:$2 sm:$0xff] %v1811_v37  ;;  %v1845_v37 = vld [vmem:[%s3767_s23 + $0x628] sm:$0xf]  ;;  %v1846_v43 = vmul.f32 %v1844_v35, %v1844_v35 }
 0x55b   : > { %v1847_v46 = vmul.f32 %v1845_v37, %v1845_v37 }
 0x561   : > { %v4324_v25 = vld.sshfl [vmem:[#allocation1] sm:$0xff pattern:$0x75316420] }
 0x562   : > { %5190 = vst [vmem:[#allocation95_spill] sm:$0xff] %v4324_v25 }
 0x563   : > { %1826 = vst [vmem:[#allocation1] ss:$2 sm:$0xff] %v1822_v56  ;;  %v1856_v56 = vld [vmem:[%s3767_s23 + $0x22c] sm:$0xf] }
 0x564   : > { %1828 = vst [vmem:[#allocation1 + $0x1] ss:$2 sm:$0xff] %v1823_v62  ;;  %v1857_v62 = vld [vmem:[%s3767_s23 + $0x62c] sm:$0xf]  ;;  %v1858_v2 = vmul.f32 %v1856_v56, %v1856_v56 }
 0x565   : > { %v1859_v7 = vmul.f32 %v1857_v62, %v1857_v62 }
 0x56b   : > { %v4328_v53 = vld.sshfl [vmem:[#allocation1] sm:$0xff pattern:$0x75316420] }
 0x56c   : > { %5191 = vst [vmem:[#allocation96_spill] sm:$0xff] %v4328_v53 }
 0x56d   : > { %1838 = vst [vmem:[#allocation1] ss:$2 sm:$0xff] %v1834_v21  ;;  %v1868_v21 = vld [vmem:[%s3767_s23 + $0x230] sm:$0xf] }
 0x56e   : > { %1840 = vst [vmem:[#allocation1 + $0x1] ss:$2 sm:$0xff] %v1835_v22  ;;  %v1869_v22 = vld [vmem:[%s3767_s23 + $0x630] sm:$0xf]  ;;  %v1870_v35 = vmul.f32 %v1868_v21, %v1868_v21 }
 0x56f   : > { %v1871_v37 = vmul.f32 %v1869_v22, %v1869_v22 }
 0x575   : > { %v4332_v16 = vld.sshfl [vmem:[#allocation1] sm:$0xff pattern:$0x75316420] }
 0x576   : > { %5192 = vst [vmem:[#allocation97_spill] sm:$0xff] %v4332_v16 }
 0x577   : > { %1850 = vst [vmem:[#allocation1] ss:$2 sm:$0xff] %v1846_v43  ;;  %v1880_v43 = vld [vmem:[%s3767_s23 + $0x234] sm:$0xf] }
 0x578   : > { %1852 = vst [vmem:[#allocation1 + $0x1] ss:$2 sm:$0xff] %v1847_v46  ;;  %v1881_v46 = vld [vmem:[%s3767_s23 + $0x634] sm:$0xf]  ;;  %v1882_v56 = vmul.f32 %v1880_v43, %v1880_v43 }
 0x579   : > { %v1883_v62 = vmul.f32 %v1881_v46, %v1881_v46 }
 0x57f   : > { %v4336_v25 = vld.sshfl [vmem:[#allocation1] sm:$0xff pattern:$0x75316420] }
 0x580   : > { %5193 = vst [vmem:[#allocation98_spill] sm:$0xff] %v4336_v25 }
 0x581   : > { %1862 = vst [vmem:[#allocation1] ss:$2 sm:$0xff] %v1858_v2  ;;  %v1892_v2 = vld [vmem:[%s3767_s23 + $0x238] sm:$0xf] }
 0x582   : > { %1864 = vst [vmem:[#allocation1 + $0x1] ss:$2 sm:$0xff] %v1859_v7  ;;  %v1893_v7 = vld [vmem:[%s3767_s23 + $0x638] sm:$0xf]  ;;  %v1894_v21 = vmul.f32 %v1892_v2, %v1892_v2 }
 0x583   : > { %v1895_v22 = vmul.f32 %v1893_v7, %v1893_v7 }
 0x589   : > { %v4340_v53 = vld.sshfl [vmem:[#allocation1] sm:$0xff pattern:$0x75316420] }
 0x58a   : > { %5194 = vst [vmem:[#allocation99_spill] sm:$0xff] %v4340_v53 }
 0x58b   : > { %1874 = vst [vmem:[#allocation1] ss:$2 sm:$0xff] %v1870_v35  ;;  %v1904_v35 = vld [vmem:[%s3767_s23 + $0x23c] sm:$0xf] }
 0x58c   : > { %1876 = vst [vmem:[#allocation1 + $0x1] ss:$2 sm:$0xff] %v1871_v37  ;;  %v1905_v37 = vld [vmem:[%s3767_s23 + $0x63c] sm:$0xf]  ;;  %v1906_v43 = vmul.f32 %v1904_v35, %v1904_v35 }
 0x58d   : > { %v1907_v46 = vmul.f32 %v1905_v37, %v1905_v37 }
 0x593   : > { %v4344_v16 = vld.sshfl [vmem:[#allocation1] sm:$0xff pattern:$0x75316420] }
 0x594   : > { %5195 = vst [vmem:[#allocation100_spill] sm:$0xff] %v4344_v16 }
 0x595   : > { %1886 = vst [vmem:[#allocation1] ss:$2 sm:$0xff] %v1882_v56  ;;  %v1916_v56 = vld [vmem:[%s3767_s23 + $0x240] sm:$0xf] }
 0x596   : > { %1888 = vst [vmem:[#allocation1 + $0x1] ss:$2 sm:$0xff] %v1883_v62  ;;  %v1917_v62 = vld [vmem:[%s3767_s23 + $0x640] sm:$0xf]  ;;  %v1918_v2 = vmul.f32 %v1916_v56, %v1916_v56 }
 0x597   : > { %v1919_v7 = vmul.f32 %v1917_v62, %v1917_v62 }
 0x59d   : > { %v4348_v25 = vld.sshfl [vmem:[#allocation1] sm:$0xff pattern:$0x75316420] }
 0x59e   : > { %5196 = vst [vmem:[#allocation101_spill] sm:$0xff] %v4348_v25 }
 0x59f   : > { %1898 = vst [vmem:[#allocation1] ss:$2 sm:$0xff] %v1894_v21  ;;  %v1928_v21 = vld [vmem:[%s3767_s23 + $0x244] sm:$0xf] }
 0x5a0   : > { %1900 = vst [vmem:[#allocation1 + $0x1] ss:$2 sm:$0xff] %v1895_v22  ;;  %v1929_v22 = vld [vmem:[%s3767_s23 + $0x644] sm:$0xf]  ;;  %v1930_v35 = vmul.f32 %v1928_v21, %v1928_v21 }
 0x5a1   : > { %v1931_v37 = vmul.f32 %v1929_v22, %v1929_v22 }
 0x5a7   : > { %v4352_v53 = vld.sshfl [vmem:[#allocation1] sm:$0xff pattern:$0x75316420] }
 0x5a8   : > { %5197 = vst [vmem:[#allocation102_spill] sm:$0xff] %v4352_v53 }
 0x5a9   : > { %1910 = vst [vmem:[#allocation1] ss:$2 sm:$0xff] %v1906_v43  ;;  %v1940_v43 = vld [vmem:[%s3767_s23 + $0x248] sm:$0xf] }
 0x5aa   : > { %1912 = vst [vmem:[#allocation1 + $0x1] ss:$2 sm:$0xff] %v1907_v46  ;;  %v1941_v46 = vld [vmem:[%s3767_s23 + $0x648] sm:$0xf]  ;;  %v1942_v56 = vmul.f32 %v1940_v43, %v1940_v43 }
 0x5ab   : > { %v1943_v62 = vmul.f32 %v1941_v46, %v1941_v46 }
 0x5b1   : > { %v4356_v16 = vld.sshfl [vmem:[#allocation1] sm:$0xff pattern:$0x75316420] }
 0x5b2   : > { %5198 = vst [vmem:[#allocation103_spill] sm:$0xff] %v4356_v16 }
 0x5b3   : > { %1922 = vst [vmem:[#allocation1] ss:$2 sm:$0xff] %v1918_v2  ;;  %v1952_v2 = vld [vmem:[%s3767_s23 + $0x24c] sm:$0xf] }
 0x5b4   : > { %1924 = vst [vmem:[#allocation1 + $0x1] ss:$2 sm:$0xff] %v1919_v7  ;;  %v1953_v7 = vld [vmem:[%s3767_s23 + $0x64c] sm:$0xf]  ;;  %v1954_v21 = vmul.f32 %v1952_v2, %v1952_v2 }
 0x5b5   : > { %v1955_v22 = vmul.f32 %v1953_v7, %v1953_v7 }
 0x5bb   : > { %v4360_v25 = vld.sshfl [vmem:[#allocation1] sm:$0xff pattern:$0x75316420] }
 0x5bc   : > { %5199 = vst [vmem:[#allocation104_spill] sm:$0xff] %v4360_v25 }
 0x5bd   : > { %1934 = vst [vmem:[#allocation1] ss:$2 sm:$0xff] %v1930_v35  ;;  %v1964_v35 = vld [vmem:[%s3767_s23 + $0x250] sm:$0xf] }
 0x5be   : > { %1936 = vst [vmem:[#allocation1 + $0x1] ss:$2 sm:$0xff] %v1931_v37  ;;  %v1965_v37 = vld [vmem:[%s3767_s23 + $0x650] sm:$0xf]  ;;  %v1966_v43 = vmul.f32 %v1964_v35, %v1964_v35 }
 0x5bf   : > { %v1967_v46 = vmul.f32 %v1965_v37, %v1965_v37 }
 0x5c5   : > { %v4364_v53 = vld.sshfl [vmem:[#allocation1] sm:$0xff pattern:$0x75316420] }
 0x5c6   : > { %5200 = vst [vmem:[#allocation105_spill] sm:$0xff] %v4364_v53 }
 0x5c7   : > { %1946 = vst [vmem:[#allocation1] ss:$2 sm:$0xff] %v1942_v56  ;;  %v1976_v56 = vld [vmem:[%s3767_s23 + $0x254] sm:$0xf] }
 0x5c8   : > { %1948 = vst [vmem:[#allocation1 + $0x1] ss:$2 sm:$0xff] %v1943_v62  ;;  %v1977_v62 = vld [vmem:[%s3767_s23 + $0x654] sm:$0xf]  ;;  %v1978_v2 = vmul.f32 %v1976_v56, %v1976_v56 }
 0x5c9   : > { %v1979_v7 = vmul.f32 %v1977_v62, %v1977_v62 }
 0x5cf   : > { %v4368_v16 = vld.sshfl [vmem:[#allocation1] sm:$0xff pattern:$0x75316420] }
 0x5d0   : > { %5201 = vst [vmem:[#allocation106_spill] sm:$0xff] %v4368_v16 }
 0x5d1   : > { %1958 = vst [vmem:[#allocation1] ss:$2 sm:$0xff] %v1954_v21  ;;  %v1988_v21 = vld [vmem:[%s3767_s23 + $0x258] sm:$0xf] }
 0x5d2   : > { %1960 = vst [vmem:[#allocation1 + $0x1] ss:$2 sm:$0xff] %v1955_v22  ;;  %v1989_v22 = vld [vmem:[%s3767_s23 + $0x658] sm:$0xf]  ;;  %v1990_v35 = vmul.f32 %v1988_v21, %v1988_v21 }
 0x5d3   : > { %v1991_v37 = vmul.f32 %v1989_v22, %v1989_v22 }
 0x5d9   : > { %v4372_v25 = vld.sshfl [vmem:[#allocation1] sm:$0xff pattern:$0x75316420] }
 0x5da   : > { %5202 = vst [vmem:[#allocation107_spill] sm:$0xff] %v4372_v25 }
 0x5db   : > { %1970 = vst [vmem:[#allocation1] ss:$2 sm:$0xff] %v1966_v43  ;;  %v2000_v43 = vld [vmem:[%s3767_s23 + $0x25c] sm:$0xf] }
 0x5dc   : > { %1972 = vst [vmem:[#allocation1 + $0x1] ss:$2 sm:$0xff] %v1967_v46  ;;  %v2001_v46 = vld [vmem:[%s3767_s23 + $0x65c] sm:$0xf]  ;;  %v2002_v56 = vmul.f32 %v2000_v43, %v2000_v43 }
 0x5dd   : > { %v2003_v62 = vmul.f32 %v2001_v46, %v2001_v46 }
 0x5e3   : > { %v4376_v53 = vld.sshfl [vmem:[#allocation1] sm:$0xff pattern:$0x75316420] }
 0x5e4   : > { %5203 = vst [vmem:[#allocation108_spill] sm:$0xff] %v4376_v53 }
 0x5e5   : > { %1982 = vst [vmem:[#allocation1] ss:$2 sm:$0xff] %v1978_v2  ;;  %v2012_v2 = vld [vmem:[%s3767_s23 + $0x260] sm:$0xf] }
 0x5e6   : > { %1984 = vst [vmem:[#allocation1 + $0x1] ss:$2 sm:$0xff] %v1979_v7  ;;  %v2013_v7 = vld [vmem:[%s3767_s23 + $0x660] sm:$0xf]  ;;  %v2014_v21 = vmul.f32 %v2012_v2, %v2012_v2 }
 0x5e7   : > { %v2015_v22 = vmul.f32 %v2013_v7, %v2013_v7 }
 0x5ed   : > { %v4380_v16 = vld.sshfl [vmem:[#allocation1] sm:$0xff pattern:$0x75316420] }
 0x5ee   : > { %5204 = vst [vmem:[#allocation109_spill] sm:$0xff] %v4380_v16 }
 0x5ef   : > { %1994 = vst [vmem:[#allocation1] ss:$2 sm:$0xff] %v1990_v35  ;;  %v2024_v35 = vld [vmem:[%s3767_s23 + $0x264] sm:$0xf] }
 0x5f0   : > { %1996 = vst [vmem:[#allocation1 + $0x1] ss:$2 sm:$0xff] %v1991_v37  ;;  %v2025_v37 = vld [vmem:[%s3767_s23 + $0x664] sm:$0xf]  ;;  %v2026_v43 = vmul.f32 %v2024_v35, %v2024_v35 }
 0x5f1   : > { %v2027_v46 = vmul.f32 %v2025_v37, %v2025_v37 }
 0x5f7   : > { %v4384_v25 = vld.sshfl [vmem:[#allocation1] sm:$0xff pattern:$0x75316420] }
 0x5f8   : > { %5205 = vst [vmem:[#allocation110_spill] sm:$0xff] %v4384_v25 }
 0x5f9   : > { %2006 = vst [vmem:[#allocation1] ss:$2 sm:$0xff] %v2002_v56  ;;  %v2036_v56 = vld [vmem:[%s3767_s23 + $0x268] sm:$0xf] }
 0x5fa   : > { %2008 = vst [vmem:[#allocation1 + $0x1] ss:$2 sm:$0xff] %v2003_v62  ;;  %v2037_v62 = vld [vmem:[%s3767_s23 + $0x668] sm:$0xf]  ;;  %v2038_v2 = vmul.f32 %v2036_v56, %v2036_v56 }
 0x5fb   : > { %v2039_v7 = vmul.f32 %v2037_v62, %v2037_v62 }
 0x601   : > { %v4388_v53 = vld.sshfl [vmem:[#allocation1] sm:$0xff pattern:$0x75316420] }
 0x602   : > { %5206 = vst [vmem:[#allocation111_spill] sm:$0xff] %v4388_v53 }
 0x603   : > { %2018 = vst [vmem:[#allocation1] ss:$2 sm:$0xff] %v2014_v21  ;;  %v2048_v21 = vld [vmem:[%s3767_s23 + $0x26c] sm:$0xf] }
 0x604   : > { %2020 = vst [vmem:[#allocation1 + $0x1] ss:$2 sm:$0xff] %v2015_v22  ;;  %v2049_v22 = vld [vmem:[%s3767_s23 + $0x66c] sm:$0xf]  ;;  %v2050_v35 = vmul.f32 %v2048_v21, %v2048_v21 }
 0x605   : > { %v2051_v37 = vmul.f32 %v2049_v22, %v2049_v22 }
 0x60b   : > { %v4392_v16 = vld.sshfl [vmem:[#allocation1] sm:$0xff pattern:$0x75316420] }
 0x60c   : > { %5207 = vst [vmem:[#allocation112_spill] sm:$0xff] %v4392_v16 }
 0x60d   : > { %2030 = vst [vmem:[#allocation1] ss:$2 sm:$0xff] %v2026_v43  ;;  %v2060_v43 = vld [vmem:[%s3767_s23 + $0x270] sm:$0xf] }
 0x60e   : > { %2032 = vst [vmem:[#allocation1 + $0x1] ss:$2 sm:$0xff] %v2027_v46  ;;  %v2061_v46 = vld [vmem:[%s3767_s23 + $0x670] sm:$0xf]  ;;  %v2062_v56 = vmul.f32 %v2060_v43, %v2060_v43 }
 0x60f   : > { %v2063_v62 = vmul.f32 %v2061_v46, %v2061_v46 }
 0x615   : > { %v4396_v25 = vld.sshfl [vmem:[#allocation1] sm:$0xff pattern:$0x75316420] }
 0x616   : > { %5208 = vst [vmem:[#allocation113_spill] sm:$0xff] %v4396_v25 }
 0x617   : > { %2042 = vst [vmem:[#allocation1] ss:$2 sm:$0xff] %v2038_v2  ;;  %v2072_v2 = vld [vmem:[%s3767_s23 + $0x274] sm:$0xf] }
 0x618   : > { %2044 = vst [vmem:[#allocation1 + $0x1] ss:$2 sm:$0xff] %v2039_v7  ;;  %v2073_v7 = vld [vmem:[%s3767_s23 + $0x674] sm:$0xf]  ;;  %v2074_v21 = vmul.f32 %v2072_v2, %v2072_v2 }
 0x619   : > { %v2075_v22 = vmul.f32 %v2073_v7, %v2073_v7 }
 0x61f   : > { %v4400_v53 = vld.sshfl [vmem:[#allocation1] sm:$0xff pattern:$0x75316420] }
 0x620   : > { %5209 = vst [vmem:[#allocation114_spill] sm:$0xff] %v4400_v53 }
 0x621   : > { %2054 = vst [vmem:[#allocation1] ss:$2 sm:$0xff] %v2050_v35  ;;  %v2084_v35 = vld [vmem:[%s3767_s23 + $0x278] sm:$0xf] }
 0x622   : > { %2056 = vst [vmem:[#allocation1 + $0x1] ss:$2 sm:$0xff] %v2051_v37  ;;  %v2085_v37 = vld [vmem:[%s3767_s23 + $0x678] sm:$0xf]  ;;  %v2086_v43 = vmul.f32 %v2084_v35, %v2084_v35 }
 0x623   : > { %v2087_v46 = vmul.f32 %v2085_v37, %v2085_v37 }
 0x629   : > { %v4404_v16 = vld.sshfl [vmem:[#allocation1] sm:$0xff pattern:$0x75316420] }
 0x62a   : > { %5210 = vst [vmem:[#allocation115_spill] sm:$0xff] %v4404_v16 }
 0x62b   : > { %2066 = vst [vmem:[#allocation1] ss:$2 sm:$0xff] %v2062_v56  ;;  %v2096_v56 = vld [vmem:[%s3767_s23 + $0x27c] sm:$0xf] }
 0x62c   : > { %2068 = vst [vmem:[#allocation1 + $0x1] ss:$2 sm:$0xff] %v2063_v62  ;;  %v2097_v62 = vld [vmem:[%s3767_s23 + $0x67c] sm:$0xf]  ;;  %v2098_v2 = vmul.f32 %v2096_v56, %v2096_v56 }
 0x62d   : > { %v2099_v7 = vmul.f32 %v2097_v62, %v2097_v62 }
 0x633   : > { %v4408_v25 = vld.sshfl [vmem:[#allocation1] sm:$0xff pattern:$0x75316420] }
 0x634   : > { %5211 = vst [vmem:[#allocation116_spill] sm:$0xff] %v4408_v25 }
 0x635   : > { %2078 = vst [vmem:[#allocation1] ss:$2 sm:$0xff] %v2074_v21  ;;  %v2108_v21 = vld [vmem:[%s3767_s23 + $0x280] sm:$0xf] }
 0x636   : > { %2080 = vst [vmem:[#allocation1 + $0x1] ss:$2 sm:$0xff] %v2075_v22  ;;  %v2109_v22 = vld [vmem:[%s3767_s23 + $0x680] sm:$0xf]  ;;  %v2110_v35 = vmul.f32 %v2108_v21, %v2108_v21 }
 0x637   : > { %v2111_v37 = vmul.f32 %v2109_v22, %v2109_v22 }
 0x63d   : > { %v4412_v53 = vld.sshfl [vmem:[#allocation1] sm:$0xff pattern:$0x75316420] }
 0x63e   : > { %5212 = vst [vmem:[#allocation117_spill] sm:$0xff] %v4412_v53 }
 0x63f   : > { %2090 = vst [vmem:[#allocation1] ss:$2 sm:$0xff] %v2086_v43  ;;  %v2120_v43 = vld [vmem:[%s3767_s23 + $0x284] sm:$0xf] }
 0x640   : > { %2092 = vst [vmem:[#allocation1 + $0x1] ss:$2 sm:$0xff] %v2087_v46  ;;  %v2121_v46 = vld [vmem:[%s3767_s23 + $0x684] sm:$0xf]  ;;  %v2122_v56 = vmul.f32 %v2120_v43, %v2120_v43 }
 0x641   : > { %v2123_v62 = vmul.f32 %v2121_v46, %v2121_v46 }
 0x647   : > { %v4416_v16 = vld.sshfl [vmem:[#allocation1] sm:$0xff pattern:$0x75316420] }
 0x648   : > { %5213 = vst [vmem:[#allocation118_spill] sm:$0xff] %v4416_v16 }
 0x649   : > { %2102 = vst [vmem:[#allocation1] ss:$2 sm:$0xff] %v2098_v2  ;;  %v2132_v2 = vld [vmem:[%s3767_s23 + $0x288] sm:$0xf] }
 0x64a   : > { %2104 = vst [vmem:[#allocation1 + $0x1] ss:$2 sm:$0xff] %v2099_v7  ;;  %v2133_v7 = vld [vmem:[%s3767_s23 + $0x688] sm:$0xf]  ;;  %v2134_v21 = vmul.f32 %v2132_v2, %v2132_v2 }
 0x64b   : > { %v2135_v22 = vmul.f32 %v2133_v7, %v2133_v7 }
 0x651   : > { %v4420_v25 = vld.sshfl [vmem:[#allocation1] sm:$0xff pattern:$0x75316420] }
 0x652   : > { %5214 = vst [vmem:[#allocation119_spill] sm:$0xff] %v4420_v25 }
 0x653   : > { %2114 = vst [vmem:[#allocation1] ss:$2 sm:$0xff] %v2110_v35  ;;  %v2144_v35 = vld [vmem:[%s3767_s23 + $0x28c] sm:$0xf] }
 0x654   : > { %2116 = vst [vmem:[#allocation1 + $0x1] ss:$2 sm:$0xff] %v2111_v37  ;;  %v2145_v37 = vld [vmem:[%s3767_s23 + $0x68c] sm:$0xf]  ;;  %v2146_v43 = vmul.f32 %v2144_v35, %v2144_v35 }
 0x655   : > { %v2147_v46 = vmul.f32 %v2145_v37, %v2145_v37 }
 0x65b   : > { %v4424_v53 = vld.sshfl [vmem:[#allocation1] sm:$0xff pattern:$0x75316420] }
 0x65c   : > { %5215 = vst [vmem:[#allocation120_spill] sm:$0xff] %v4424_v53 }
 0x65d   : > { %2126 = vst [vmem:[#allocation1] ss:$2 sm:$0xff] %v2122_v56  ;;  %v2156_v56 = vld [vmem:[%s3767_s23 + $0x290] sm:$0xf] }
 0x65e   : > { %2128 = vst [vmem:[#allocation1 + $0x1] ss:$2 sm:$0xff] %v2123_v62  ;;  %v2157_v62 = vld [vmem:[%s3767_s23 + $0x690] sm:$0xf]  ;;  %v2158_v2 = vmul.f32 %v2156_v56, %v2156_v56 }
 0x65f   : > { %v2159_v7 = vmul.f32 %v2157_v62, %v2157_v62 }
 0x665   : > { %v4428_v16 = vld.sshfl [vmem:[#allocation1] sm:$0xff pattern:$0x75316420] }
 0x666   : > { %5216 = vst [vmem:[#allocation121_spill] sm:$0xff] %v4428_v16 }
 0x667   : > { %2138 = vst [vmem:[#allocation1] ss:$2 sm:$0xff] %v2134_v21  ;;  %v2168_v21 = vld [vmem:[%s3767_s23 + $0x294] sm:$0xf] }
 0x668   : > { %2140 = vst [vmem:[#allocation1 + $0x1] ss:$2 sm:$0xff] %v2135_v22  ;;  %v2169_v22 = vld [vmem:[%s3767_s23 + $0x694] sm:$0xf]  ;;  %v2170_v35 = vmul.f32 %v2168_v21, %v2168_v21 }
 0x669   : > { %v2171_v37 = vmul.f32 %v2169_v22, %v2169_v22 }
 0x66f   : > { %v4432_v25 = vld.sshfl [vmem:[#allocation1] sm:$0xff pattern:$0x75316420] }
 0x670   : > { %5217 = vst [vmem:[#allocation122_spill] sm:$0xff] %v4432_v25 }
 0x671   : > { %2150 = vst [vmem:[#allocation1] ss:$2 sm:$0xff] %v2146_v43  ;;  %v2180_v43 = vld [vmem:[%s3767_s23 + $0x298] sm:$0xf] }
 0x672   : > { %2152 = vst [vmem:[#allocation1 + $0x1] ss:$2 sm:$0xff] %v2147_v46  ;;  %v2181_v46 = vld [vmem:[%s3767_s23 + $0x698] sm:$0xf]  ;;  %v2182_v56 = vmul.f32 %v2180_v43, %v2180_v43 }
 0x673   : > { %v2183_v62 = vmul.f32 %v2181_v46, %v2181_v46 }
 0x679   : > { %v4436_v53 = vld.sshfl [vmem:[#allocation1] sm:$0xff pattern:$0x75316420] }
 0x67a   : > { %5218 = vst [vmem:[#allocation123_spill] sm:$0xff] %v4436_v53 }
 0x67b   : > { %2162 = vst [vmem:[#allocation1] ss:$2 sm:$0xff] %v2158_v2  ;;  %v2192_v2 = vld [vmem:[%s3767_s23 + $0x29c] sm:$0xf] }
 0x67c   : > { %2164 = vst [vmem:[#allocation1 + $0x1] ss:$2 sm:$0xff] %v2159_v7  ;;  %v2193_v7 = vld [vmem:[%s3767_s23 + $0x69c] sm:$0xf]  ;;  %v2194_v21 = vmul.f32 %v2192_v2, %v2192_v2 }
 0x67d   : > { %v2195_v22 = vmul.f32 %v2193_v7, %v2193_v7 }
 0x683   : > { %v4440_v16 = vld.sshfl [vmem:[#allocation1] sm:$0xff pattern:$0x75316420] }
 0x684   : > { %5219 = vst [vmem:[#allocation124_spill] sm:$0xff] %v4440_v16 }
 0x685   : > { %2174 = vst [vmem:[#allocation1] ss:$2 sm:$0xff] %v2170_v35  ;;  %v2204_v35 = vld [vmem:[%s3767_s23 + $0x2a0] sm:$0xf] }
 0x686   : > { %2176 = vst [vmem:[#allocation1 + $0x1] ss:$2 sm:$0xff] %v2171_v37  ;;  %v2205_v37 = vld [vmem:[%s3767_s23 + $0x6a0] sm:$0xf]  ;;  %v2206_v43 = vmul.f32 %v2204_v35, %v2204_v35 }
 0x687   : > { %v2207_v46 = vmul.f32 %v2205_v37, %v2205_v37 }
 0x68d   : > { %v4444_v25 = vld.sshfl [vmem:[#allocation1] sm:$0xff pattern:$0x75316420] }
 0x68e   : > { %5220 = vst [vmem:[#allocation125_spill] sm:$0xff] %v4444_v25 }
 0x68f   : > { %2186 = vst [vmem:[#allocation1] ss:$2 sm:$0xff] %v2182_v56  ;;  %v2216_v56 = vld [vmem:[%s3767_s23 + $0x2a4] sm:$0xf] }
 0x690   : > { %2188 = vst [vmem:[#allocation1 + $0x1] ss:$2 sm:$0xff] %v2183_v62  ;;  %v2217_v62 = vld [vmem:[%s3767_s23 + $0x6a4] sm:$0xf]  ;;  %v2218_v2 = vmul.f32 %v2216_v56, %v2216_v56 }
 0x691   : > { %v2219_v7 = vmul.f32 %v2217_v62, %v2217_v62 }
 0x697   : > { %v4448_v53 = vld.sshfl [vmem:[#allocation1] sm:$0xff pattern:$0x75316420] }
 0x698   : > { %5221 = vst [vmem:[#allocation126_spill] sm:$0xff] %v4448_v53 }
 0x699   : > { %2198 = vst [vmem:[#allocation1] ss:$2 sm:$0xff] %v2194_v21  ;;  %v2228_v21 = vld [vmem:[%s3767_s23 + $0x2a8] sm:$0xf] }
 0x69a   : > { %2200 = vst [vmem:[#allocation1 + $0x1] ss:$2 sm:$0xff] %v2195_v22  ;;  %v2229_v22 = vld [vmem:[%s3767_s23 + $0x6a8] sm:$0xf]  ;;  %v2230_v35 = vmul.f32 %v2228_v21, %v2228_v21 }
 0x69b   : > { %v2231_v37 = vmul.f32 %v2229_v22, %v2229_v22 }
 0x6a1   : > { %v4452_v16 = vld.sshfl [vmem:[#allocation1] sm:$0xff pattern:$0x75316420] }
 0x6a2   : > { %5222 = vst [vmem:[#allocation127_spill] sm:$0xff] %v4452_v16 }
 0x6a3   : > { %2210 = vst [vmem:[#allocation1] ss:$2 sm:$0xff] %v2206_v43  ;;  %v2240_v43 = vld [vmem:[%s3767_s23 + $0x2ac] sm:$0xf] }
 0x6a4   : > { %2212 = vst [vmem:[#allocation1 + $0x1] ss:$2 sm:$0xff] %v2207_v46  ;;  %v2241_v46 = vld [vmem:[%s3767_s23 + $0x6ac] sm:$0xf]  ;;  %v2242_v56 = vmul.f32 %v2240_v43, %v2240_v43 }
 0x6a5   : > { %v2243_v62 = vmul.f32 %v2241_v46, %v2241_v46 }
 0x6ab   : > { %v4456_v25 = vld.sshfl [vmem:[#allocation1] sm:$0xff pattern:$0x75316420] }
 0x6ac   : > { %5223 = vst [vmem:[#allocation128_spill] sm:$0xff] %v4456_v25 }
 0x6ad   : > { %2222 = vst [vmem:[#allocation1] ss:$2 sm:$0xff] %v2218_v2  ;;  %v2252_v2 = vld [vmem:[%s3767_s23 + $0x2b0] sm:$0xf] }
 0x6ae   : > { %2224 = vst [vmem:[#allocation1 + $0x1] ss:$2 sm:$0xff] %v2219_v7  ;;  %v2253_v7 = vld [vmem:[%s3767_s23 + $0x6b0] sm:$0xf]  ;;  %v2254_v21 = vmul.f32 %v2252_v2, %v2252_v2 }
 0x6af   : > { %v2255_v22 = vmul.f32 %v2253_v7, %v2253_v7 }
 0x6b5   : > { %v4460_v53 = vld.sshfl [vmem:[#allocation1] sm:$0xff pattern:$0x75316420] }
 0x6b6   : > { %5224 = vst [vmem:[#allocation129_spill] sm:$0xff] %v4460_v53 }
 0x6b7   : > { %2234 = vst [vmem:[#allocation1] ss:$2 sm:$0xff] %v2230_v35  ;;  %v2264_v35 = vld [vmem:[%s3767_s23 + $0x2b4] sm:$0xf] }
 0x6b8   : > { %2236 = vst [vmem:[#allocation1 + $0x1] ss:$2 sm:$0xff] %v2231_v37  ;;  %v2265_v37 = vld [vmem:[%s3767_s23 + $0x6b4] sm:$0xf]  ;;  %v2266_v43 = vmul.f32 %v2264_v35, %v2264_v35 }
 0x6b9   : > { %v2267_v46 = vmul.f32 %v2265_v37, %v2265_v37 }
 0x6bf   : > { %v4464_v16 = vld.sshfl [vmem:[#allocation1] sm:$0xff pattern:$0x75316420] }
 0x6c0   : > { %5225 = vst [vmem:[#allocation130_spill] sm:$0xff] %v4464_v16 }
 0x6c1   : > { %2246 = vst [vmem:[#allocation1] ss:$2 sm:$0xff] %v2242_v56  ;;  %v2276_v56 = vld [vmem:[%s3767_s23 + $0x2b8] sm:$0xf] }
 0x6c2   : > { %2248 = vst [vmem:[#allocation1 + $0x1] ss:$2 sm:$0xff] %v2243_v62  ;;  %v2277_v62 = vld [vmem:[%s3767_s23 + $0x6b8] sm:$0xf]  ;;  %v2278_v2 = vmul.f32 %v2276_v56, %v2276_v56 }
 0x6c3   : > { %v2279_v7 = vmul.f32 %v2277_v62, %v2277_v62 }
 0x6c9   : > { %v4468_v25 = vld.sshfl [vmem:[#allocation1] sm:$0xff pattern:$0x75316420] }
 0x6ca   : > { %5226 = vst [vmem:[#allocation131_spill] sm:$0xff] %v4468_v25 }
 0x6cb   : > { %2258 = vst [vmem:[#allocation1] ss:$2 sm:$0xff] %v2254_v21  ;;  %v2288_v21 = vld [vmem:[%s3767_s23 + $0x2bc] sm:$0xf] }
 0x6cc   : > { %2260 = vst [vmem:[#allocation1 + $0x1] ss:$2 sm:$0xff] %v2255_v22  ;;  %v2289_v22 = vld [vmem:[%s3767_s23 + $0x6bc] sm:$0xf]  ;;  %v2290_v35 = vmul.f32 %v2288_v21, %v2288_v21 }
 0x6cd   : > { %v2291_v37 = vmul.f32 %v2289_v22, %v2289_v22 }
 0x6d3   : > { %v4472_v53 = vld.sshfl [vmem:[#allocation1] sm:$0xff pattern:$0x75316420] }
 0x6d4   : > { %5227 = vst [vmem:[#allocation132_spill] sm:$0xff] %v4472_v53 }
 0x6d5   : > { %2270 = vst [vmem:[#allocation1] ss:$2 sm:$0xff] %v2266_v43  ;;  %v2300_v43 = vld [vmem:[%s3767_s23 + $0x2c0] sm:$0xf] }
 0x6d6   : > { %2272 = vst [vmem:[#allocation1 + $0x1] ss:$2 sm:$0xff] %v2267_v46  ;;  %v2301_v46 = vld [vmem:[%s3767_s23 + $0x6c0] sm:$0xf]  ;;  %v2302_v56 = vmul.f32 %v2300_v43, %v2300_v43 }
 0x6d7   : > { %v2303_v62 = vmul.f32 %v2301_v46, %v2301_v46 }
 0x6dd   : > { %v4476_v16 = vld.sshfl [vmem:[#allocation1] sm:$0xff pattern:$0x75316420] }
 0x6de   : > { %5228 = vst [vmem:[#allocation133_spill] sm:$0xff] %v4476_v16 }
 0x6df   : > { %2282 = vst [vmem:[#allocation1] ss:$2 sm:$0xff] %v2278_v2  ;;  %v2312_v2 = vld [vmem:[%s3767_s23 + $0x2c4] sm:$0xf] }
 0x6e0   : > { %2284 = vst [vmem:[#allocation1 + $0x1] ss:$2 sm:$0xff] %v2279_v7  ;;  %v2313_v7 = vld [vmem:[%s3767_s23 + $0x6c4] sm:$0xf]  ;;  %v2314_v21 = vmul.f32 %v2312_v2, %v2312_v2 }
 0x6e1   : > { %v2315_v22 = vmul.f32 %v2313_v7, %v2313_v7 }
 0x6e7   : > { %v4480_v25 = vld.sshfl [vmem:[#allocation1] sm:$0xff pattern:$0x75316420] }
 0x6e8   : > { %5229 = vst [vmem:[#allocation134_spill] sm:$0xff] %v4480_v25 }
 0x6e9   : > { %2294 = vst [vmem:[#allocation1] ss:$2 sm:$0xff] %v2290_v35  ;;  %v2324_v35 = vld [vmem:[%s3767_s23 + $0x2c8] sm:$0xf] }
 0x6ea   : > { %2296 = vst [vmem:[#allocation1 + $0x1] ss:$2 sm:$0xff] %v2291_v37  ;;  %v2325_v37 = vld [vmem:[%s3767_s23 + $0x6c8] sm:$0xf]  ;;  %v2326_v43 = vmul.f32 %v2324_v35, %v2324_v35 }
 0x6eb   : > { %v2327_v46 = vmul.f32 %v2325_v37, %v2325_v37 }
 0x6f1   : > { %v4484_v53 = vld.sshfl [vmem:[#allocation1] sm:$0xff pattern:$0x75316420] }
 0x6f2   : > { %5230 = vst [vmem:[#allocation135_spill] sm:$0xff] %v4484_v53 }
 0x6f3   : > { %2306 = vst [vmem:[#allocation1] ss:$2 sm:$0xff] %v2302_v56  ;;  %v2336_v56 = vld [vmem:[%s3767_s23 + $0x2cc] sm:$0xf] }
 0x6f4   : > { %2308 = vst [vmem:[#allocation1 + $0x1] ss:$2 sm:$0xff] %v2303_v62  ;;  %v2337_v62 = vld [vmem:[%s3767_s23 + $0x6cc] sm:$0xf]  ;;  %v2338_v2 = vmul.f32 %v2336_v56, %v2336_v56 }
 0x6f5   : > { %v2339_v7 = vmul.f32 %v2337_v62, %v2337_v62 }
 0x6fb   : > { %v4488_v16 = vld.sshfl [vmem:[#allocation1] sm:$0xff pattern:$0x75316420] }
 0x6fc   : > { %5231 = vst [vmem:[#allocation136_spill] sm:$0xff] %v4488_v16 }
 0x6fd   : > { %2318 = vst [vmem:[#allocation1] ss:$2 sm:$0xff] %v2314_v21  ;;  %v2348_v21 = vld [vmem:[%s3767_s23 + $0x2d0] sm:$0xf] }
 0x6fe   : > { %2320 = vst [vmem:[#allocation1 + $0x1] ss:$2 sm:$0xff] %v2315_v22  ;;  %v2349_v22 = vld [vmem:[%s3767_s23 + $0x6d0] sm:$0xf]  ;;  %v2350_v35 = vmul.f32 %v2348_v21, %v2348_v21 }
 0x6ff   : > { %v2351_v37 = vmul.f32 %v2349_v22, %v2349_v22 }
 0x705   : > { %v4492_v25 = vld.sshfl [vmem:[#allocation1] sm:$0xff pattern:$0x75316420] }
 0x706   : > { %5232 = vst [vmem:[#allocation137_spill] sm:$0xff] %v4492_v25 }
 0x707   : > { %2330 = vst [vmem:[#allocation1] ss:$2 sm:$0xff] %v2326_v43  ;;  %v2360_v43 = vld [vmem:[%s3767_s23 + $0x2d4] sm:$0xf] }
 0x708   : > { %2332 = vst [vmem:[#allocation1 + $0x1] ss:$2 sm:$0xff] %v2327_v46  ;;  %v2361_v46 = vld [vmem:[%s3767_s23 + $0x6d4] sm:$0xf]  ;;  %v2362_v56 = vmul.f32 %v2360_v43, %v2360_v43 }
 0x709   : > { %v2363_v62 = vmul.f32 %v2361_v46, %v2361_v46 }
 0x70f   : > { %v4496_v53 = vld.sshfl [vmem:[#allocation1] sm:$0xff pattern:$0x75316420] }
 0x710   : > { %5233 = vst [vmem:[#allocation138_spill] sm:$0xff] %v4496_v53 }
 0x711   : > { %2342 = vst [vmem:[#allocation1] ss:$2 sm:$0xff] %v2338_v2  ;;  %v2372_v2 = vld [vmem:[%s3767_s23 + $0x2d8] sm:$0xf] }
 0x712   : > { %2344 = vst [vmem:[#allocation1 + $0x1] ss:$2 sm:$0xff] %v2339_v7  ;;  %v2373_v7 = vld [vmem:[%s3767_s23 + $0x6d8] sm:$0xf]  ;;  %v2374_v21 = vmul.f32 %v2372_v2, %v2372_v2 }
 0x713   : > { %v2375_v22 = vmul.f32 %v2373_v7, %v2373_v7 }
 0x719   : > { %v4500_v16 = vld.sshfl [vmem:[#allocation1] sm:$0xff pattern:$0x75316420] }
 0x71a   : > { %5234 = vst [vmem:[#allocation139_spill] sm:$0xff] %v4500_v16 }
 0x71b   : > { %2354 = vst [vmem:[#allocation1] ss:$2 sm:$0xff] %v2350_v35  ;;  %v2384_v35 = vld [vmem:[%s3767_s23 + $0x2dc] sm:$0xf] }
 0x71c   : > { %2356 = vst [vmem:[#allocation1 + $0x1] ss:$2 sm:$0xff] %v2351_v37  ;;  %v2385_v37 = vld [vmem:[%s3767_s23 + $0x6dc] sm:$0xf]  ;;  %v2386_v43 = vmul.f32 %v2384_v35, %v2384_v35 }
 0x71d   : > { %v2387_v46 = vmul.f32 %v2385_v37, %v2385_v37 }
 0x723   : > { %v4504_v25 = vld.sshfl [vmem:[#allocation1] sm:$0xff pattern:$0x75316420] }
 0x724   : > { %5235 = vst [vmem:[#allocation140_spill] sm:$0xff] %v4504_v25 }
 0x725   : > { %2366 = vst [vmem:[#allocation1] ss:$2 sm:$0xff] %v2362_v56  ;;  %v2396_v56 = vld [vmem:[%s3767_s23 + $0x2e0] sm:$0xf] }
 0x726   : > { %2368 = vst [vmem:[#allocation1 + $0x1] ss:$2 sm:$0xff] %v2363_v62  ;;  %v2397_v62 = vld [vmem:[%s3767_s23 + $0x6e0] sm:$0xf]  ;;  %v2398_v2 = vmul.f32 %v2396_v56, %v2396_v56 }
 0x727   : > { %v2399_v7 = vmul.f32 %v2397_v62, %v2397_v62 }
 0x72d   : > { %v4508_v53 = vld.sshfl [vmem:[#allocation1] sm:$0xff pattern:$0x75316420] }
 0x72e   : > { %5236 = vst [vmem:[#allocation141_spill] sm:$0xff] %v4508_v53 }
 0x72f   : > { %2378 = vst [vmem:[#allocation1] ss:$2 sm:$0xff] %v2374_v21  ;;  %v2408_v21 = vld [vmem:[%s3767_s23 + $0x2e4] sm:$0xf] }
 0x730   : > { %2380 = vst [vmem:[#allocation1 + $0x1] ss:$2 sm:$0xff] %v2375_v22  ;;  %v2409_v22 = vld [vmem:[%s3767_s23 + $0x6e4] sm:$0xf]  ;;  %v2410_v35 = vmul.f32 %v2408_v21, %v2408_v21 }
 0x731   : > { %v2411_v37 = vmul.f32 %v2409_v22, %v2409_v22 }
 0x737   : > { %v4512_v16 = vld.sshfl [vmem:[#allocation1] sm:$0xff pattern:$0x75316420] }
 0x738   : > { %5237 = vst [vmem:[#allocation142_spill] sm:$0xff] %v4512_v16 }
 0x739   : > { %2390 = vst [vmem:[#allocation1] ss:$2 sm:$0xff] %v2386_v43  ;;  %v2420_v43 = vld [vmem:[%s3767_s23 + $0x2e8] sm:$0xf] }
 0x73a   : > { %2392 = vst [vmem:[#allocation1 + $0x1] ss:$2 sm:$0xff] %v2387_v46  ;;  %v2421_v46 = vld [vmem:[%s3767_s23 + $0x6e8] sm:$0xf]  ;;  %v2422_v56 = vmul.f32 %v2420_v43, %v2420_v43 }
 0x73b   : > { %v2423_v62 = vmul.f32 %v2421_v46, %v2421_v46 }
 0x741   : > { %v4516_v25 = vld.sshfl [vmem:[#allocation1] sm:$0xff pattern:$0x75316420] }
 0x742   : > { %5238 = vst [vmem:[#allocation143_spill] sm:$0xff] %v4516_v25 }
 0x743   : > { %2402 = vst [vmem:[#allocation1] ss:$2 sm:$0xff] %v2398_v2  ;;  %v2432_v2 = vld [vmem:[%s3767_s23 + $0x2ec] sm:$0xf] }
 0x744   : > { %2404 = vst [vmem:[#allocation1 + $0x1] ss:$2 sm:$0xff] %v2399_v7  ;;  %v2433_v7 = vld [vmem:[%s3767_s23 + $0x6ec] sm:$0xf]  ;;  %v2434_v21 = vmul.f32 %v2432_v2, %v2432_v2 }
 0x745   : > { %v2435_v22 = vmul.f32 %v2433_v7, %v2433_v7 }
 0x74b   : > { %v4520_v53 = vld.sshfl [vmem:[#allocation1] sm:$0xff pattern:$0x75316420] }
 0x74c   : > { %5239 = vst [vmem:[#allocation144_spill] sm:$0xff] %v4520_v53 }
 0x74d   : > { %2414 = vst [vmem:[#allocation1] ss:$2 sm:$0xff] %v2410_v35  ;;  %v2444_v35 = vld [vmem:[%s3767_s23 + $0x2f0] sm:$0xf] }
 0x74e   : > { %2416 = vst [vmem:[#allocation1 + $0x1] ss:$2 sm:$0xff] %v2411_v37  ;;  %v2445_v37 = vld [vmem:[%s3767_s23 + $0x6f0] sm:$0xf]  ;;  %v2446_v43 = vmul.f32 %v2444_v35, %v2444_v35 }
 0x74f   : > { %v2447_v46 = vmul.f32 %v2445_v37, %v2445_v37 }
 0x755   : > { %v4524_v16 = vld.sshfl [vmem:[#allocation1] sm:$0xff pattern:$0x75316420] }
 0x756   : > { %5240 = vst [vmem:[#allocation145_spill] sm:$0xff] %v4524_v16 }
 0x757   : > { %2426 = vst [vmem:[#allocation1] ss:$2 sm:$0xff] %v2422_v56  ;;  %v2456_v56 = vld [vmem:[%s3767_s23 + $0x2f4] sm:$0xf] }
 0x758   : > { %2428 = vst [vmem:[#allocation1 + $0x1] ss:$2 sm:$0xff] %v2423_v62  ;;  %v2457_v62 = vld [vmem:[%s3767_s23 + $0x6f4] sm:$0xf]  ;;  %v2458_v2 = vmul.f32 %v2456_v56, %v2456_v56 }
 0x759   : > { %v2459_v7 = vmul.f32 %v2457_v62, %v2457_v62 }
 0x75f   : > { %v4528_v25 = vld.sshfl [vmem:[#allocation1] sm:$0xff pattern:$0x75316420] }
 0x760   : > { %5241 = vst [vmem:[#allocation146_spill] sm:$0xff] %v4528_v25 }
 0x761   : > { %2438 = vst [vmem:[#allocation1] ss:$2 sm:$0xff] %v2434_v21  ;;  %v2468_v21 = vld [vmem:[%s3767_s23 + $0x2f8] sm:$0xf] }
 0x762   : > { %2440 = vst [vmem:[#allocation1 + $0x1] ss:$2 sm:$0xff] %v2435_v22  ;;  %v2469_v22 = vld [vmem:[%s3767_s23 + $0x6f8] sm:$0xf]  ;;  %v2470_v35 = vmul.f32 %v2468_v21, %v2468_v21 }
 0x763   : > { %v2471_v37 = vmul.f32 %v2469_v22, %v2469_v22 }
 0x769   : > { %v4532_v53 = vld.sshfl [vmem:[#allocation1] sm:$0xff pattern:$0x75316420] }
 0x76a   : > { %5242 = vst [vmem:[#allocation147_spill] sm:$0xff] %v4532_v53 }
 0x76b   : > { %2450 = vst [vmem:[#allocation1] ss:$2 sm:$0xff] %v2446_v43  ;;  %v2480_v43 = vld [vmem:[%s3767_s23 + $0x2fc] sm:$0xf] }
 0x76c   : > { %2452 = vst [vmem:[#allocation1 + $0x1] ss:$2 sm:$0xff] %v2447_v46  ;;  %v2481_v46 = vld [vmem:[%s3767_s23 + $0x6fc] sm:$0xf]  ;;  %v2482_v56 = vmul.f32 %v2480_v43, %v2480_v43 }
 0x76d   : > { %v2483_v62 = vmul.f32 %v2481_v46, %v2481_v46 }
 0x773   : > { %v4536_v16 = vld.sshfl [vmem:[#allocation1] sm:$0xff pattern:$0x75316420] }
 0x774   : > { %5243 = vst [vmem:[#allocation148_spill] sm:$0xff] %v4536_v16 }
 0x775   : > { %2462 = vst [vmem:[#allocation1] ss:$2 sm:$0xff] %v2458_v2  ;;  %v2492_v2 = vld [vmem:[%s3767_s23 + $0x300] sm:$0xf] }
 0x776   : > { %2464 = vst [vmem:[#allocation1 + $0x1] ss:$2 sm:$0xff] %v2459_v7  ;;  %v2493_v7 = vld [vmem:[%s3767_s23 + $0x700] sm:$0xf]  ;;  %v2494_v21 = vmul.f32 %v2492_v2, %v2492_v2 }
 0x777   : > { %v2495_v22 = vmul.f32 %v2493_v7, %v2493_v7 }
 0x77d   : > { %v4540_v25 = vld.sshfl [vmem:[#allocation1] sm:$0xff pattern:$0x75316420] }
 0x77e   : > { %5244 = vst [vmem:[#allocation149_spill] sm:$0xff] %v4540_v25 }
 0x77f   : > { %2474 = vst [vmem:[#allocation1] ss:$2 sm:$0xff] %v2470_v35  ;;  %v2504_v35 = vld [vmem:[%s3767_s23 + $0x304] sm:$0xf] }
 0x780   : > { %2476 = vst [vmem:[#allocation1 + $0x1] ss:$2 sm:$0xff] %v2471_v37  ;;  %v2505_v37 = vld [vmem:[%s3767_s23 + $0x704] sm:$0xf]  ;;  %v2506_v43 = vmul.f32 %v2504_v35, %v2504_v35 }
 0x781   : > { %v2507_v46 = vmul.f32 %v2505_v37, %v2505_v37 }
 0x787   : > { %v4544_v53 = vld.sshfl [vmem:[#allocation1] sm:$0xff pattern:$0x75316420] }
 0x788   : > { %5245 = vst [vmem:[#allocation150_spill] sm:$0xff] %v4544_v53 }
 0x789   : > { %2486 = vst [vmem:[#allocation1] ss:$2 sm:$0xff] %v2482_v56  ;;  %v2516_v56 = vld [vmem:[%s3767_s23 + $0x308] sm:$0xf] }
 0x78a   : > { %2488 = vst [vmem:[#allocation1 + $0x1] ss:$2 sm:$0xff] %v2483_v62  ;;  %v2517_v62 = vld [vmem:[%s3767_s23 + $0x708] sm:$0xf]  ;;  %v2518_v2 = vmul.f32 %v2516_v56, %v2516_v56 }
 0x78b   : > { %v2519_v7 = vmul.f32 %v2517_v62, %v2517_v62 }
 0x791   : > { %v4548_v16 = vld.sshfl [vmem:[#allocation1] sm:$0xff pattern:$0x75316420] }
 0x792   : > { %5246 = vst [vmem:[#allocation151_spill] sm:$0xff] %v4548_v16 }
 0x793   : > { %2498 = vst [vmem:[#allocation1] ss:$2 sm:$0xff] %v2494_v21  ;;  %v2528_v21 = vld [vmem:[%s3767_s23 + $0x30c] sm:$0xf] }
 0x794   : > { %2500 = vst [vmem:[#allocation1 + $0x1] ss:$2 sm:$0xff] %v2495_v22  ;;  %v2529_v22 = vld [vmem:[%s3767_s23 + $0x70c] sm:$0xf]  ;;  %v2530_v35 = vmul.f32 %v2528_v21, %v2528_v21 }
 0x795   : > { %v2531_v37 = vmul.f32 %v2529_v22, %v2529_v22 }
 0x79b   : > { %v4552_v25 = vld.sshfl [vmem:[#allocation1] sm:$0xff pattern:$0x75316420] }
 0x79c   : > { %5247 = vst [vmem:[#allocation152_spill] sm:$0xff] %v4552_v25 }
 0x79d   : > { %2510 = vst [vmem:[#allocation1] ss:$2 sm:$0xff] %v2506_v43  ;;  %v2540_v43 = vld [vmem:[%s3767_s23 + $0x310] sm:$0xf] }
 0x79e   : > { %2512 = vst [vmem:[#allocation1 + $0x1] ss:$2 sm:$0xff] %v2507_v46  ;;  %v2541_v46 = vld [vmem:[%s3767_s23 + $0x710] sm:$0xf]  ;;  %v2542_v56 = vmul.f32 %v2540_v43, %v2540_v43 }
 0x79f   : > { %v2543_v62 = vmul.f32 %v2541_v46, %v2541_v46 }
 0x7a5   : > { %v4556_v53 = vld.sshfl [vmem:[#allocation1] sm:$0xff pattern:$0x75316420] }
 0x7a6   : > { %5248 = vst [vmem:[#allocation153_spill] sm:$0xff] %v4556_v53 }
 0x7a7   : > { %2522 = vst [vmem:[#allocation1] ss:$2 sm:$0xff] %v2518_v2  ;;  %v2552_v2 = vld [vmem:[%s3767_s23 + $0x314] sm:$0xf] }
 0x7a8   : > { %2524 = vst [vmem:[#allocation1 + $0x1] ss:$2 sm:$0xff] %v2519_v7  ;;  %v2553_v7 = vld [vmem:[%s3767_s23 + $0x714] sm:$0xf]  ;;  %v2554_v21 = vmul.f32 %v2552_v2, %v2552_v2 }
 0x7a9   : > { %v2555_v22 = vmul.f32 %v2553_v7, %v2553_v7 }
 0x7af   : > { %v4560_v16 = vld.sshfl [vmem:[#allocation1] sm:$0xff pattern:$0x75316420] }
 0x7b0   : > { %5249 = vst [vmem:[#allocation154_spill] sm:$0xff] %v4560_v16 }
 0x7b1   : > { %2534 = vst [vmem:[#allocation1] ss:$2 sm:$0xff] %v2530_v35  ;;  %v2564_v35 = vld [vmem:[%s3767_s23 + $0x318] sm:$0xf] }
 0x7b2   : > { %2536 = vst [vmem:[#allocation1 + $0x1] ss:$2 sm:$0xff] %v2531_v37  ;;  %v2565_v37 = vld [vmem:[%s3767_s23 + $0x718] sm:$0xf]  ;;  %v2566_v43 = vmul.f32 %v2564_v35, %v2564_v35 }
 0x7b3   : > { %v2567_v46 = vmul.f32 %v2565_v37, %v2565_v37 }
 0x7b9   : > { %v4564_v25 = vld.sshfl [vmem:[#allocation1] sm:$0xff pattern:$0x75316420] }
 0x7ba   : > { %5250 = vst [vmem:[#allocation155_spill] sm:$0xff] %v4564_v25 }
 0x7bb   : > { %2546 = vst [vmem:[#allocation1] ss:$2 sm:$0xff] %v2542_v56  ;;  %v2576_v56 = vld [vmem:[%s3767_s23 + $0x31c] sm:$0xf] }
 0x7bc   : > { %2548 = vst [vmem:[#allocation1 + $0x1] ss:$2 sm:$0xff] %v2543_v62  ;;  %v2577_v62 = vld [vmem:[%s3767_s23 + $0x71c] sm:$0xf]  ;;  %v2578_v16 = vmul.f32 %v2576_v56, %v2576_v56  ;;  %v2600_v56 = vld [vmem:[%s3767_s23 + $0x324] sm:$0xf] }
 0x7bd   : > { %v2579_v2 = vmul.f32 %v2577_v62, %v2577_v62 }
 0x7c3   : > { %v4568_v53 = vld.sshfl [vmem:[#allocation1] sm:$0xff pattern:$0x75316420] }
 0x7c4   : > { %5251 = vst [vmem:[#allocation156_spill] sm:$0xff] %v4568_v53  ;;  %v2589_v53 = vld [vmem:[%s3767_s23 + $0x720] sm:$0xf] }
 0x7c5   : > { %2558 = vst [vmem:[#allocation1] ss:$2 sm:$0xff] %v2554_v21  ;;  %v187_v21 = vld [vmem:[%s3776_s21] sm:$0xff] }
 0x7c6   : > { %2560 = vst [vmem:[#allocation1 + $0x1] ss:$2 sm:$0xff] %v2555_v22  ;;  %v2588_v22 = vld [vmem:[%s3767_s23 + $0x320] sm:$0xf]  ;;  %v199_v35 = vadd.f32 %v3784_v9, %v187_v21  ;;  %v2602_v21 = vmul.f32 %v2600_v56, %v2600_v56  ;;  %v2625_v56 = vld [vmem:[%s3767_s23 + $0x72c] sm:$0xf] }
 0x7c7   : > { %v2590_v37 = vmul.f32 %v2588_v22, %v2588_v22 }
 0x7cd   : > { %v4572_v25 = vld.sshfl [vmem:[#allocation1] sm:$0xff pattern:$0x75316420] }
 0x7ce   : > { %5252 = vst [vmem:[#allocation157_spill] sm:$0xff] %v4572_v25  ;;  %v211_v25 = vadd.f32 %v3788_v14, %v199_v35  ;;  %v2613_v35 = vld [vmem:[%s3767_s23 + $0x728] sm:$0xf] }
 0x7cf   : > { %2570 = vst [vmem:[#allocation1] ss:$2 sm:$0xff] %v2566_v43  ;;  %v2591_v43 = vmul.f32 %v2589_v53, %v2589_v53 }
 0x7d0   : > { %2572 = vst [vmem:[#allocation1 + $0x1] ss:$2 sm:$0xff] %v2567_v46  ;;  %v223_v46 = vadd.f32 %v3792_v19, %v211_v25  ;;  %v2612_v25 = vld [vmem:[%s3767_s23 + $0x328] sm:$0xf] }
 0x7d7   : > { %v4576_v7 = vld.sshfl [vmem:[#allocation1] sm:$0xff pattern:$0x75316420] }
 0x7d8   : > { %2582 = vst [vmem:[#allocation1] ss:$2 sm:$0xff] %v2578_v16  ;;  %v235_v16 = vadd.f32 %v3796_v24, %v223_v46 }
 0x7d9   : > { %2584 = vst [vmem:[#allocation1 + $0x1] ss:$2 sm:$0xff] %v2579_v2  ;;  %v2601_v2 = vld [vmem:[%s3767_s23 + $0x724] sm:$0xf] }
 0x7da   : > { %v247_v62 = vadd.f32 %v3800_v29, %v235_v16  ;;  %v2603_v22 = vmul.f32 %v2601_v2, %v2601_v2  ;;  %v2624_v16 = vld [vmem:[%s3767_s23 + $0x32c] sm:$0xf]  ;;  %v2627_v2 = vmul.f32 %v2625_v56, %v2625_v56  ;;  %v2672_v56 = vld [vmem:[%s3767_s23 + $0x33c] sm:$0xf] }
 0x7dc   : > { %v259_v9 = vadd.f32 %v3804_v34, %v247_v62  ;;  %v2626_v62 = vmul.f32 %v2624_v16, %v2624_v16 }
 0x7de   : > { %v271_v14 = vadd.f32 %v3808_v39, %v259_v9 }
 0x7e0   : > { %v4584_v6 = vld.sshfl [vmem:[#allocation1] sm:$0xff pattern:$0x75316420]  ;;  %v283_v19 = vadd.f32 %v3812_v44, %v271_v14 }
 0x7e1   : > { %2594 = vst [vmem:[#allocation1] ss:$2 sm:$0xff] %v2590_v37  ;;  %v2614_v37 = vmul.f32 %v2612_v25, %v2612_v25  ;;  %v2648_v25 = vld [vmem:[%s3767_s23 + $0x334] sm:$0xf] }
 0x7e2   : > { %2596 = vst [vmem:[#allocation1 + $0x1] ss:$2 sm:$0xff] %v2591_v43  ;;  %v295_v24 = vadd.f32 %v3816_v49, %v283_v19  ;;  %v2615_v43 = vmul.f32 %v2613_v35, %v2613_v35  ;;  %v2649_v35 = vld [vmem:[%s3767_s23 + $0x734] sm:$0xf] }
 0x7e4   : > { %v307_v29 = vadd.f32 %v3820_v54, %v295_v24 }
 0x7e6   : > { %v319_v34 = vadd.f32 %v3824_v59, %v307_v29  ;;  %v2650_v29 = vmul.f32 %v2648_v25, %v2648_v25  ;;  %v2708_v25 = vld [vmem:[%s3767_s23 + $0x348] sm:$0xf] }
 0x7e8   : > { %v331_v39 = vadd.f32 %v3828_v0, %v319_v34 }
 0x7e9   : > { %v4592_v53 = vld.sshfl [vmem:[#allocation1] sm:$0xff pattern:$0x75316420] }
 0x7ea   : > { %2606 = vst [vmem:[#allocation1] ss:$2 sm:$0xff] %v2602_v21  ;;  %v343_v44 = vadd.f32 %v3832_v5, %v331_v39  ;;  %v2636_v21 = vld [vmem:[%s3767_s23 + $0x330] sm:$0xf]  ;;  %v2661_v39 = vld [vmem:[%s3767_s23 + $0x738] sm:$0xf] }
 0x7eb   : > { %2608 = vst [vmem:[#allocation1 + $0x1] ss:$2 sm:$0xff] %v2603_v22  ;;  %v2637_v22 = vld [vmem:[%s3767_s23 + $0x730] sm:$0xf]  ;;  %v2638_v14 = vmul.f32 %v2636_v21, %v2636_v21  ;;  %v2663_v16 = vmul.f32 %v2661_v39, %v2661_v39 }
 0x7ec   : > { %v355_v49 = vadd.f32 %v3836_v11, %v343_v44  ;;  %v2639_v19 = vmul.f32 %v2637_v22, %v2637_v22 }
 0x7ee   : > { %v367_v54 = vadd.f32 %v3840_v17, %v355_v49 }
 0x7f0   : > { %v379_v59 = vadd.f32 %v3844_v23, %v367_v54  ;;  %v2673_v54 = vld [vmem:[%s3767_s23 + $0x73c] sm:$0xf] }
 0x7f2   : > { %v4601_v46 = vld.sshfl [vmem:[#allocation1] sm:$0xff pattern:$0x75316420]  ;;  %v391_v0 = vadd.f32 %v3848_v30, %v379_v59 }
 0x7f3   : > { %2618 = vst [vmem:[#allocation1] ss:$2 sm:$0xff] %v2614_v37  ;;  %v2651_v37 = vmul.f32 %v2649_v35, %v2649_v35  ;;  %v2710_v35 = vmul.f32 %v2708_v25, %v2708_v25  ;;  %v5266_v25 = vld [vmem:[#allocation23_spill] sm:$0xff] }
 0x7f4   : > { %2620 = vst [vmem:[#allocation1 + $0x1] ss:$2 sm:$0xff] %v2615_v43  ;;  %v403_v5 = vadd.f32 %v3852_v36, %v391_v0  ;;  %v2660_v43 = vld [vmem:[%s3767_s23 + $0x338] sm:$0xf]  ;;  %v2684_v0 = vld [vmem:[%s3767_s23 + $0x340] sm:$0xf] }
 0x7f5   : > { %v2662_v44 = vmul.f32 %v2660_v43, %v2660_v43  ;;  %v2686_v21 = vmul.f32 %v2684_v0, %v2684_v0  ;;  %v2744_v0 = vld [vmem:[%s3767_s23 + $0x354] sm:$0xf] }
 0x7f6   : > { %v415_v11 = vadd.f32 %v3856_v42, %v403_v5  ;;  %v2685_v5 = vld [vmem:[%s3767_s23 + $0x740] sm:$0xf] }
 0x7f7   : > { %v2687_v22 = vmul.f32 %v2685_v5, %v2685_v5  ;;  %v5261_v5 = vld [vmem:[#allocation18_spill] sm:$0xff] }
 0x7f8   : > { %v427_v17 = vadd.f32 %v3860_v48, %v415_v11 }
 0x7fa   : > { %v439_v23 = vadd.f32 %v3864_v55, %v427_v17  ;;  %v2697_v17 = vld [vmem:[%s3767_s23 + $0x744] sm:$0xf] }
 0x7fb   : > { %v4609_v9 = vld.sshfl [vmem:[#allocation1] sm:$0xff pattern:$0x75316420] }
 0x7fc   : > { %2630 = vst [vmem:[#allocation1] ss:$2 sm:$0xff] %v2626_v62  ;;  %v451_v30 = vadd.f32 %v3868_v61, %v439_v23  ;;  %v2674_v62 = vmul.f32 %v2672_v56, %v2672_v56  ;;  %v2699_v23 = vmul.f32 %v2697_v17, %v2697_v17 }
 0x7fd   : > { %2632 = vst [vmem:[#allocation1 + $0x1] ss:$2 sm:$0xff] %v2627_v2  ;;  %v2675_v2 = vmul.f32 %v2673_v54, %v2673_v54 }
 0x7fe   : > { %v463_v36 = vadd.f32 %v3872_v3, %v451_v30 }
 0x800   : > { %v475_v42 = vadd.f32 %v3876_v10, %v463_v36  ;;  %v2709_v36 = vld [vmem:[%s3767_s23 + $0x748] sm:$0xf] }
 0x802   : > { %v487_v48 = vadd.f32 %v3880_v18, %v475_v42  ;;  %v2711_v42 = vmul.f32 %v2709_v36, %v2709_v36 }
 0x804   : > { %v4618_v24 = vld.sshfl [vmem:[#allocation1] sm:$0xff pattern:$0x75316420]  ;;  %v499_v55 = vadd.f32 %v3884_v26, %v487_v48  ;;  %v2721_v48 = vld [vmem:[%s3767_s23 + $0x74c] sm:$0xf] }
 0x805   : > { %2642 = vst [vmem:[#allocation1] ss:$2 sm:$0xff] %v2638_v14  ;;  %v2696_v14 = vld [vmem:[%s3767_s23 + $0x344] sm:$0xf]  ;;  %v2723_v43 = vmul.f32 %v2721_v48, %v2721_v48 }
 0x806   : > { %2644 = vst [vmem:[#allocation1 + $0x1] ss:$2 sm:$0xff] %v2639_v19  ;;  %v511_v61 = vadd.f32 %v3888_v33, %v499_v55  ;;  %v2698_v19 = vmul.f32 %v2696_v14, %v2696_v14  ;;  %v5253_v55 = vld [vmem:[#allocation10_spill] sm:$0xff]  ;;  %v5263_v14 = vld [vmem:[#allocation20_spill] sm:$0xff] }
 0x808   : > { %v523_v3 = vadd.f32 %v3892_v41, %v511_v61 }
 0x80a   : > { %v535_v10 = vadd.f32 %v3896_v50, %v523_v3 }
 0x80c   : > { %v547_v18 = vadd.f32 %v3900_v57, %v535_v10 }
 0x80d   : > { %v4626_v34 = vld.sshfl [vmem:[#allocation1] sm:$0xff pattern:$0x75316420] }
 0x80e   : > { %2654 = vst [vmem:[#allocation1] ss:$2 sm:$0xff] %v2650_v29  ;;  %v559_v26 = vadd.f32 %v3904_v1, %v547_v18  ;;  %v2733_v18 = vld [vmem:[%s3767_s23 + $0x750] sm:$0xf] }
 0x80f   : > { %2656 = vst [vmem:[#allocation1 + $0x1] ss:$2 sm:$0xff] %v2651_v37  ;;  %v2720_v37 = vld [vmem:[%s3767_s23 + $0x34c] sm:$0xf] }
 0x810   : > { %v571_v33 = vadd.f32 %v3908_v8, %v559_v26  ;;  %v2722_v61 = vmul.f32 %v2720_v37, %v2720_v37 }
 0x812   : > { %v583_v41 = vadd.f32 %v3912_v20, %v571_v33  ;;  %v5258_v33 = vld [vmem:[#allocation15_spill] sm:$0xff] }
 0x814   : > { %v595_v50 = vadd.f32 %v3916_v28, %v583_v41  ;;  %v2735_v41 = vmul.f32 %v2733_v18, %v2733_v18  ;;  %v5273_v18 = vld [vmem:[#allocation30_spill] sm:$0xff] }
 0x816   : > { %v4635_v49 = vld.sshfl [vmem:[#allocation1] sm:$0xff pattern:$0x75316420]  ;;  %v607_v57 = vadd.f32 %v3920_v38, %v595_v50 }
 0x817   : > { %2666 = vst [vmem:[#allocation1] ss:$2 sm:$0xff] %v2662_v44 }
 0x818   : > { %2668 = vst [vmem:[#allocation1 + $0x1] ss:$2 sm:$0xff] %v2663_v16  ;;  %v619_v1 = vadd.f32 %v3924_v47, %v607_v57  ;;  %v2732_v16 = vld [vmem:[%s3767_s23 + $0x350] sm:$0xf]  ;;  %v5260_v57 = vld [vmem:[#allocation17_spill] sm:$0xff] }
 0x819   : > { %v2734_v56 = vmul.f32 %v2732_v16, %v2732_v16 }
 0x81a   : > { %v631_v8 = vadd.f32 %v3928_v58, %v619_v1 }
 0x81c   : > { %v643_v20 = vadd.f32 %v3932_v4, %v631_v8 }
 0x81e   : > { %v655_v28 = vadd.f32 %v3936_v15, %v643_v20  ;;  %v5262_v20 = vld [vmem:[#allocation19_spill] sm:$0xff] }
 0x81f   : > { %v4643_v59 = vld.sshfl [vmem:[#allocation1] sm:$0xff pattern:$0x75316420] }
 0x820   : > { %2678 = vst [vmem:[#allocation1] ss:$2 sm:$0xff] %v2674_v62  ;;  %v667_v38 = vadd.f32 %v3940_v27, %v655_v28  ;;  %v5259_v62 = vld [vmem:[#allocation16_spill] sm:$0xff]  ;;  %v2746_v28 = vmul.f32 %v2744_v0, %v2744_v0 }
 0x821   : > { %2680 = vst [vmem:[#allocation1 + $0x1] ss:$2 sm:$0xff] %v2675_v2 }
 0x822   : > { %v679_v47 = vadd.f32 %v3944_v40, %v667_v38 }
 0x824   : > { %v691_v58 = vadd.f32 %v3948_v52, %v679_v47 }
 0x826   : > { %v703_v4 = vadd.f32 %v3952_v63, %v691_v58  ;;  %v5264_v58 = vld [vmem:[#allocation21_spill] sm:$0xff] }
 0x828   : > { %v4652_v11 = vld.sshfl [vmem:[#allocation1] sm:$0xff pattern:$0x75316420]  ;;  %v715_v15 = vadd.f32 %v3956_v13, %v703_v4 }
 0x829   : > { %2690 = vst [vmem:[#allocation1] ss:$2 sm:$0xff] %v2686_v21  ;;  %v2745_v21 = vld [vmem:[%s3767_s23 + $0x754] sm:$0xf] }
 0x82a   : > { %2692 = vst [vmem:[#allocation1 + $0x1] ss:$2 sm:$0xff] %v2687_v22  ;;  %v727_v27 = vadd.f32 %v3960_v31, %v715_v15  ;;  %v2747_v38 = vmul.f32 %v2745_v21, %v2745_v21  ;;  %v2756_v15 = vld [vmem:[%s3767_s23 + $0x358] sm:$0xf] }
 0x82c   : > { %v739_v40 = vadd.f32 %v3964_v45, %v727_v27  ;;  %v2757_v27 = vld [vmem:[%s3767_s23 + $0x758] sm:$0xf] }
 0x82e   : > { %v751_v52 = vadd.f32 %v3968_v60, %v739_v40  ;;  %v5254_v60 = vld [vmem:[#allocation11_spill] sm:$0xff]  ;;  %v2758_v40 = vmul.f32 %v2756_v15, %v2756_v15  ;;  %v5281_v15 = vld [vmem:[#allocation38_spill] sm:$0xff] }
 0x830   : > { %v763_v63 = vadd.f32 %v3972_v12, %v751_v52  ;;  %v5255_v12 = vld [vmem:[#allocation12_spill] sm:$0xff] }
 0x831   : > { %v4660_v30 = vld.sshfl [vmem:[#allocation1] sm:$0xff pattern:$0x75316420] }
 0x832   : > { %2702 = vst [vmem:[#allocation1] ss:$2 sm:$0xff] %v2698_v19  ;;  %v775_v13 = vadd.f32 %v3976_v32, %v763_v63  ;;  %v5256_v32 = vld [vmem:[#allocation13_spill] sm:$0xff] }
 0x833   : > { %2704 = vst [vmem:[#allocation1 + $0x1] ss:$2 sm:$0xff] %v2699_v23  ;;  %v5265_v23 = vld [vmem:[#allocation22_spill] sm:$0xff]  ;;  %v5268_v63 = vld [vmem:[#allocation25_spill] sm:$0xff] }
 0x834   : > { %v787_v31 = vadd.f32 %v3980_v51, %v775_v13  ;;  %v5257_v51 = vld [vmem:[#allocation14_spill] sm:$0xff] }
 0x836   : > { %v799_v45 = vadd.f32 %v5253_v55, %v787_v31  ;;  %v5269_v31 = vld [vmem:[#allocation26_spill] sm:$0xff]  ;;  %v2768_v55 = vld [vmem:[%s3767_s23 + $0x35c] sm:$0xf] }
 0x838   : > { %v811_v39 = vadd.f32 %v5254_v60, %v799_v45  ;;  %v5270_v45 = vld [vmem:[#allocation27_spill] sm:$0xff]  ;;  %v5271_v60 = vld [vmem:[#allocation28_spill] sm:$0xff] }
 0x83a   : > { %v4669_v29 = vld.sshfl [vmem:[#allocation1] sm:$0xff pattern:$0x75316420]  ;;  %v823_v44 = vadd.f32 %v5255_v12, %v811_v39  ;;  %v2770_v12 = vmul.f32 %v2768_v55, %v2768_v55  ;;  %v5285_v55 = vld [vmem:[#allocation42_spill] sm:$0xff] }
 0x83b   : > { %2714 = vst [vmem:[#allocation1] ss:$2 sm:$0xff] %v2710_v35  ;;  %v5267_v35 = vld [vmem:[#allocation24_spill] sm:$0xff] }
 0x83c   : > { %2716 = vst [vmem:[#allocation1 + $0x1] ss:$2 sm:$0xff] %v2711_v42  ;;  %v835_v10 = vadd.f32 %v5256_v32, %v823_v44  ;;  %v2759_v42 = vmul.f32 %v2757_v27, %v2757_v27  ;;  %v5272_v32 = vld [vmem:[#allocation29_spill] sm:$0xff] }
 0x83e   : > { %v847_v26 = vadd.f32 %v5257_v51, %v835_v10 }
 0x840   : > { %v859_v54 = vadd.f32 %v5258_v33, %v847_v26  ;;  %v5274_v26 = vld [vmem:[#allocation31_spill] sm:$0xff]  ;;  %v2780_v33 = vld [vmem:[%s3767_s23 + $0x360] sm:$0xf] }
 0x842   : > { %v871_v2 = vadd.f32 %v5259_v62, %v859_v54  ;;  %v2781_v54 = vld [vmem:[%s3767_s23 + $0x760] sm:$0xf] }
 0x843   : > { %v4677_v3 = vld.sshfl [vmem:[#allocation1] sm:$0xff pattern:$0x75316420]  ;;  %v2783_v0 = vmul.f32 %v2781_v54, %v2781_v54 }
 0x844   : > { %2726 = vst [vmem:[#allocation1] ss:$2 sm:$0xff] %v2722_v61  ;;  %v883_v1 = vadd.f32 %v5260_v57, %v871_v2  ;;  %v2782_v2 = vmul.f32 %v2780_v33, %v2780_v33  ;;  %v5276_v57 = vld [vmem:[#allocation33_spill] sm:$0xff] }
 0x845   : > { %2728 = vst [vmem:[#allocation1 + $0x1] ss:$2 sm:$0xff] %v2723_v43  ;;  %v2769_v43 = vld [vmem:[%s3767_s23 + $0x75c] sm:$0xf] }
 0x846   : > { %v895_v8 = vadd.f32 %v5261_v5, %v883_v1  ;;  %v2771_v44 = vmul.f32 %v2769_v43, %v2769_v43  ;;  %v5277_v5 = vld [vmem:[#allocation34_spill] sm:$0xff]  ;;  %v5286_v43 = vld [vmem:[#allocation43_spill] sm:$0xff] }
 0x848   : > { %v907_v22 = vadd.f32 %v5262_v20, %v895_v8  ;;  %v5278_v20 = vld [vmem:[#allocation35_spill] sm:$0xff] }
 0x84a   : > { %v919_v47 = vadd.f32 %v5263_v14, %v907_v22 }
 0x84c   : > { %v4686_v50 = vld.sshfl [vmem:[#allocation1] sm:$0xff pattern:$0x75316420]  ;;  %v931_v19 = vadd.f32 %v5264_v58, %v919_v47  ;;  %v2793_v47 = vld [vmem:[%s3767_s23 + $0x764] sm:$0xf]  ;;  %v5280_v58 = vld [vmem:[#allocation37_spill] sm:$0xff] }
 0x84d   : > { %2738 = vst [vmem:[#allocation1] ss:$2 sm:$0xff] %v2734_v56 }
 0x84e   : > { %2740 = vst [vmem:[#allocation1 + $0x1] ss:$2 sm:$0xff] %v2735_v41  ;;  %v943_v4 = vadd.f32 %v5265_v23, %v931_v19  ;;  %v5275_v41 = vld [vmem:[#allocation32_spill] sm:$0xff] }
 0x850   : > { %v955_v36 = vadd.f32 %v5266_v25, %v943_v4  ;;  %v2795_v4 = vmul.f32 %v2793_v47, %v2793_v47 }
 0x852   : > { %v967_v52 = vadd.f32 %v5267_v35, %v955_v36  ;;  %v5282_v36 = vld [vmem:[#allocation39_spill] sm:$0xff]  ;;  %v5283_v35 = vld [vmem:[#allocation40_spill] sm:$0xff] }
 0x854   : > { %v979_v13 = vadd.f32 %v5268_v63, %v967_v52  ;;  %v2805_v63 = vld [vmem:[%s3767_s23 + $0x768] sm:$0xf] }
 0x855   : > { %v4694_v17 = vld.sshfl [vmem:[#allocation1] sm:$0xff pattern:$0x75316420] }
 0x856   : > { %2750 = vst [vmem:[#allocation1] ss:$2 sm:$0xff] %v2746_v28  ;;  %v991_v48 = vadd.f32 %v5269_v31, %v979_v13  ;;  %v2792_v28 = vld [vmem:[%s3767_s23 + $0x364] sm:$0xf]  ;;  %v5284_v13 = vld [vmem:[#allocation41_spill] sm:$0xff] }
 0x857   : > { %2752 = vst [vmem:[#allocation1 + $0x1] ss:$2 sm:$0xff] %v2747_v38  ;;  %v5279_v38 = vld [vmem:[#allocation36_spill] sm:$0xff]  ;;  %v2794_v23 = vmul.f32 %v2792_v28, %v2792_v28 }
 0x858   : > { %v1003_v61 = vadd.f32 %v5270_v45, %v991_v48 }
 0x85a   : > { %v1015_v39 = vadd.f32 %v5271_v60, %v1003_v61  ;;  %v2807_v61 = vmul.f32 %v2805_v63, %v2805_v63 }
 0x85c   : > { %v1027_v10 = vadd.f32 %v5272_v32, %v1015_v39  ;;  %v2816_v32 = vld [vmem:[%s3767_s23 + $0x36c] sm:$0xf] }
 0x85d   : > { %v2818_v33 = vmul.f32 %v2816_v32, %v2816_v32  ;;  %v2853_v32 = vld [vmem:[%s3767_s23 + $0x778] sm:$0xf] }
 0x85e   : > { %v4703_v37 = vld.sshfl [vmem:[#allocation1] sm:$0xff pattern:$0x75316420]  ;;  %v1039_v51 = vadd.f32 %v5273_v18, %v1027_v10  ;;  %v5288_v10 = vld [vmem:[#allocation45_spill] sm:$0xff] }
 0x85f   : > { %2762 = vst [vmem:[#allocation1] ss:$2 sm:$0xff] %v2758_v40 }
 0x860   : > { %2764 = vst [vmem:[#allocation1 + $0x1] ss:$2 sm:$0xff] %v2759_v42  ;;  %v1051_v56 = vadd.f32 %v5274_v26, %v1039_v51  ;;  %v2804_v42 = vld [vmem:[%s3767_s23 + $0x368] sm:$0xf]  ;;  %v2817_v51 = vld [vmem:[%s3767_s23 + $0x76c] sm:$0xf] }
 0x861   : > { %v2806_v48 = vmul.f32 %v2804_v42, %v2804_v42  ;;  %v5289_v26 = vld [vmem:[#allocation46_spill] sm:$0xff]  ;;  %v2819_v54 = vmul.f32 %v2817_v51, %v2817_v51  ;;  %v5298_v42 = vld [vmem:[#allocation55_spill] sm:$0xff] }
 0x862   : > { %v1063_v62 = vadd.f32 %v5275_v41, %v1051_v56  ;;  %v5290_v41 = vld [vmem:[#allocation47_spill] sm:$0xff] }
 0x864   : > { %v1075_v1 = vadd.f32 %v5276_v57, %v1063_v62  ;;  %v5291_v57 = vld [vmem:[#allocation48_spill] sm:$0xff] }
 0x866   : > { %v1087_v8 = vadd.f32 %v5277_v5, %v1075_v1 }
 0x867   : > { %v4711_v16 = vld.sshfl [vmem:[#allocation1] sm:$0xff pattern:$0x75316420] }
 0x868   : > { %2774 = vst [vmem:[#allocation1] ss:$2 sm:$0xff] %v2770_v12  ;;  %v1099_v22 = vadd.f32 %v5278_v20, %v1087_v8  ;;  %v5287_v12 = vld [vmem:[#allocation44_spill] sm:$0xff]  ;;  %v2828_v8 = vld [vmem:[%s3767_s23 + $0x370] sm:$0xf] }
 0x869   : > { %2776 = vst [vmem:[#allocation1 + $0x1] ss:$2 sm:$0xff] %v2771_v44  ;;  %v2829_v20 = vld [vmem:[%s3767_s23 + $0x770] sm:$0xf] }
 0x86a   : > { %v1111_v14 = vadd.f32 %v5279_v38, %v1099_v22  ;;  %v5293_v22 = vld [vmem:[#allocation50_spill] sm:$0xff]  ;;  %v2830_v38 = vmul.f32 %v2828_v8, %v2828_v8 }
 0x86c   : > { %v1123_v19 = vadd.f32 %v5280_v58, %v1111_v14  ;;  %v5294_v14 = vld [vmem:[#allocation51_spill] sm:$0xff]  ;;  %v2831_v58 = vmul.f32 %v2829_v20, %v2829_v20 }
 0x86d   : > { %v2865_v20 = vld [vmem:[%s3767_s23 + $0x77c] sm:$0xf] }
 0x86e   : > { %v1135_v27 = vadd.f32 %v5281_v15, %v1123_v19  ;;  %v5295_v19 = vld [vmem:[#allocation52_spill] sm:$0xff]  ;;  %v5296_v15 = vld [vmem:[#allocation53_spill] sm:$0xff] }
 0x870   : > { %v4720_v21 = vld.sshfl [vmem:[#allocation1] sm:$0xff pattern:$0x75316420]  ;;  %v1147_v40 = vadd.f32 %v5282_v36, %v1135_v27  ;;  %v2840_v36 = vld [vmem:[%s3767_s23 + $0x374] sm:$0xf] }
 0x871   : > { %2786 = vst [vmem:[#allocation1] ss:$2 sm:$0xff] %v2782_v2 }
 0x872   : > { %2788 = vst [vmem:[#allocation1 + $0x1] ss:$2 sm:$0xff] %v2783_v0  ;;  %v1159_v52 = vadd.f32 %v5283_v35, %v1147_v40  ;;  %v5292_v0 = vld [vmem:[#allocation49_spill] sm:$0xff]  ;;  %v5297_v40 = vld [vmem:[#allocation54_spill] sm:$0xff] }
 0x874   : > { %v1171_v31 = vadd.f32 %v5284_v13, %v1159_v52  ;;  %v2841_v52 = vld [vmem:[%s3767_s23 + $0x774] sm:$0xf]  ;;  %v2842_v13 = vmul.f32 %v2840_v36, %v2840_v36 }
 0x876   : > { %v1183_v45 = vadd.f32 %v5285_v55, %v1171_v31  ;;  %v2843_v31 = vmul.f32 %v2841_v52, %v2841_v52  ;;  %v5311_v52 = vld [vmem:[#allocation68_spill] sm:$0xff] }
 0x878   : > { %v1195_v60 = vadd.f32 %v5286_v43, %v1183_v45 }
 0x879   : > { %v4728_v25 = vld.sshfl [vmem:[#allocation1] sm:$0xff pattern:$0x75316420] }
 0x87a   : > { %2798 = vst [vmem:[#allocation1] ss:$2 sm:$0xff] %v2794_v23  ;;  %v1207_v44 = vadd.f32 %v5287_v12, %v1195_v60  ;;  %v5301_v60 = vld [vmem:[#allocation58_spill] sm:$0xff] }
 0x87b   : > { %2800 = vst [vmem:[#allocation1 + $0x1] ss:$2 sm:$0xff] %v2795_v4 }
 0x87c   : > { %v1219_v18 = vadd.f32 %v5288_v10, %v1207_v44  ;;  %v2852_v44 = vld [vmem:[%s3767_s23 + $0x378] sm:$0xf] }
 0x87d   : > { %v5302_v10 = vld [vmem:[#allocation59_spill] sm:$0xff]  ;;  %v2854_v51 = vmul.f32 %v2852_v44, %v2852_v44  ;;  %v2888_v44 = vld [vmem:[%s3767_s23 + $0x384] sm:$0xf] }
 0x87e   : > { %v1231_v56 = vadd.f32 %v5289_v26, %v1219_v18  ;;  %v5303_v26 = vld [vmem:[#allocation60_spill] sm:$0xff] }
 0x880   : > { %v1243_v62 = vadd.f32 %v5290_v41, %v1231_v56 }
 0x882   : > { %v4737_v39 = vld.sshfl [vmem:[#allocation1] sm:$0xff pattern:$0x75316420]  ;;  %v1255_v1 = vadd.f32 %v5291_v57, %v1243_v62  ;;  %v5305_v57 = vld [vmem:[#allocation62_spill] sm:$0xff] }
 0x883   : > { %2810 = vst [vmem:[#allocation1] ss:$2 sm:$0xff] %v2806_v48  ;;  %v5299_v48 = vld [vmem:[#allocation56_spill] sm:$0xff] }
 0x884   : > { %2812 = vst [vmem:[#allocation1 + $0x1] ss:$2 sm:$0xff] %v2807_v61  ;;  %v1267_v5 = vadd.f32 %v5292_v0, %v1255_v1  ;;  %v5300_v61 = vld [vmem:[#allocation57_spill] sm:$0xff]  ;;  %v2864_v0 = vld [vmem:[%s3767_s23 + $0x37c] sm:$0xf] }
 0x886   : > { %v1279_v28 = vadd.f32 %v5293_v22, %v1267_v5  ;;  %v5306_v5 = vld [vmem:[#allocation63_spill] sm:$0xff]  ;;  %v5307_v22 = vld [vmem:[#allocation64_spill] sm:$0xff] }
 0x888   : > { %v1291_v47 = vadd.f32 %v5294_v14, %v1279_v28  ;;  %v2867_v14 = vmul.f32 %v2865_v20, %v2865_v20  ;;  %v2900_v20 = vld [vmem:[%s3767_s23 + $0x388] sm:$0xf] }
 0x88a   : > { %v1303_v23 = vadd.f32 %v5295_v19, %v1291_v47  ;;  %v5308_v47 = vld [vmem:[#allocation65_spill] sm:$0xff] }
 0x88b   : > { %v4745_v2 = vld.sshfl [vmem:[#allocation1] sm:$0xff pattern:$0x75316420] }
 0x88c   : > { %2822 = vst [vmem:[#allocation1] ss:$2 sm:$0xff] %v2818_v33  ;;  %v1315_v27 = vadd.f32 %v5296_v15, %v1303_v23  ;;  %v2855_v33 = vmul.f32 %v2853_v32, %v2853_v32  ;;  %v5309_v23 = vld [vmem:[#allocation66_spill] sm:$0xff]  ;;  %v5315_v32 = vld [vmem:[#allocation72_spill] sm:$0xff] }
 0x88d   : > { %2824 = vst [vmem:[#allocation1 + $0x1] ss:$2 sm:$0xff] %v2819_v54  ;;  %v5304_v54 = vld [vmem:[#allocation61_spill] sm:$0xff] }
 0x88e   : > { %v1327_v35 = vadd.f32 %v5297_v40, %v1315_v27  ;;  %v5310_v27 = vld [vmem:[#allocation67_spill] sm:$0xff]  ;;  %v2876_v40 = vld [vmem:[%s3767_s23 + $0x380] sm:$0xf] }
 0x890   : > { %v1339_v63 = vadd.f32 %v5298_v42, %v1327_v35  ;;  %v2877_v35 = vld [vmem:[%s3767_s23 + $0x780] sm:$0xf] }
 0x892   : > { %v1351_v55 = vadd.f32 %v5299_v48, %v1339_v63  ;;  %v2878_v63 = vmul.f32 %v2876_v40, %v2876_v40  ;;  %v2879_v48 = vmul.f32 %v2877_v35, %v2877_v35  ;;  %v5323_v40 = vld [vmem:[#allocation80_spill] sm:$0xff] }
 0x894   : > { %v4754_v4 = vld.sshfl [vmem:[#allocation1] sm:$0xff pattern:$0x75316420]  ;;  %v1363_v43 = vadd.f32 %v5300_v61, %v1351_v55  ;;  %v5313_v55 = vld [vmem:[#allocation70_spill] sm:$0xff] }
 0x895   : > { %2834 = vst [vmem:[#allocation1] ss:$2 sm:$0xff] %v2830_v38  ;;  %v2866_v38 = vmul.f32 %v2864_v0, %v2864_v0 }
 0x896   : > { %2836 = vst [vmem:[#allocation1 + $0x1] ss:$2 sm:$0xff] %v2831_v58  ;;  %v1375_v12 = vadd.f32 %v5301_v60, %v1363_v43  ;;  %v5314_v60 = vld [vmem:[#allocation71_spill] sm:$0xff] }
 0x898   : > { %v1387_v18 = vadd.f32 %v5302_v10, %v1375_v12 }
 0x89a   : > { %v1399_v56 = vadd.f32 %v5303_v26, %v1387_v18  ;;  %v2889_v18 = vld [vmem:[%s3767_s23 + $0x784] sm:$0xf] }
 0x89c   : > { %v1411_v41 = vadd.f32 %v5304_v54, %v1399_v56  ;;  %v2890_v56 = vmul.f32 %v2888_v44, %v2888_v44  ;;  %v5317_v54 = vld [vmem:[#allocation74_spill] sm:$0xff] }
 0x89d   : > { %v4762_v45 = vld.sshfl [vmem:[#allocation1] sm:$0xff pattern:$0x75316420] }
 0x89e   : > { %2846 = vst [vmem:[#allocation1] ss:$2 sm:$0xff] %v2842_v13  ;;  %v1423_v1 = vadd.f32 %v5305_v57, %v1411_v41  ;;  %v5312_v13 = vld [vmem:[#allocation69_spill] sm:$0xff] }
 0x89f   : > { %2848 = vst [vmem:[#allocation1 + $0x1] ss:$2 sm:$0xff] %v2843_v31 }
 0x8a0   : > { %v1435_v8 = vadd.f32 %v5306_v5, %v1423_v1  ;;  %v5318_v1 = vld [vmem:[#allocation75_spill] sm:$0xff]  ;;  %v5319_v5 = vld [vmem:[#allocation76_spill] sm:$0xff] }
 0x8a2   : > { %v1447_v28 = vadd.f32 %v5307_v22, %v1435_v8  ;;  %v2901_v22 = vld [vmem:[%s3767_s23 + $0x788] sm:$0xf] }
 0x8a4   : > { %v1459_v58 = vadd.f32 %v5308_v47, %v1447_v28  ;;  %v5320_v28 = vld [vmem:[#allocation77_spill] sm:$0xff]  ;;  %v5321_v47 = vld [vmem:[#allocation78_spill] sm:$0xff] }
 0x8a6   : > { %v4771_v62 = vld.sshfl [vmem:[#allocation1] sm:$0xff pattern:$0x75316420]  ;;  %v1471_v15 = vadd.f32 %v5309_v23, %v1459_v58  ;;  %v2903_v23 = vmul.f32 %v2901_v22, %v2901_v22 }
 0x8a7   : > { %2858 = vst [vmem:[#allocation1] ss:$2 sm:$0xff] %v2854_v51  ;;  %v5316_v51 = vld [vmem:[#allocation73_spill] sm:$0xff] }
 0x8a8   : > { %2860 = vst [vmem:[#allocation1 + $0x1] ss:$2 sm:$0xff] %v2855_v33  ;;  %v1483_v36 = vadd.f32 %v5310_v27, %v1471_v15  ;;  %v2891_v33 = vmul.f32 %v2889_v18, %v2889_v18  ;;  %v5322_v15 = vld [vmem:[#allocation79_spill] sm:$0xff]  ;;  %v5328_v18 = vld [vmem:[#allocation85_spill] sm:$0xff] }
 0x8aa   : > { %v1495_v42 = vadd.f32 %v5311_v52, %v1483_v36  ;;  %v2912_v52 = vld [vmem:[%s3767_s23 + $0x38c] sm:$0xf] }
 0x8ac   : > { %v1507_v31 = vadd.f32 %v5312_v13, %v1495_v42  ;;  %v5324_v42 = vld [vmem:[#allocation81_spill] sm:$0xff] }
 0x8ad   : > { %v2913_v13 = vld [vmem:[%s3767_s23 + $0x78c] sm:$0xf] }
 0x8ae   : > { %v1519_v61 = vadd.f32 %v5313_v55, %v1507_v31  ;;  %v5325_v31 = vld [vmem:[#allocation82_spill] sm:$0xff]  ;;  %v2914_v55 = vmul.f32 %v2912_v52, %v2912_v52  ;;  %v5335_v52 = vld [vmem:[#allocation92_spill] sm:$0xff] }
 0x8af   : > { %v4779_v19 = vld.sshfl [vmem:[#allocation1] sm:$0xff pattern:$0x75316420] }
 0x8b0   : > { %2870 = vst [vmem:[#allocation1] ss:$2 sm:$0xff] %v2866_v38  ;;  %v1531_v12 = vadd.f32 %v5314_v60, %v1519_v61  ;;  %v2915_v61 = vmul.f32 %v2913_v13, %v2913_v13  ;;  %v5326_v60 = vld [vmem:[#allocation83_spill] sm:$0xff]  ;;  %v5336_v13 = vld [vmem:[#allocation93_spill] sm:$0xff] }
 0x8b1   : > { %2872 = vst [vmem:[#allocation1 + $0x1] ss:$2 sm:$0xff] %v2867_v14  ;;  %v2902_v14 = vmul.f32 %v2900_v20, %v2900_v20 }
 0x8b2   : > { %v1543_v10 = vadd.f32 %v5315_v32, %v1531_v12  ;;  %v5327_v32 = vld [vmem:[#allocation84_spill] sm:$0xff] }
 0x8b4   : > { %v1555_v26 = vadd.f32 %v5316_v51, %v1543_v10 }
 0x8b6   : > { %v1567_v41 = vadd.f32 %v5317_v54, %v1555_v26  ;;  %v2924_v26 = vld [vmem:[%s3767_s23 + $0x390] sm:$0xf] }
 0x8b8   : > { %v4788_v43 = vld.sshfl [vmem:[#allocation1] sm:$0xff pattern:$0x75316420]  ;;  %v1579_v0 = vadd.f32 %v5318_v1, %v1567_v41  ;;  %v2926_v41 = vmul.f32 %v2924_v26, %v2924_v26 }
 0x8b9   : > { %2882 = vst [vmem:[#allocation1] ss:$2 sm:$0xff] %v2878_v63  ;;  %v5330_v1 = vld [vmem:[#allocation87_spill] sm:$0xff] }
 0x8ba   : > { %2884 = vst [vmem:[#allocation1 + $0x1] ss:$2 sm:$0xff] %v2879_v48  ;;  %v1591_v8 = vadd.f32 %v5319_v5, %v1579_v0 }
 0x8bc   : > { %v1603_v38 = vadd.f32 %v5320_v28, %v1591_v8  ;;  %v5331_v8 = vld [vmem:[#allocation88_spill] sm:$0xff]  ;;  %v5332_v28 = vld [vmem:[#allocation89_spill] sm:$0xff] }
 0x8be   : > { %v1615_v58 = vadd.f32 %v5321_v47, %v1603_v38  ;;  %v5333_v47 = vld [vmem:[#allocation90_spill] sm:$0xff] }
 0x8c0   : > { %v1627_v27 = vadd.f32 %v5322_v15, %v1615_v58  ;;  %v5334_v15 = vld [vmem:[#allocation91_spill] sm:$0xff] }
 0x8c1   : > { %v4796_v57 = vld.sshfl [vmem:[#allocation1] sm:$0xff pattern:$0x75316420] }
 0x8c2   : > { %2894 = vst [vmem:[#allocation1] ss:$2 sm:$0xff] %v2890_v56  ;;  %v1639_v35 = vadd.f32 %v5323_v40, %v1627_v27  ;;  %v2925_v56 = vld [vmem:[%s3767_s23 + $0x790] sm:$0xf] }
 0x8c3   : > { %2896 = vst [vmem:[#allocation1 + $0x1] ss:$2 sm:$0xff] %v2891_v33  ;;  %v5329_v33 = vld [vmem:[#allocation86_spill] sm:$0xff]  ;;  %v2927_v5 = vmul.f32 %v2925_v56, %v2925_v56  ;;  %v5340_v56 = vld [vmem:[#allocation97_spill] sm:$0xff] }
 0x8c4   : > { %v1651_v63 = vadd.f32 %v5324_v42, %v1639_v35 }
 0x8c6   : > { %v1663_v48 = vadd.f32 %v5325_v31, %v1651_v63 }
 0x8c8   : > { %v1675_v12 = vadd.f32 %v5326_v60, %v1663_v48  ;;  %v5337_v48 = vld [vmem:[#allocation94_spill] sm:$0xff]  ;;  %v2949_v60 = vld [vmem:[%s3767_s23 + $0x798] sm:$0xf] }
 0x8c9   : > { %v2951_v26 = vmul.f32 %v2949_v60, %v2949_v60 }
 0x8ca   : > { %v4805_v36 = vld.sshfl [vmem:[#allocation1] sm:$0xff pattern:$0x75316420]  ;;  %v1687_v10 = vadd.f32 %v5327_v32, %v1675_v12 }
 0x8cb   : > { %2906 = vst [vmem:[#allocation1] ss:$2 sm:$0xff] %v2902_v14  ;;  %v2936_v14 = vld [vmem:[%s3767_s23 + $0x394] sm:$0xf]  ;;  %v5338_v12 = vld [vmem:[#allocation95_spill] sm:$0xff] }
 0x8cc   : > { %2908 = vst [vmem:[#allocation1 + $0x1] ss:$2 sm:$0xff] %v2903_v23  ;;  %v1699_v51 = vadd.f32 %v5328_v18, %v1687_v10  ;;  %v2937_v23 = vld [vmem:[%s3767_s23 + $0x794] sm:$0xf]  ;;  %v2938_v40 = vmul.f32 %v2936_v14, %v2936_v14  ;;  %v5339_v18 = vld [vmem:[#allocation96_spill] sm:$0xff] }
 0x8cd   : > { %v2939_v35 = vmul.f32 %v2937_v23, %v2937_v23 }
 0x8ce   : > { %v1711_v54 = vadd.f32 %v5329_v33, %v1699_v51 }
 0x8d0   : > { %v1723_v0 = vadd.f32 %v5330_v1, %v1711_v54 }
 0x8d2   : > { %v1735_v20 = vadd.f32 %v5331_v8, %v1723_v0  ;;  %v2960_v0 = vld [vmem:[%s3767_s23 + $0x39c] sm:$0xf] }
 0x8d3   : > { %v4813_v44 = vld.sshfl [vmem:[#allocation1] sm:$0xff pattern:$0x75316420]  ;;  %v2962_v14 = vmul.f32 %v2960_v0, %v2960_v0  ;;  %v5352_v0 = vld [vmem:[#allocation109_spill] sm:$0xff] }
 0x8d4   : > { %2918 = vst [vmem:[#allocation1] ss:$2 sm:$0xff] %v2914_v55  ;;  %v1747_v38 = vadd.f32 %v5332_v28, %v1735_v20  ;;  %v2961_v20 = vld [vmem:[%s3767_s23 + $0x79c] sm:$0xf]  ;;  %v5343_v28 = vld [vmem:[#allocation100_spill] sm:$0xff] }
 0x8d5   : > { %2920 = vst [vmem:[#allocation1 + $0x1] ss:$2 sm:$0xff] %v2915_v61  ;;  %v2948_v61 = vld [vmem:[%s3767_s23 + $0x398] sm:$0xf] }
 0x8d6   : > { %v1759_v58 = vadd.f32 %v5333_v47, %v1747_v38  ;;  %v2950_v10 = vmul.f32 %v2948_v61, %v2948_v61  ;;  %v2963_v47 = vmul.f32 %v2961_v20, %v2961_v20  ;;  %v5348_v61 = vld [vmem:[#allocation105_spill] sm:$0xff] }
 0x8d8   : > { %v1771_v27 = vadd.f32 %v5334_v15, %v1759_v58  ;;  %v5344_v58 = vld [vmem:[#allocation101_spill] sm:$0xff] }
 0x8da   : > { %v1783_v42 = vadd.f32 %v5335_v52, %v1771_v27  ;;  %v5345_v27 = vld [vmem:[#allocation102_spill] sm:$0xff] }
 0x8dc   : > { %v4822_v22 = vld.sshfl [vmem:[#allocation1] sm:$0xff pattern:$0x75316420]  ;;  %v1795_v31 = vadd.f32 %v5336_v13, %v1783_v42  ;;  %v2972_v42 = vld [vmem:[%s3767_s23 + $0x3a0] sm:$0xf] }
 0x8dd   : > { %2930 = vst [vmem:[#allocation1] ss:$2 sm:$0xff] %v2926_v41  ;;  %v5341_v41 = vld [vmem:[#allocation98_spill] sm:$0xff]  ;;  %v2973_v13 = vld [vmem:[%s3767_s23 + $0x7a0] sm:$0xf] }
 0x8de   : > { %2932 = vst [vmem:[#allocation1 + $0x1] ss:$2 sm:$0xff] %v2927_v5  ;;  %v1807_v55 = vadd.f32 %v5337_v48, %v1795_v31  ;;  %v5342_v5 = vld [vmem:[#allocation99_spill] sm:$0xff]  ;;  %v5347_v31 = vld [vmem:[#allocation104_spill] sm:$0xff] }
 0x8e0   : > { %v1819_v32 = vadd.f32 %v5338_v12, %v1807_v55  ;;  %v2974_v55 = vmul.f32 %v2972_v42, %v2972_v42  ;;  %v2975_v12 = vmul.f32 %v2973_v13, %v2973_v13 }
 0x8e2   : > { %v1831_v51 = vadd.f32 %v5339_v18, %v1819_v32  ;;  %v5349_v32 = vld [vmem:[#allocation106_spill] sm:$0xff] }
 0x8e4   : > { %v1843_v33 = vadd.f32 %v5340_v56, %v1831_v51  ;;  %v5350_v51 = vld [vmem:[#allocation107_spill] sm:$0xff]  ;;  %v2984_v56 = vld [vmem:[%s3767_s23 + $0x3a4] sm:$0xf] }
 0x8e5   : > { %v4830_v63 = vld.sshfl [vmem:[#allocation1] sm:$0xff pattern:$0x75316420] }
 0x8e6   : > { %2942 = vst [vmem:[#allocation1] ss:$2 sm:$0xff] %v2938_v40  ;;  %v1855_v1 = vadd.f32 %v5341_v41, %v1843_v33  ;;  %v5351_v33 = vld [vmem:[#allocation108_spill] sm:$0xff] }
 0x8e7   : > { %2944 = vst [vmem:[#allocation1 + $0x1] ss:$2 sm:$0xff] %v2939_v35  ;;  %v5346_v35 = vld [vmem:[#allocation103_spill] sm:$0xff] }
 0x8e8   : > { %v1867_v8 = vadd.f32 %v5342_v5, %v1855_v1  ;;  %v2985_v1 = vld [vmem:[%s3767_s23 + $0x7a4] sm:$0xf] }
 0x8e9   : > { %v2987_v20 = vmul.f32 %v2985_v1, %v2985_v1 }
 0x8ea   : > { %v1879_v38 = vadd.f32 %v5343_v28, %v1867_v8  ;;  %v2986_v8 = vmul.f32 %v2984_v56, %v2984_v56  ;;  %v5353_v28 = vld [vmem:[#allocation110_spill] sm:$0xff] }
 0x8ec   : > { %v1891_v23 = vadd.f32 %v5344_v58, %v1879_v38 }
 0x8ee   : > { %v4839_v54 = vld.sshfl [vmem:[#allocation1] sm:$0xff pattern:$0x75316420]  ;;  %v1903_v40 = vadd.f32 %v5345_v27, %v1891_v23  ;;  %v5355_v23 = vld [vmem:[#allocation112_spill] sm:$0xff] }
 0x8ef   : > { %2954 = vst [vmem:[#allocation1] ss:$2 sm:$0xff] %v2950_v10 }
 0x8f0   : > { %2956 = vst [vmem:[#allocation1 + $0x1] ss:$2 sm:$0xff] %v2951_v26  ;;  %v1915_v52 = vadd.f32 %v5346_v35, %v1903_v40  ;;  %v2996_v40 = vld [vmem:[%s3767_s23 + $0x3a8] sm:$0xf] }
 0x8f1   : > { %v2997_v35 = vld [vmem:[%s3767_s23 + $0x7a8] sm:$0xf]  ;;  %v2998_v13 = vmul.f32 %v2996_v40, %v2996_v40  ;;  %v3021_v40 = vld [vmem:[%s3767_s23 + $0x7b0] sm:$0xf] }
 0x8f2   : > { %v1927_v48 = vadd.f32 %v5347_v31, %v1915_v52  ;;  %v5356_v52 = vld [vmem:[#allocation113_spill] sm:$0xff]  ;;  %v5357_v31 = vld [vmem:[#allocation114_spill] sm:$0xff] }
 0x8f4   : > { %v1939_v60 = vadd.f32 %v5348_v61, %v1927_v48  ;;  %v5358_v61 = vld [vmem:[#allocation115_spill] sm:$0xff] }
 0x8f6   : > { %v1951_v10 = vadd.f32 %v5349_v32, %v1939_v60  ;;  %v5359_v32 = vld [vmem:[#allocation116_spill] sm:$0xff] }
 0x8f7   : > { %v4847_v15 = vld.sshfl [vmem:[#allocation1] sm:$0xff pattern:$0x75316420] }
 0x8f8   : > { %2966 = vst [vmem:[#allocation1] ss:$2 sm:$0xff] %v2962_v14  ;;  %v1963_v26 = vadd.f32 %v5350_v51, %v1951_v10  ;;  %v3008_v51 = vld [vmem:[%s3767_s23 + $0x3ac] sm:$0xf] }
 0x8f9   : > { %2968 = vst [vmem:[#allocation1 + $0x1] ss:$2 sm:$0xff] %v2963_v47  ;;  %v5354_v47 = vld [vmem:[#allocation111_spill] sm:$0xff] }
 0x8fa   : > { %v1975_v41 = vadd.f32 %v5351_v33, %v1963_v26  ;;  %v5360_v26 = vld [vmem:[#allocation117_spill] sm:$0xff] }
 0x8fb   : > { %v3009_v33 = vld [vmem:[%s3767_s23 + $0x7ac] sm:$0xf] }
 0x8fc   : > { %v1987_v5 = vadd.f32 %v5352_v0, %v1975_v41  ;;  %v5361_v41 = vld [vmem:[#allocation118_spill] sm:$0xff]  ;;  %v3010_v0 = vmul.f32 %v3008_v51, %v3008_v51 }
 0x8fd   : > { %v3032_v51 = vld [vmem:[%s3767_s23 + $0x3b4] sm:$0xf] }
 0x8fe   : > { %v1999_v38 = vadd.f32 %v5353_v28, %v1987_v5  ;;  %v3011_v5 = vmul.f32 %v3009_v33, %v3009_v33  ;;  %v3033_v33 = vld [vmem:[%s3767_s23 + $0x7b4] sm:$0xf] }
 0x900   : > { %v4856_v18 = vld.sshfl [vmem:[#allocation1] sm:$0xff pattern:$0x75316420]  ;;  %v2011_v58 = vadd.f32 %v5354_v47, %v1999_v38  ;;  %v5363_v38 = vld [vmem:[#allocation120_spill] sm:$0xff] }
 0x901   : > { %2978 = vst [vmem:[#allocation1] ss:$2 sm:$0xff] %v2974_v55  ;;  %v2999_v55 = vmul.f32 %v2997_v35, %v2997_v35  ;;  %v5365_v35 = vld [vmem:[#allocation122_spill] sm:$0xff] }
 0x902   : > { %2980 = vst [vmem:[#allocation1 + $0x1] ss:$2 sm:$0xff] %v2975_v12  ;;  %v2023_v27 = vadd.f32 %v5355_v23, %v2011_v58  ;;  %v5364_v58 = vld [vmem:[#allocation121_spill] sm:$0xff] }
 0x904   : > { %v2035_v42 = vadd.f32 %v5356_v52, %v2023_v27  ;;  %v3020_v27 = vld [vmem:[%s3767_s23 + $0x3b0] sm:$0xf] }
 0x906   : > { %v2047_v48 = vadd.f32 %v5357_v31, %v2035_v42  ;;  %v3022_v42 = vmul.f32 %v3020_v27, %v3020_v27 }
 0x908   : > { %v2059_v60 = vadd.f32 %v5358_v61, %v2047_v48  ;;  %v3023_v48 = vmul.f32 %v3021_v40, %v3021_v40  ;;  %v3044_v40 = vld [vmem:[%s3767_s23 + $0x3b8] sm:$0xf] }
 0x909   : > { %v4864_v14 = vld.sshfl [vmem:[#allocation1] sm:$0xff pattern:$0x75316420] }
 0x90a   : > { %2990 = vst [vmem:[#allocation1] ss:$2 sm:$0xff] %v2986_v8  ;;  %v2071_v10 = vadd.f32 %v5359_v32, %v2059_v60  ;;  %v5362_v8 = vld [vmem:[#allocation119_spill] sm:$0xff]  ;;  %v5368_v32 = vld [vmem:[#allocation125_spill] sm:$0xff] }
 0x90b   : > { %2992 = vst [vmem:[#allocation1 + $0x1] ss:$2 sm:$0xff] %v2987_v20 }
 0x90c   : > { %v2083_v56 = vadd.f32 %v5360_v26, %v2071_v10  ;;  %v5369_v26 = vld [vmem:[#allocation126_spill] sm:$0xff] }
 0x90e   : > { %v2095_v1 = vadd.f32 %v5361_v41, %v2083_v56  ;;  %v5370_v41 = vld [vmem:[#allocation127_spill] sm:$0xff] }
 0x910   : > { %v2107_v20 = vadd.f32 %v5362_v8, %v2095_v1  ;;  %v5371_v8 = vld [vmem:[#allocation128_spill] sm:$0xff] }
 0x912   : > { %v4873_v12 = vld.sshfl [vmem:[#allocation1] sm:$0xff pattern:$0x75316420]  ;;  %v2119_v47 = vadd.f32 %v5363_v38, %v2107_v20 }
 0x913   : > { %3002 = vst [vmem:[#allocation1] ss:$2 sm:$0xff] %v2998_v13  ;;  %v5366_v13 = vld [vmem:[#allocation123_spill] sm:$0xff] }
 0x914   : > { %3004 = vst [vmem:[#allocation1 + $0x1] ss:$2 sm:$0xff] %v2999_v55  ;;  %v2131_v23 = vadd.f32 %v5364_v58, %v2119_v47  ;;  %v5367_v55 = vld [vmem:[#allocation124_spill] sm:$0xff]  ;;  %v5372_v47 = vld [vmem:[#allocation129_spill] sm:$0xff] }
 0x916   : > { %v2143_v52 = vadd.f32 %v5365_v35, %v2131_v23  ;;  %v5373_v23 = vld [vmem:[#allocation130_spill] sm:$0xff]  ;;  %v3045_v35 = vld [vmem:[%s3767_s23 + $0x7b8] sm:$0xf] }
 0x918   : > { %v2155_v31 = vadd.f32 %v5366_v13, %v2143_v52  ;;  %v5374_v52 = vld [vmem:[#allocation131_spill] sm:$0xff]  ;;  %v3046_v13 = vmul.f32 %v3044_v40, %v3044_v40 }
 0x91a   : > { %v2167_v61 = vadd.f32 %v5367_v55, %v2155_v31  ;;  %v5375_v31 = vld [vmem:[#allocation132_spill] sm:$0xff]  ;;  %v3047_v55 = vmul.f32 %v3045_v35, %v3045_v35  ;;  %v5382_v35 = vld [vmem:[#allocation139_spill] sm:$0xff] }
 0x91b   : > { %v4881_v28 = vld.sshfl [vmem:[#allocation1] sm:$0xff pattern:$0x75316420] }
 0x91c   : > { %3014 = vst [vmem:[#allocation1] ss:$2 sm:$0xff] %v3010_v0  ;;  %v2179_v10 = vadd.f32 %v5368_v32, %v2167_v61  ;;  %v3034_v0 = vmul.f32 %v3032_v51, %v3032_v51  ;;  %v5376_v61 = vld [vmem:[#allocation133_spill] sm:$0xff]  ;;  %v5377_v51 = vld [vmem:[#allocation134_spill] sm:$0xff] }
 0x91d   : > { %3016 = vst [vmem:[#allocation1 + $0x1] ss:$2 sm:$0xff] %v3011_v5  ;;  %v3035_v5 = vmul.f32 %v3033_v33, %v3033_v33  ;;  %v5378_v33 = vld [vmem:[#allocation135_spill] sm:$0xff] }
 0x91e   : > { %v2191_v56 = vadd.f32 %v5369_v26, %v2179_v10 }
 0x920   : > { %v2203_v1 = vadd.f32 %v5370_v41, %v2191_v56  ;;  %v3056_v56 = vld [vmem:[%s3767_s23 + $0x3bc] sm:$0xf] }
 0x922   : > { %v2215_v20 = vadd.f32 %v5371_v8, %v2203_v1  ;;  %v3057_v1 = vld [vmem:[%s3767_s23 + $0x7bc] sm:$0xf]  ;;  %v3058_v8 = vmul.f32 %v3056_v56, %v3056_v56 }
 0x924   : > { %v4890_v60 = vld.sshfl [vmem:[#allocation1] sm:$0xff pattern:$0x75316420]  ;;  %v2227_v58 = vadd.f32 %v5372_v47, %v2215_v20  ;;  %v3059_v20 = vmul.f32 %v3057_v1, %v3057_v1  ;;  %v5380_v47 = vld [vmem:[#allocation137_spill] sm:$0xff] }
 0x925   : > { %3026 = vst [vmem:[#allocation1] ss:$2 sm:$0xff] %v3022_v42 }
 0x926   : > { %3028 = vst [vmem:[#allocation1 + $0x1] ss:$2 sm:$0xff] %v3023_v48  ;;  %v2239_v27 = vadd.f32 %v5373_v23, %v2227_v58 }
 0x928   : > { %v2251_v42 = vadd.f32 %v5374_v52, %v2239_v27  ;;  %v5381_v27 = vld [vmem:[#allocation138_spill] sm:$0xff] }
 0x92a   : > { %v2263_v48 = vadd.f32 %v5375_v31, %v2251_v42  ;;  %v3068_v42 = vld [vmem:[%s3767_s23 + $0x3c0] sm:$0xf] }
 0x92b   : > { %v5383_v31 = vld [vmem:[#allocation140_spill] sm:$0xff] }
 0x92c   : > { %v2275_v32 = vadd.f32 %v5376_v61, %v2263_v48  ;;  %v5384_v61 = vld [vmem:[#allocation141_spill] sm:$0xff] }
 0x92d   : > { %v4898_v38 = vld.sshfl [vmem:[#allocation1] sm:$0xff pattern:$0x75316420] }
 0x92e   : > { %3038 = vst [vmem:[#allocation1] ss:$2 sm:$0xff] %v3034_v0  ;;  %v2287_v26 = vadd.f32 %v5377_v51, %v2275_v32  ;;  %v5379_v0 = vld [vmem:[#allocation136_spill] sm:$0xff] }
 0x92f   : > { %3040 = vst [vmem:[#allocation1 + $0x1] ss:$2 sm:$0xff] %v3035_v5 }
 0x930   : > { %v2299_v41 = vadd.f32 %v5378_v33, %v2287_v26  ;;  %v5385_v26 = vld [vmem:[#allocation142_spill] sm:$0xff] }
 0x932   : > { %v2311_v5 = vadd.f32 %v5379_v0, %v2299_v41  ;;  %v5386_v41 = vld [vmem:[#allocation143_spill] sm:$0xff]  ;;  %v3080_v0 = vld [vmem:[%s3767_s23 + $0x3c4] sm:$0xf] }
 0x934   : > { %v2323_v58 = vadd.f32 %v5380_v47, %v2311_v5  ;;  %v5387_v5 = vld [vmem:[#allocation144_spill] sm:$0xff]  ;;  %v5388_v47 = vld [vmem:[#allocation145_spill] sm:$0xff] }
 0x936   : > { %v4907_v10 = vld.sshfl [vmem:[#allocation1] sm:$0xff pattern:$0x75316420]  ;;  %v2335_v40 = vadd.f32 %v5381_v27, %v2323_v58  ;;  %v3082_v27 = vmul.f32 %v3080_v0, %v3080_v0 }
 0x937   : > { %3050 = vst [vmem:[#allocation1] ss:$2 sm:$0xff] %v3046_v13  ;;  %v3069_v13 = vld [vmem:[%s3767_s23 + $0x7c0] sm:$0xf] }
 0x938   : > { %3052 = vst [vmem:[#allocation1 + $0x1] ss:$2 sm:$0xff] %v3047_v55  ;;  %v2347_v52 = vadd.f32 %v5382_v35, %v2335_v40  ;;  %v3070_v55 = vmul.f32 %v3068_v42, %v3068_v42  ;;  %v3071_v51 = vmul.f32 %v3069_v13, %v3069_v13  ;;  %v5389_v35 = vld [vmem:[#allocation146_spill] sm:$0xff]  ;;  %v5390_v13 = vld [vmem:[#allocation147_spill] sm:$0xff] }
 0x93a   : > { %v2359_v48 = vadd.f32 %v5383_v31, %v2347_v52 }
 0x93c   : > { %v2371_v32 = vadd.f32 %v5384_v61, %v2359_v48  ;;  %v5391_v48 = vld [vmem:[#allocation148_spill] sm:$0xff]  ;;  %v3092_v61 = vld [vmem:[%s3767_s23 + $0x3c8] sm:$0xf] }
 0x93e   : > { %v2383_v56 = vadd.f32 %v5385_v26, %v2371_v32  ;;  %v3093_v32 = vld [vmem:[%s3767_s23 + $0x7c8] sm:$0xf] }
 0x93f   : > { %v4915_v23 = vld.sshfl [vmem:[#allocation1] sm:$0xff pattern:$0x75316420]  ;;  %v3095_v0 = vmul.f32 %v3093_v32, %v3093_v32 }
 0x940   : > { %3062 = vst [vmem:[#allocation1] ss:$2 sm:$0xff] %v3058_v8  ;;  %v2395_v1 = vadd.f32 %v5386_v41, %v2383_v56  ;;  %v3094_v56 = vmul.f32 %v3092_v61, %v3092_v61  ;;  %v5393_v41 = vld [vmem:[#allocation150_spill] sm:$0xff]  ;;  %v5398_v61 = vld [vmem:[#allocation155_spill] sm:$0xff] }
 0x941   : > { %3064 = vst [vmem:[#allocation1 + $0x1] ss:$2 sm:$0xff] %v3059_v20  ;;  %v3081_v20 = vld [vmem:[%s3767_s23 + $0x7c4] sm:$0xf] }
 0x942   : > { %v2407_v8 = vadd.f32 %v5387_v5, %v2395_v1  ;;  %v3083_v40 = vmul.f32 %v3081_v20, %v3081_v20  ;;  %v5394_v5 = vld [vmem:[#allocation151_spill] sm:$0xff] }
 0x944   : > { %v2419_v58 = vadd.f32 %v5388_v47, %v2407_v8  ;;  %v5395_v47 = vld [vmem:[#allocation152_spill] sm:$0xff] }
 0x946   : > { %v2431_v52 = vadd.f32 %v5389_v35, %v2419_v58 }
 0x948   : > { %v4924_v33 = vld.sshfl [vmem:[#allocation1] sm:$0xff pattern:$0x75316420]  ;;  %v2443_v31 = vadd.f32 %v5390_v13, %v2431_v52  ;;  %v3105_v52 = vld [vmem:[%s3767_s23 + $0x7cc] sm:$0xf]  ;;  %v5397_v13 = vld [vmem:[#allocation154_spill] sm:$0xff] }
 0x949   : > { %3074 = vst [vmem:[#allocation1] ss:$2 sm:$0xff] %v3070_v55 }
 0x94a   : > { %3076 = vst [vmem:[#allocation1 + $0x1] ss:$2 sm:$0xff] %v3071_v51  ;;  %v2455_v55 = vadd.f32 %v5391_v48, %v2443_v31  ;;  %v5392_v51 = vld [vmem:[#allocation149_spill] sm:$0xff] }
 0x94c   : > { %v2467_v26 = vadd.f32 %v5392_v51, %v2455_v55  ;;  %v3107_v55 = vmul.f32 %v3105_v52, %v3105_v52 }
 0x94e   : > { %v2479_v1 = vadd.f32 %v5393_v41, %v2467_v26  ;;  %v5399_v26 = vld [vmem:[#allocation156_spill] sm:$0xff] }
 0x950   : > { %v2491_v8 = vadd.f32 %v5394_v5, %v2479_v1  ;;  %v3117_v5 = vld [vmem:[%s3767_s23 + $0x7d0] sm:$0xf] }
 0x951   : > { %v4932_v42 = vld.sshfl [vmem:[#allocation1] sm:$0xff pattern:$0x75316420] }
 0x952   : > { %3086 = vst [vmem:[#allocation1] ss:$2 sm:$0xff] %v3082_v27  ;;  %v2503_v58 = vadd.f32 %v5395_v47, %v2491_v8  ;;  %v3104_v27 = vld [vmem:[%s3767_s23 + $0x3cc] sm:$0xf] }
 0x953   : > { %3088 = vst [vmem:[#allocation1 + $0x1] ss:$2 sm:$0xff] %v3083_v40  ;;  %v5396_v40 = vld [vmem:[#allocation153_spill] sm:$0xff]  ;;  %v3106_v48 = vmul.f32 %v3104_v27, %v3104_v27  ;;  %v3119_v27 = vmul.f32 %v3117_v5, %v3117_v5  ;;  %v3152_v5 = vld [vmem:[%s3767_s23 + $0x3dc] sm:$0xf] }
 0x954   : > { %v2515_v35 = vadd.f32 %v5396_v40, %v2503_v58 }
 0x956   : > { %v2527_v31 = vadd.f32 %v5397_v13, %v2515_v35  ;;  %v3128_v13 = vld [vmem:[%s3767_s23 + $0x3d4] sm:$0xf] }
 0x958   : > { %v2539_v32 = vadd.f32 %v5398_v61, %v2527_v31 }
 0x95a   : > { %v4941_v20 = vld.sshfl [vmem:[#allocation1] sm:$0xff pattern:$0x75316420]  ;;  %v2551_v41 = vadd.f32 %v5399_v26, %v2539_v32 }
 0x95b   : > { %3098 = vst [vmem:[#allocation1] ss:$2 sm:$0xff] %v3094_v56  ;;  %v5400_v56 = vld [vmem:[#allocation157_spill] sm:$0xff]  ;;  %v3140_v26 = vld [vmem:[%s3767_s23 + $0x3d8] sm:$0xf] }
 0x95c   : > { %3100 = vst [vmem:[#allocation1 + $0x1] ss:$2 sm:$0xff] %v3095_v0  ;;  %v2563_v1 = vadd.f32 %v5400_v56, %v2551_v41  ;;  %v3116_v0 = vld [vmem:[%s3767_s23 + $0x3d0] sm:$0xf]  ;;  %v3141_v41 = vld [vmem:[%s3767_s23 + $0x7d8] sm:$0xf]  ;;  %v3142_v56 = vmul.f32 %v3140_v26, %v3140_v26 }
 0x95d   : > { %v3118_v47 = vmul.f32 %v3116_v0, %v3116_v0  ;;  %v3189_v26 = vld [vmem:[%s3767_s23 + $0x7e8] sm:$0xf] }
 0x95e   : > { %v2575_v8 = vadd.f32 %v4576_v7, %v2563_v1  ;;  %v3143_v1 = vmul.f32 %v3141_v41, %v3141_v41 }
 0x960   : > { %v2587_v58 = vadd.f32 %v4584_v6, %v2575_v8  ;;  %v3153_v8 = vld [vmem:[%s3767_s23 + $0x7dc] sm:$0xf] }
 0x962   : > { %v2599_v40 = vadd.f32 %v4592_v53, %v2587_v58  ;;  %v3155_v58 = vmul.f32 %v3153_v8, %v3153_v8  ;;  %v3213_v8 = vld [vmem:[%s3767_s23 + $0x7f0] sm:$0xf] }
 0x963   : > { %v4949_v51 = vld.sshfl [vmem:[#allocation1] sm:$0xff pattern:$0x75316420] }
 0x964   : > { %3110 = vst [vmem:[#allocation1] ss:$2 sm:$0xff] %v3106_v48  ;;  %v2611_v52 = vadd.f32 %v4601_v46, %v2599_v40  ;;  %v3129_v48 = vld [vmem:[%s3767_s23 + $0x7d4] sm:$0xf]  ;;  %v3164_v40 = vld [vmem:[%s3767_s23 + $0x3e0] sm:$0xf] }
 0x965   : > { %3112 = vst [vmem:[#allocation1 + $0x1] ss:$2 sm:$0xff] %v3107_v55  ;;  %v3130_v55 = vmul.f32 %v3128_v13, %v3128_v13  ;;  %v3131_v61 = vmul.f32 %v3129_v48, %v3129_v48  ;;  %v3166_v13 = vmul.f32 %v3164_v40, %v3164_v40 }
 0x966   : > { %v2623_v31 = vadd.f32 %v4609_v9, %v2611_v52  ;;  %v3165_v52 = vld [vmem:[%s3767_s23 + $0x7e0] sm:$0xf] }
 0x968   : > { %v2635_v7 = vadd.f32 %v4618_v24, %v2623_v31  ;;  %v3167_v31 = vmul.f32 %v3165_v52, %v3165_v52 }
 0x96a   : > { %v2647_v6 = vadd.f32 %v4626_v34, %v2635_v7  ;;  %v3176_v7 = vld [vmem:[%s3767_s23 + $0x3e4] sm:$0xf] }
 0x96c   : > { %v4958_v35 = vld.sshfl [vmem:[#allocation1] sm:$0xff pattern:$0x75316420]  ;;  %v2659_v53 = vadd.f32 %v4635_v49, %v2647_v6 }
 0x96d   : > { %3122 = vst [vmem:[#allocation1] ss:$2 sm:$0xff] %v3118_v47  ;;  %v3154_v47 = vmul.f32 %v3152_v5, %v3152_v5 }
 0x96e   : > { %3124 = vst [vmem:[#allocation1 + $0x1] ss:$2 sm:$0xff] %v3119_v27  ;;  %v2671_v46 = vadd.f32 %v4643_v59, %v2659_v53 }
 0x970   : > { %v2683_v9 = vadd.f32 %v4652_v11, %v2671_v46  ;;  %v3188_v46 = vld [vmem:[%s3767_s23 + $0x3e8] sm:$0xf] }
 0x971   : > { %v3190_v41 = vmul.f32 %v3188_v46, %v3188_v46 }
 0x972   : > { %v2695_v24 = vadd.f32 %v4660_v30, %v2683_v9  ;;  %v3191_v9 = vmul.f32 %v3189_v26, %v3189_v26 }
 0x974   : > { %v2707_v34 = vadd.f32 %v4669_v29, %v2695_v24  ;;  %v3200_v24 = vld [vmem:[%s3767_s23 + $0x3ec] sm:$0xf] }
 0x975   : > { %v4966_v32 = vld.sshfl [vmem:[#allocation1] sm:$0xff pattern:$0x75316420] }
 0x976   : > { %3134 = vst [vmem:[#allocation1] ss:$2 sm:$0xff] %v3130_v55  ;;  %v2719_v49 = vadd.f32 %v4677_v3, %v2707_v34  ;;  %v3177_v55 = vld [vmem:[%s3767_s23 + $0x7e4] sm:$0xf] }
 0x977   : > { %3136 = vst [vmem:[#allocation1 + $0x1] ss:$2 sm:$0xff] %v3131_v61  ;;  %v3178_v61 = vmul.f32 %v3176_v7, %v3176_v7  ;;  %v3179_v6 = vmul.f32 %v3177_v55, %v3177_v55  ;;  %v3249_v7 = vld [vmem:[%s3767_s23 + $0x7fc] sm:$0xf] }
 0x978   : > { %v2731_v59 = vadd.f32 %v4686_v50, %v2719_v49  ;;  %v3251_v55 = vmul.f32 %v3249_v7, %v3249_v7 }
 0x97a   : > { %v2743_v11 = vadd.f32 %v4694_v17, %v2731_v59  ;;  %v3212_v59 = vld [vmem:[%s3767_s23 + $0x3f0] sm:$0xf] }
 0x97c   : > { %v2755_v30 = vadd.f32 %v4703_v37, %v2743_v11  ;;  %v3214_v11 = vmul.f32 %v3212_v59, %v3212_v59 }
 0x97e   : > { %v4975_v0 = vld.sshfl [vmem:[#allocation1] sm:$0xff pattern:$0x75316420]  ;;  %v2767_v29 = vadd.f32 %v4711_v16, %v2755_v30  ;;  %v3224_v30 = vld [vmem:[%s3767_s23 + $0x3f4] sm:$0xf] }
 0x97f   : > { %3146 = vst [vmem:[#allocation1] ss:$2 sm:$0xff] %v3142_v56 }
 0x980   : > { %3148 = vst [vmem:[#allocation1 + $0x1] ss:$2 sm:$0xff] %v3143_v1  ;;  %v2779_v3 = vadd.f32 %v4720_v21, %v2767_v29  ;;  %v3201_v1 = vld [vmem:[%s3767_s23 + $0x7ec] sm:$0xf]  ;;  %v3225_v29 = vld [vmem:[%s3767_s23 + $0x7f4] sm:$0xf] }
 0x981   : > { %v3203_v49 = vmul.f32 %v3201_v1, %v3201_v1  ;;  %v3227_v40 = vmul.f32 %v3225_v29, %v3225_v29 }
 0x982   : > { %v2791_v50 = vadd.f32 %v4728_v25, %v2779_v3 }
 0x984   : > { %v2803_v17 = vadd.f32 %v4737_v39, %v2791_v50  ;;  %v3236_v50 = vld [vmem:[%s3767_s23 + $0x3f8] sm:$0xf] }
 0x986   : > { %v2815_v37 = vadd.f32 %v4745_v2, %v2803_v17  ;;  %v3238_v17 = vmul.f32 %v3236_v50, %v3236_v50 }
 0x987   : > { %v4983_v27 = vld.sshfl [vmem:[#allocation1] sm:$0xff pattern:$0x75316420] }
 0x988   : > { %3158 = vst [vmem:[#allocation1] ss:$2 sm:$0xff] %v3154_v47  ;;  %v2827_v16 = vadd.f32 %v4754_v4, %v2815_v37  ;;  %v3215_v47 = vmul.f32 %v3213_v8, %v3213_v8 }
 0x989   : > { %3160 = vst [vmem:[#allocation1 + $0x1] ss:$2 sm:$0xff] %v3155_v58 }
 0x98a   : > { %v2839_v21 = vadd.f32 %v4762_v45, %v2827_v16  ;;  %v3248_v16 = vld [vmem:[%s3767_s23 + $0x3fc] sm:$0xf] }
 0x98c   : > { %v2851_v25 = vadd.f32 %v4771_v62, %v2839_v21 }
 0x98e   : > { %v2863_v39 = vadd.f32 %v4779_v19, %v2851_v25 }
 0x990   : > { %v4992_v48 = vld.sshfl [vmem:[#allocation1] sm:$0xff pattern:$0x75316420]  ;;  %v2875_v2 = vadd.f32 %v4788_v43, %v2863_v39 }
 0x991   : > { %3170 = vst [vmem:[#allocation1] ss:$2 sm:$0xff] %v3166_v13  ;;  %v3237_v13 = vld [vmem:[%s3767_s23 + $0x7f8] sm:$0xf] }
 0x992   : > { %3172 = vst [vmem:[#allocation1 + $0x1] ss:$2 sm:$0xff] %v3167_v31  ;;  %v2887_v4 = vadd.f32 %v4796_v57, %v2875_v2  ;;  %v3239_v31 = vmul.f32 %v3237_v13, %v3237_v13 }
 0x994   : > { %v2899_v45 = vadd.f32 %v4805_v36, %v2887_v4  ;;  %v3202_v36 = vmul.f32 %v3200_v24, %v3200_v24 }
 0x996   : > { %v2911_v62 = vadd.f32 %v4813_v44, %v2899_v45 }
 0x998   : > { %v2923_v19 = vadd.f32 %v4822_v22, %v2911_v62 }
 0x999   : > { %v5000_v53 = vld.sshfl [vmem:[#allocation1] sm:$0xff pattern:$0x75316420] }
 0x99a   : > { %3182 = vst [vmem:[#allocation1] ss:$2 sm:$0xff] %v3178_v61  ;;  %v2935_v43 = vadd.f32 %v4830_v63, %v2923_v19 }
 0x99b   : > { %3184 = vst [vmem:[#allocation1 + $0x1] ss:$2 sm:$0xff] %v3179_v6 }
 0x99c   : > { %v2947_v57 = vadd.f32 %v4839_v54, %v2935_v43 }
 0x99e   : > { %v2959_v34 = vadd.f32 %v4847_v15, %v2947_v57 }
 0x9a0   : > { %v2971_v44 = vadd.f32 %v4856_v18, %v2959_v34 }
 0x9a2   : > { %v3185_v56 = vld.sshfl [vmem:[#allocation1] sm:$0xff pattern:$0x75316420]  ;;  %v2983_v22 = vadd.f32 %v4864_v14, %v2971_v44 }
 0x9a3   : > { %3194 = vst [vmem:[#allocation1] ss:$2 sm:$0xff] %v3190_v41 }
 0x9a4   : > { %3196 = vst [vmem:[#allocation1 + $0x1] ss:$2 sm:$0xff] %v3191_v9  ;;  %v2995_v63 = vadd.f32 %v4873_v12, %v2983_v22 }
 0x9a6   : > { %v3007_v54 = vadd.f32 %v4881_v28, %v2995_v63  ;;  %v3226_v28 = vmul.f32 %v3224_v30, %v3224_v30 }
 0x9a8   : > { %v3019_v15 = vadd.f32 %v4890_v60, %v3007_v54 }
 0x9aa   : > { %v3031_v58 = vadd.f32 %v4898_v38, %v3019_v15 }
 0x9ab   : > { %v3197_v5 = vld.sshfl [vmem:[#allocation1] sm:$0xff pattern:$0x75316420] }
 0x9ac   : > { %3206 = vst [vmem:[#allocation1] ss:$2 sm:$0xff] %v3202_v36  ;;  %v3043_v14 = vadd.f32 %v4907_v10, %v3031_v58 }
 0x9ad   : > { %3208 = vst [vmem:[#allocation1 + $0x1] ss:$2 sm:$0xff] %v3203_v49 }
 0x9ae   : > { %v3055_v12 = vadd.f32 %v4915_v23, %v3043_v14 }
 0x9b0   : > { %v3067_v3 = vadd.f32 %v4924_v33, %v3055_v12 }
 0x9b2   : > { %v3079_v60 = vadd.f32 %v4932_v42, %v3067_v3 }
 0x9b4   : > { %v3209_v18 = vld.sshfl [vmem:[#allocation1] sm:$0xff pattern:$0x75316420]  ;;  %v3091_v38 = vadd.f32 %v4941_v20, %v3079_v60 }
 0x9b5   : > { %3218 = vst [vmem:[#allocation1] ss:$2 sm:$0xff] %v3214_v11 }
 0x9b6   : > { %3220 = vst [vmem:[#allocation1 + $0x1] ss:$2 sm:$0xff] %v3215_v47  ;;  %v3103_v10 = vadd.f32 %v4949_v51, %v3091_v38 }
 0x9b8   : > { %v3115_v23 = vadd.f32 %v4958_v35, %v3103_v10  ;;  %v3250_v35 = vmul.f32 %v3248_v16, %v3248_v16 }
 0x9ba   : > { %v3127_v33 = vadd.f32 %v4966_v32, %v3115_v23 }
 0x9bc   : > { %v3139_v42 = vadd.f32 %v4975_v0, %v3127_v33 }
 0x9bd   : > { %v3221_v52 = vld.sshfl [vmem:[#allocation1] sm:$0xff pattern:$0x75316420] }
 0x9be   : > { %3230 = vst [vmem:[#allocation1] ss:$2 sm:$0xff] %v3226_v28  ;;  %v3151_v20 = vadd.f32 %v4983_v27, %v3139_v42 }
 0x9bf   : > { %3232 = vst [vmem:[#allocation1 + $0x1] ss:$2 sm:$0xff] %v3227_v40 }
 0x9c0   : > { %v3163_v51 = vadd.f32 %v4992_v48, %v3151_v20 }
 0x9c2   : > { %v3175_v21 = vadd.f32 %v5000_v53, %v3163_v51 }
 0x9c4   : > { %v3187_v25 = vadd.f32 %v3185_v56, %v3175_v21 }
 0x9c6   : > { %v3233_v37 = vld.sshfl [vmem:[#allocation1] sm:$0xff pattern:$0x75316420]  ;;  %v3199_v61 = vadd.f32 %v3197_v5, %v3187_v25 }
 0x9c7   : > { %3242 = vst [vmem:[#allocation1] ss:$2 sm:$0xff] %v3238_v17 }
 0x9c8   : > { %3244 = vst [vmem:[#allocation1 + $0x1] ss:$2 sm:$0xff] %v3239_v31  ;;  %v3211_v0 = vadd.f32 %v3209_v18, %v3199_v61 }
 0x9ca   : > { %v3223_v27 = vadd.f32 %v3221_v52, %v3211_v0 }
 0x9cc   : > { %v3235_v48 = vadd.f32 %v3233_v37, %v3223_v27 }
 0x9cf   : > { %v3245_v32 = vld.sshfl [vmem:[#allocation1] sm:$0xff pattern:$0x75316420] }
 0x9d0   : > { %3254 = vst [vmem:[#allocation1] ss:$2 sm:$0xff] %v3250_v35  ;;  %v3247_v6 = vadd.f32 %v3245_v32, %v3235_v48 }
 0x9d1   : > { %3256 = vst [vmem:[#allocation1 + $0x1] ss:$2 sm:$0xff] %v3251_v55 }
 0x9d8   : > { %v3257_v39 = vld.sshfl [vmem:[#allocation1] sm:$0xff pattern:$0x75316420] }
 0x9d9   : > { %v3259_v53 = vadd.f32 %v3257_v39, %v3247_v6 }
 0x9db   : > { %3260 = vst [vmem:[%s3776_s21] sm:$0xff] %v3259_v53 }
 0x9dc   : > { %3540 = shalt.err (!%p3537_p0)
}
 0x9dd   : > { %3390 = dma.vmem_to_hbm [thread:$0]  (%p3744_p12), %s3277_s18, 128, %s3279_s28, %s3262_s29  }
 0x9de PF: > { %p3396_p2 = scmp.ge.s32.totalorder %s3635_s16, 2  ;;  %s3290_s19 = sand.u32 1, %s3595_s6  }
 0x9df   : > { %s3291_s20 = scalar_lea.sflag [#allocation4], %s3290_s19 }
 0x9e0   : > { %p3393_p3 = pnand %p3396_p2, %p3752_p1 }
 0x9e2   : > { %p3394_p4 = pneg %p3393_p3 }
 0x9e4   : > { %3590 = dma.done.wait (%p3394_p4), %s3291_s20, 128  }
 0x9e5   : > { %3592 = vsyncadd (%p3394_p4), %s3291_s20, 4294967168  ;;  %s17_s16 = sadd.s32 1, %s3635_s16   ;;  %s5401_s4 = sld [smem:[#allocation8_spill]] }
 0x9e6   : > { %p14_p5 = scmp.ge.s32.totalorder %s17_s16, 6   ;;  %s5402_s21 = sld [smem:[#allocation9_spill]] }
 0x9e7   : > { %s5403_s6 = smov %s3599_s7  ;;  %s5404_s7 = smov %s3603_s8 }
 0x9e8   : > { %s5405_s8 = smov %s3739_s2  ;;  %s5406_s9 = smov %s3611_s10 }
 0x9e9   : > { %s5407_s10 = smov %s3615_s11  ;;  %s5408_s11 = smov %s3742_s3 }
 0x9ea   : > { %s5409_s12 = smov %s3627_s14  ;;  %s5410_s13 = smov %s3631_s15 }
 0x9eb   : > { %s5411_s14 = smov %s5401_s4  ;;  %16 = sbr.rel (!%p14_p5) target bundleno = 9 (0x9), region = 329 }
 0x9ec   : > { %s5412_s15 = smov %s5402_s21 }
 0x9f0   :  { %3297 = vsyncpa [#allocation3], 1 }
 0x9f1   :  { %3299 = vsyncpa [#allocation3 + $0x1], 1 }
 0x9f2   :  { %3300 = vsyncpa [#allocation4], 1 }
 0x9f3   :  { %3302 = vsyncpa [#allocation4 + $0x1], 1 }

</bundles_post_ra>
